<compile_context>
chip_gen: v6e
topology: v6e:2x2x1
jax: 0.10.0
libtpu: 0.0.40
codegen_flags: <defaults>
</compile_context>

<pallas_src>
import jax
import jax.numpy as jnp
from jax.experimental import pallas as pl
from jax.experimental.pallas import tpu as pltpu


# ----------------------------------------------------------------------------
# Fused kernel: shared point-MLP + global max-pool + classifier head
# ----------------------------------------------------------------------------
def _pointnet_kernel(x_ref,
                     w1_ref, b1_ref, w2_ref, b2_ref, w3_ref, b3_ref,
                     w4_ref, b4_ref, w5_ref, b5_ref,
                     f1w_ref, f1b_ref, f2w_ref, f2b_ref, f3w_ref, f3b_ref,
                     logits_ref, gfeat_ref):
    """Grid: (batch tiles ["parallel"], point tiles ["arbitrary" reduction]).

    x_ref      : (TB, TN, 3)    current tile of points
    w*/b*      : folded conv(1x1)+BN weights of the shared point-MLP
                 (64-wide layers zero-padded to 128 columns)
    f*         : folded classifier-head weights (logits padded to 128 lanes)
    logits_ref : (TB, 1, Cpad)  output block (written on the last point tile)
    gfeat_ref  : (TB, 1024)     VMEM scratch running max-pool accumulator
    """
    t = pl.program_id(1)
    nt = pl.num_programs(1)

    @pl.when(t == 0)
    def _init():
        # All pooled activations are post-ReLU (>= 0), so 0 is a valid identity
        # for the running max.  (Would need -inf if that ReLU were removed.)
        gfeat_ref[...] = jnp.zeros_like(gfeat_ref)

    TB, TN, CIN = x_ref.shape          # CIN == 3
    M = TB * TN

    # ---- layer 1 (3 -> 64, padded to 128): three broadcast FMAs on the VPU.
    x = x_ref[...].astype(jnp.float32).reshape(M, CIN)          # (M, 3)
    w1 = w1_ref[...].astype(jnp.float32)                        # (3, 128)
    h = (x[:, 0:1] * w1[0:1, :] + x[:, 1:2] * w1[1:2, :]
         + x[:, 2:3] * w1[2:3, :] + b1_ref[...])
    h = jnp.maximum(h, 0.0)                                     # (M, 128) f32

    # ---- shared point-MLP layers 2..4 on the MXU; activations stay in the
    #      weight (compute) dtype, accumulation + bias + ReLU in f32.
    def dense_relu(a, w_ref, b_ref):
        y = jnp.dot(a.astype(w_ref.dtype), w_ref[...],
                    preferred_element_type=jnp.float32) + b_ref[...]
        return jnp.maximum(y, 0.0).astype(w_ref.dtype)

    h = dense_relu(h, w2_ref, b2_ref)            # (M, 128)  mlp1[1]
    h = dense_relu(h, w3_ref, b3_ref)            # (M, 128)  mlp2[0]
    h = dense_relu(h, w4_ref, b4_ref)            # (M, 128)  mlp2[1]

    # ---- layer 5 (128 -> 1024): column-tiled with the max-pool fused per
    #      slice so the full (M, 1024) f32 activation never exists.
    cout = gfeat_ref.shape[-1]                   # 1024
    chunk = 256 if cout % 256 == 0 else cout
    for s in range(0, cout, chunk):
        y = jnp.dot(h, w5_ref[:, s:s + chunk],
                    preferred_element_type=jnp.float32) + b5_ref[:, s:s + chunk]
        y = jnp.maximum(y, 0.0)                               # (M, chunk) f32
        tmax = jnp.max(y.reshape(TB, TN, chunk), axis=1)      # (TB, chunk)
        gfeat_ref[:, s:s + chunk] = jnp.maximum(gfeat_ref[:, s:s + chunk], tmax)

    # ---- classifier head (Linear+BN+ReLU[+Dropout=id]) x2 + final Linear,
    #      fused into the last point-tile step for this batch block.
    @pl.when(t == nt - 1)
    def _head():
        g = gfeat_ref[...]                                     # (TB, 1024) f32
        z = jnp.maximum(
            jnp.dot(g.astype(f1w_ref.dtype), f1w_ref[...],
                    preferred_element_type=jnp.float32) + f1b_ref[...], 0.0)
        z = jnp.maximum(
            jnp.dot(z.astype(f2w_ref.dtype), f2w_ref[...],
                    preferred_element_type=jnp.float32) + f2b_ref[...], 0.0)
        out = (jnp.dot(z.astype(f3w_ref.dtype), f3w_ref[...],
                       preferred_element_type=jnp.float32) + f3b_ref[...])
        logits_ref[...] = out.reshape(logits_ref.shape)


# ----------------------------------------------------------------------------
# Wrapper
# ----------------------------------------------------------------------------
def _pick_tile(total, target, align=8):
    """Largest tile <= target that divides `total` and is `align`-aligned;
    falls back to the full extent (always a legal block size)."""
    t = min(total, max(align, (min(total, target) // align) * align))
    while t > align and total % t:
        t -= align
    if total % t:
        t = total
    return t


def _vmem_limit_bytes():
    # Generation-aware scoped-VMEM budget: ~3/4 of physical, capped at 64 MiB
    # (-> 64 MiB on v5e/v6e with 128 MiB physical, 48 MiB on v7x with 64 MiB).
    try:
        cap = int(pltpu.get_tpu_info().vmem_capacity_bytes)
        return int(min(64 * 1024 * 1024, (cap * 3) // 4))
    except Exception:
        return 32 * 1024 * 1024


def pointnet_classification(x, params, *, tile_b=1, tile_n=None,
                            compute_dtype=jnp.float32, head_dtype=None):
    """x: (B, N, 3) float32.  Returns (logits, None, None) like the torch
    module with input_transform=False, feature_transform=False."""
    B, N, C = x.shape
    assert C == 3
    (w1, b1, w2, b2, w3, b3, w4, b4, w5, b5,
     f1w, f1b, f2w, f2b, f3w, f3b) = params
    num_classes = f3w.shape[1]

    assert B % tile_b == 0
    if tile_n is None:
        # size M = tile_b * tile_n to ~2048 MXU rows per grid step
        tile_n = _pick_tile(N, max(8, 2048 // tile_b))
    assert N % tile_n == 0
    assert tile_b == 1 or tile_n % 8 == 0 or tile_n == N

    cdt = compute_dtype
    hdt = compute_dtype if head_dtype is None else head_dtype  # review suggests bf16 head

    def pad_to(a, rows, cols):
        return jnp.pad(a, ((0, rows - a.shape[0]), (0, cols - a.shape[1])))

    # Lane-dense (128-wide) zero-padding of the 64-wide layers (exact: padded
    # activation columns are identically 0 and padded weight rows are 0).
    mlp_params = (
        pad_to(w1, 3, 128).astype(cdt),   pad_to(b1, 1, 128),
        pad_to(w2, 128, 128).astype(cdt), pad_to(b2, 1, 128),
        pad_to(w3, 128, 128).astype(cdt), pad_to(b3, 1, 128),
        pad_to(w4, 128, 128).astype(cdt), b4,
        w5.astype(cdt),                   b5,
    )

    # Classifier head: pad logits to a lane-dense 128-multiple; slice outside.
    c_pad = ((num_classes + 127) // 128) * 128
    head_params = (
        f1w.astype(hdt), f1b,
        f2w.astype(hdt), f2b,
        pad_to(f3w, f3w.shape[0], c_pad).astype(hdt), pad_to(f3b, 1, c_pad),
    )

    consts = mlp_params + head_params

    def const_spec(a):
        nd = a.ndim
        return pl.BlockSpec(a.shape, lambda b, t, _nd=nd: (0,) * _nd)

    flops = (2 * B * N * (3 * 64 + 64 * 64 + 64 * 64 + 64 * 128 + 128 * 1024)
             + 2 * B * (1024 * 512 + 512 * 256 + 256 * num_classes))
    bytes_accessed = (int(x.size) * x.dtype.itemsize
                      + sum(int(p.size) * p.dtype.itemsize for p in consts)
                      + B * c_pad * 4)

    logits_pad = pl.pallas_call(
        _pointnet_kernel,
        out_shape=jax.ShapeDtypeStruct((B, 1, c_pad), jnp.float32),
        grid=(B // tile_b, N // tile_n),
        in_specs=[pl.BlockSpec((tile_b, tile_n, C), lambda b, t: (b, t, 0))]
                 + [const_spec(p) for p in consts],
        out_specs=pl.BlockSpec((tile_b, 1, c_pad), lambda b, t: (b, 0, 0)),
        scratch_shapes=[pltpu.VMEM((tile_b, w5.shape[1]), jnp.float32)],
        compiler_params=pltpu.CompilerParams(
            dimension_semantics=("parallel", "arbitrary"),
            vmem_limit_bytes=_vmem_limit_bytes()),
        cost_estimate=pl.CostEstimate(
            flops=int(flops), transcendentals=0,
            bytes_accessed=int(bytes_accessed)),
    )(x.astype(jnp.float32), *consts)

    logits = logits_pad[:, 0, :num_classes]
    return logits, None, None


# ----------------------------------------------------------------------------
# Synthetic parameters (inference-mode BN folded) and pure-JAX reference
# ----------------------------------------------------------------------------
def init_params(key, num_classes):
    eps = 1e-5
    keys = iter(jax.random.split(key, 64))

    def uinit(shape, fan_in):
        bound = 1.0 / float(fan_in) ** 0.5
        return jax.random.uniform(next(keys), shape, jnp.float32, -bound, bound)

    def layer(cin, cout, with_bn=True):
        # weight stored as (C_in, C_out)  (== torch (C_out, C_in[,1]) transposed)
        w = uinit((cin, cout), cin)
        b = uinit((1, cout), cin)
        if not with_bn:
            return w, b
        gamma = 1.0 + 0.1 * jax.random.normal(next(keys), (cout,), jnp.float32)
        beta = 0.1 * jax.random.normal(next(keys), (cout,), jnp.float32)
        # BN eval: y = x * gamma / sqrt(var + eps) + beta   (mean=0, var=1)
        scale = gamma / jnp.sqrt(1.0 + eps)
        return w * scale[None, :], b * scale[None, :] + beta[None, :]

    w1, b1 = layer(3, 64)          # mlp1: Conv1d(3,64,1)+BN
    w2, b2 = layer(64, 64)         # mlp1: Conv1d(64,64,1)+BN
    w3, b3 = layer(64, 64)         # mlp2: Conv1d(64,64,1)+BN
    w4, b4 = layer(64, 128)        # mlp2: Conv1d(64,128,1)+BN
    w5, b5 = layer(128, 1024)      # mlp2: Conv1d(128,1024,1)+BN
    f1w, f1b = layer(1024, 512)    # classifier: Linear+BN
    f2w, f2b = layer(512, 256)     # classifier: Linear+BN
    f3w, f3b = layer(256, num_classes, with_bn=False)   # final Linear
    return (w1, b1, w2, b2, w3, b3, w4, b4, w5, b5,
            f1w, f1b, f2w, f2b, f3w, f3b)


def reference(x, params):
    (w1, b1, w2, b2, w3, b3, w4, b4, w5, b5,
     f1w, f1b, f2w, f2b, f3w, f3b) = params
    h = x
    for w, b in ((w1, b1), (w2, b2), (w3, b3), (w4, b4), (w5, b5)):
        h = jax.nn.relu(jnp.einsum('bnc,cd->bnd', h, w) + b)
    g = jnp.max(h, axis=1)                         # (B, 1024) global feature
    z = jax.nn.relu(g @ f1w + f1b)
    z = jax.nn.relu(z @ f2w + f2b)
    return z @ f3w + f3b


if __name__ == "__main__":
    key = jax.random.PRNGKey(0)
    kx, kp = jax.random.split(key)

    B, N, NUM_CLASSES = 2, 64, 16
    x = jax.random.normal(kx, (B, N, 3), jnp.float32)
    params = init_params(kp, NUM_CLASSES)
    ref = reference(x, params)

    # f32 path (exact match vs. reference)
    logits, in_T, feat_T = pointnet_classification(x, params)
    logits = jax.block_until_ready(logits)
    assert logits.shape == (B, NUM_CLASSES)
    assert in_T is None and feat_T is None
    assert jnp.allclose(logits, ref, rtol=1e-4, atol=1e-4), (
        float(jnp.max(jnp.abs(logits - ref))))

    # bf16 matmul/activation path (v6e/v7x optimization; f32 accumulation)
    logits_bf16, _, _ = pointnet_classification(
        x, params, compute_dtype=jnp.bfloat16)
    logits_bf16 = jax.block_until_ready(logits_bf16)
    assert jnp.allclose(logits_bf16, ref, rtol=1e-1, atol=1e-1), (
        float(jnp.max(jnp.abs(logits_bf16 - ref))))

    print("KERNEL_OK")
</pallas_src>

<mosaic_0001>
module attributes {stable_mosaic.version = 11 : i64} {
  func.func @_pointnet_kernel(%arg0: i32, %arg1: i32, %arg2: memref<1x64x3xf32, #tpu.memory_space<vmem>>, %arg3: memref<3x128xf32, #tpu.memory_space<vmem>>, %arg4: memref<1x128xf32, #tpu.memory_space<vmem>>, %arg5: memref<128x128xf32, #tpu.memory_space<vmem>>, %arg6: memref<1x128xf32, #tpu.memory_space<vmem>>, %arg7: memref<128x128xf32, #tpu.memory_space<vmem>>, %arg8: memref<1x128xf32, #tpu.memory_space<vmem>>, %arg9: memref<128x128xf32, #tpu.memory_space<vmem>>, %arg10: memref<1x128xf32, #tpu.memory_space<vmem>>, %arg11: memref<128x1024xf32, #tpu.memory_space<vmem>>, %arg12: memref<1x1024xf32, #tpu.memory_space<vmem>>, %arg13: memref<1024x512xf32, #tpu.memory_space<vmem>>, %arg14: memref<1x512xf32, #tpu.memory_space<vmem>>, %arg15: memref<512x256xf32, #tpu.memory_space<vmem>>, %arg16: memref<1x256xf32, #tpu.memory_space<vmem>>, %arg17: memref<256x128xf32, #tpu.memory_space<vmem>>, %arg18: memref<1x128xf32, #tpu.memory_space<vmem>>, %arg19: memref<1x1x128xf32, #tpu.memory_space<vmem>>, %arg20: memref<1x1024xf32, #tpu.memory_space<vmem>>) attributes {dimension_semantics = [#tpu.dimension_semantics<parallel>, #tpu.dimension_semantics<arbitrary>], iteration_bounds = array<i64: 2, 1>, scalar_prefetch = 0 : i64, scratch_operands = 1 : i64, tpu.core_type = #tpu.core_type<tc>, window_params = [{transform_indices = @transform_0, window_bounds = array<i64: 1, 64, 3>}, {pipeline_mode = #tpu.pipeline_mode<synchronous>, transform_indices = @transform_1, window_bounds = array<i64: 3, 128>}, {pipeline_mode = #tpu.pipeline_mode<synchronous>, transform_indices = @transform_2, window_bounds = array<i64: 1, 128>}, {pipeline_mode = #tpu.pipeline_mode<synchronous>, transform_indices = @transform_3, window_bounds = array<i64: 128, 128>}, {pipeline_mode = #tpu.pipeline_mode<synchronous>, transform_indices = @transform_4, window_bounds = array<i64: 1, 128>}, {pipeline_mode = #tpu.pipeline_mode<synchronous>, transform_indices = @transform_5, window_bounds = array<i64: 128, 128>}, {pipeline_mode = #tpu.pipeline_mode<synchronous>, transform_indices = @transform_6, window_bounds = array<i64: 1, 128>}, {pipeline_mode = #tpu.pipeline_mode<synchronous>, transform_indices = @transform_7, window_bounds = array<i64: 128, 128>}, {pipeline_mode = #tpu.pipeline_mode<synchronous>, transform_indices = @transform_8, window_bounds = array<i64: 1, 128>}, {pipeline_mode = #tpu.pipeline_mode<synchronous>, transform_indices = @transform_9, window_bounds = array<i64: 128, 1024>}, {pipeline_mode = #tpu.pipeline_mode<synchronous>, transform_indices = @transform_10, window_bounds = array<i64: 1, 1024>}, {pipeline_mode = #tpu.pipeline_mode<synchronous>, transform_indices = @transform_11, window_bounds = array<i64: 1024, 512>}, {pipeline_mode = #tpu.pipeline_mode<synchronous>, transform_indices = @transform_12, window_bounds = array<i64: 1, 512>}, {pipeline_mode = #tpu.pipeline_mode<synchronous>, transform_indices = @transform_13, window_bounds = array<i64: 512, 256>}, {pipeline_mode = #tpu.pipeline_mode<synchronous>, transform_indices = @transform_14, window_bounds = array<i64: 1, 256>}, {pipeline_mode = #tpu.pipeline_mode<synchronous>, transform_indices = @transform_15, window_bounds = array<i64: 256, 128>}, {pipeline_mode = #tpu.pipeline_mode<synchronous>, transform_indices = @transform_16, window_bounds = array<i64: 1, 128>}, {transform_indices = @transform_17, window_bounds = array<i64: 1, 1, 128>}]} {
    %c0_i32 = arith.constant 0 : i32
    %0 = arith.cmpi eq, %arg1, %c0_i32 : i32
    %1 = arith.extui %0 : i1 to i32
    %c0_i32_0 = arith.constant 0 : i32
    %2 = arith.cmpi ne, %1, %c0_i32_0 : i32
    scf.if %2 {
      %cst_68 = arith.constant 0.000000e+00 : f32
      %100 = vector.broadcast %cst_68 : f32 to vector<1x1024xf32>
      %c0_69 = arith.constant 0 : index
      %c0_70 = arith.constant 0 : index
      %101 = vector.load %arg20[%c0_69, %c0_70] : memref<1x1024xf32, #tpu.memory_space<vmem>>, vector<1x1024xf32>
      tpu.vector_store %arg20[%c0_69, %c0_70], %100 {strides = array<i32>} : memref<1x1024xf32, #tpu.memory_space<vmem>>, vector<1x1024xf32>,
    } else {
    }
    %c0 = arith.constant 0 : index
    %c0_1 = arith.constant 0 : index
    %c0_2 = arith.constant 0 : index
    %3 = vector.load %arg2[%c0, %c0_1, %c0_2] : memref<1x64x3xf32, #tpu.memory_space<vmem>>, vector<1x64x3xf32>
    %4 = vector.shape_cast %3 : vector<1x64x3xf32> to vector<64x3xf32>
    %c0_3 = arith.constant 0 : index
    %c0_4 = arith.constant 0 : index
    %5 = vector.load %arg3[%c0_3, %c0_4] : memref<3x128xf32, #tpu.memory_space<vmem>>, vector<3x128xf32>
    %6 = vector.extract_strided_slice %4 {offsets = [0, 0], sizes = [64, 1], strides = [1, 1]} : vector<64x3xf32> to vector<64x1xf32>
    %7 = vector.extract_strided_slice %5 {offsets = [0, 0], sizes = [1, 128], strides = [1, 1]} : vector<3x128xf32> to vector<1x128xf32>
    %8 = vector.broadcast %6 : vector<64x1xf32> to vector<64x128xf32>
    %9 = vector.broadcast %7 : vector<1x128xf32> to vector<64x128xf32>
    %10 = arith.mulf %8, %9 : vector<64x128xf32>
    %11 = vector.extract_strided_slice %4 {offsets = [0, 1], sizes = [64, 1], strides = [1, 1]} : vector<64x3xf32> to vector<64x1xf32>
    %12 = vector.extract_strided_slice %5 {offsets = [1, 0], sizes = [1, 128], strides = [1, 1]} : vector<3x128xf32> to vector<1x128xf32>
    %13 = vector.broadcast %11 : vector<64x1xf32> to vector<64x128xf32>
    %14 = vector.broadcast %12 : vector<1x128xf32> to vector<64x128xf32>
    %15 = arith.mulf %13, %14 : vector<64x128xf32>
    %16 = arith.addf %10, %15 : vector<64x128xf32>
    %17 = vector.extract_strided_slice %4 {offsets = [0, 2], sizes = [64, 1], strides = [1, 1]} : vector<64x3xf32> to vector<64x1xf32>
    %18 = vector.extract_strided_slice %5 {offsets = [2, 0], sizes = [1, 128], strides = [1, 1]} : vector<3x128xf32> to vector<1x128xf32>
    %19 = vector.broadcast %17 : vector<64x1xf32> to vector<64x128xf32>
    %20 = vector.broadcast %18 : vector<1x128xf32> to vector<64x128xf32>
    %21 = arith.mulf %19, %20 : vector<64x128xf32>
    %22 = arith.addf %16, %21 : vector<64x128xf32>
    %c0_5 = arith.constant 0 : index
    %c0_6 = arith.constant 0 : index
    %23 = vector.load %arg4[%c0_5, %c0_6] : memref<1x128xf32, #tpu.memory_space<vmem>>, vector<1x128xf32>
    %24 = vector.broadcast %23 : vector<1x128xf32> to vector<64x128xf32>
    %25 = arith.addf %22, %24 : vector<64x128xf32>
    %cst = arith.constant 0.000000e+00 : f32
    %26 = vector.broadcast %cst : f32 to vector<64x128xf32>
    %27 = arith.maximumf %25, %26 : vector<64x128xf32>
    %c0_7 = arith.constant 0 : index
    %c0_8 = arith.constant 0 : index
    %28 = vector.load %arg5[%c0_7, %c0_8] : memref<128x128xf32, #tpu.memory_space<vmem>>, vector<128x128xf32>
    %cst_9 = arith.constant dense<0.000000e+00> : vector<64x128xf32>
    %29 = tpu.matmul %27, %28, %cst_9 {dimension_numbers = #tpu.dot_dimension_numbers<[1], [0], [0], [1], [0, 0, 1, 1], [], []>} : vector<64x128xf32>, vector<128x128xf32>, vector<64x128xf32> -> vector<64x128xf32>
    %c0_10 = arith.constant 0 : index
    %c0_11 = arith.constant 0 : index
    %30 = vector.load %arg6[%c0_10, %c0_11] : memref<1x128xf32, #tpu.memory_space<vmem>>, vector<1x128xf32>
    %31 = vector.broadcast %30 : vector<1x128xf32> to vector<64x128xf32>
    %32 = arith.addf %29, %31 : vector<64x128xf32>
    %cst_12 = arith.constant 0.000000e+00 : f32
    %33 = vector.broadcast %cst_12 : f32 to vector<64x128xf32>
    %34 = arith.maximumf %32, %33 : vector<64x128xf32>
    %c0_13 = arith.constant 0 : index
    %c0_14 = arith.constant 0 : index
    %35 = vector.load %arg7[%c0_13, %c0_14] : memref<128x128xf32, #tpu.memory_space<vmem>>, vector<128x128xf32>
    %cst_15 = arith.constant dense<0.000000e+00> : vector<64x128xf32>
    %36 = tpu.matmul %34, %35, %cst_15 {dimension_numbers = #tpu.dot_dimension_numbers<[1], [0], [0], [1], [0, 0, 1, 1], [], []>} : vector<64x128xf32>, vector<128x128xf32>, vector<64x128xf32> -> vector<64x128xf32>
    %c0_16 = arith.constant 0 : index
    %c0_17 = arith.constant 0 : index
    %37 = vector.load %arg8[%c0_16, %c0_17] : memref<1x128xf32, #tpu.memory_space<vmem>>, vector<1x128xf32>
    %38 = vector.broadcast %37 : vector<1x128xf32> to vector<64x128xf32>
    %39 = arith.addf %36, %38 : vector<64x128xf32>
    %cst_18 = arith.constant 0.000000e+00 : f32
    %40 = vector.broadcast %cst_18 : f32 to vector<64x128xf32>
    %41 = arith.maximumf %39, %40 : vector<64x128xf32>
    %c0_19 = arith.constant 0 : index
    %c0_20 = arith.constant 0 : index
    %42 = vector.load %arg9[%c0_19, %c0_20] : memref<128x128xf32, #tpu.memory_space<vmem>>, vector<128x128xf32>
    %cst_21 = arith.constant dense<0.000000e+00> : vector<64x128xf32>
    %43 = tpu.matmul %41, %42, %cst_21 {dimension_numbers = #tpu.dot_dimension_numbers<[1], [0], [0], [1], [0, 0, 1, 1], [], []>} : vector<64x128xf32>, vector<128x128xf32>, vector<64x128xf32> -> vector<64x128xf32>
    %c0_22 = arith.constant 0 : index
    %c0_23 = arith.constant 0 : index
    %44 = vector.load %arg10[%c0_22, %c0_23] : memref<1x128xf32, #tpu.memory_space<vmem>>, vector<1x128xf32>
    %45 = vector.broadcast %44 : vector<1x128xf32> to vector<64x128xf32>
    %46 = arith.addf %43, %45 : vector<64x128xf32>
    %cst_24 = arith.constant 0.000000e+00 : f32
    %47 = vector.broadcast %cst_24 : f32 to vector<64x128xf32>
    %48 = arith.maximumf %46, %47 : vector<64x128xf32>
    %c0_25 = arith.constant 0 : index
    %c0_26 = arith.constant 0 : index
    %49 = vector.load %arg11[%c0_25, %c0_26] : memref<128x1024xf32, #tpu.memory_space<vmem>>, vector<128x256xf32>
    %cst_27 = arith.constant dense<0.000000e+00> : vector<64x256xf32>
    %50 = tpu.matmul %48, %49, %cst_27 {dimension_numbers = #tpu.dot_dimension_numbers<[1], [0], [0], [1], [0, 0, 1, 1], [], []>} : vector<64x128xf32>, vector<128x256xf32>, vector<64x256xf32> -> vector<64x256xf32>
    %c0_28 = arith.constant 0 : index
    %c0_29 = arith.constant 0 : index
    %51 = vector.load %arg12[%c0_28, %c0_29] : memref<1x1024xf32, #tpu.memory_space<vmem>>, vector<1x256xf32>
    %52 = vector.broadcast %51 : vector<1x256xf32> to vector<64x256xf32>
    %53 = arith.addf %50, %52 : vector<64x256xf32>
    %cst_30 = arith.constant 0.000000e+00 : f32
    %54 = vector.broadcast %cst_30 : f32 to vector<64x256xf32>
    %55 = arith.maximumf %53, %54 : vector<64x256xf32>
    %56 = vector.shape_cast %55 : vector<64x256xf32> to vector<1x64x256xf32>
    %cst_31 = arith.constant dense<0xFF800000> : vector<1x256xf32>
    %57 = vector.multi_reduction <maximumf>, %56, %cst_31 [1] : vector<1x64x256xf32> to vector<1x256xf32>
    %c0_32 = arith.constant 0 : index
    %c0_33 = arith.constant 0 : index
    %58 = vector.load %arg20[%c0_32, %c0_33] : memref<1x1024xf32, #tpu.memory_space<vmem>>, vector<1x256xf32>
    %59 = arith.maximumf %58, %57 : vector<1x256xf32>
    %c0_34 = arith.constant 0 : index
    %c0_35 = arith.constant 0 : index
    %60 = vector.load %arg20[%c0_34, %c0_35] : memref<1x1024xf32, #tpu.memory_space<vmem>>, vector<1x256xf32>
    tpu.vector_store %arg20[%c0_34, %c0_35], %59 {strides = array<i32>} : memref<1x1024xf32, #tpu.memory_space<vmem>>, vector<1x256xf32>,
    %c0_36 = arith.constant 0 : index
    %c256 = arith.constant 256 : index
    %61 = vector.load %arg11[%c0_36, %c256] : memref<128x1024xf32, #tpu.memory_space<vmem>>, vector<128x256xf32>
    %cst_37 = arith.constant dense<0.000000e+00> : vector<64x256xf32>
    %62 = tpu.matmul %48, %61, %cst_37 {dimension_numbers = #tpu.dot_dimension_numbers<[1], [0], [0], [1], [0, 0, 1, 1], [], []>} : vector<64x128xf32>, vector<128x256xf32>, vector<64x256xf32> -> vector<64x256xf32>
    %c0_38 = arith.constant 0 : index
    %c256_39 = arith.constant 256 : index
    %63 = vector.load %arg12[%c0_38, %c256_39] : memref<1x1024xf32, #tpu.memory_space<vmem>>, vector<1x256xf32>
    %64 = vector.broadcast %63 : vector<1x256xf32> to vector<64x256xf32>
    %65 = arith.addf %62, %64 : vector<64x256xf32>
    %cst_40 = arith.constant 0.000000e+00 : f32
    %66 = vector.broadcast %cst_40 : f32 to vector<64x256xf32>
    %67 = arith.maximumf %65, %66 : vector<64x256xf32>
    %68 = vector.shape_cast %67 : vector<64x256xf32> to vector<1x64x256xf32>
    %cst_41 = arith.constant dense<0xFF800000> : vector<1x256xf32>
    %69 = vector.multi_reduction <maximumf>, %68, %cst_41 [1] : vector<1x64x256xf32> to vector<1x256xf32>
    %c0_42 = arith.constant 0 : index
    %c256_43 = arith.constant 256 : index
    %70 = vector.load %arg20[%c0_42, %c256_43] : memref<1x1024xf32, #tpu.memory_space<vmem>>, vector<1x256xf32>
    %71 = arith.maximumf %70, %69 : vector<1x256xf32>
    %c0_44 = arith.constant 0 : index
    %c256_45 = arith.constant 256 : index
    %72 = vector.load %arg20[%c0_44, %c256_45] : memref<1x1024xf32, #tpu.memory_space<vmem>>, vector<1x256xf32>
    tpu.vector_store %arg20[%c0_44, %c256_45], %71 {strides = array<i32>} : memref<1x1024xf32, #tpu.memory_space<vmem>>, vector<1x256xf32>,
    %c0_46 = arith.constant 0 : index
    %c512 = arith.constant 512 : index
    %73 = vector.load %arg11[%c0_46, %c512] : memref<128x1024xf32, #tpu.memory_space<vmem>>, vector<128x256xf32>
    %cst_47 = arith.constant dense<0.000000e+00> : vector<64x256xf32>
    %74 = tpu.matmul %48, %73, %cst_47 {dimension_numbers = #tpu.dot_dimension_numbers<[1], [0], [0], [1], [0, 0, 1, 1], [], []>} : vector<64x128xf32>, vector<128x256xf32>, vector<64x256xf32> -> vector<64x256xf32>
    %c0_48 = arith.constant 0 : index
    %c512_49 = arith.constant 512 : index
    %75 = vector.load %arg12[%c0_48, %c512_49] : memref<1x1024xf32, #tpu.memory_space<vmem>>, vector<1x256xf32>
    %76 = vector.broadcast %75 : vector<1x256xf32> to vector<64x256xf32>
    %77 = arith.addf %74, %76 : vector<64x256xf32>
    %cst_50 = arith.constant 0.000000e+00 : f32
    %78 = vector.broadcast %cst_50 : f32 to vector<64x256xf32>
    %79 = arith.maximumf %77, %78 : vector<64x256xf32>
    %80 = vector.shape_cast %79 : vector<64x256xf32> to vector<1x64x256xf32>
    %cst_51 = arith.constant dense<0xFF800000> : vector<1x256xf32>
    %81 = vector.multi_reduction <maximumf>, %80, %cst_51 [1] : vector<1x64x256xf32> to vector<1x256xf32>
    %c0_52 = arith.constant 0 : index
    %c512_53 = arith.constant 512 : index
    %82 = vector.load %arg20[%c0_52, %c512_53] : memref<1x1024xf32, #tpu.memory_space<vmem>>, vector<1x256xf32>
    %83 = arith.maximumf %82, %81 : vector<1x256xf32>
    %c0_54 = arith.constant 0 : index
    %c512_55 = arith.constant 512 : index
    %84 = vector.load %arg20[%c0_54, %c512_55] : memref<1x1024xf32, #tpu.memory_space<vmem>>, vector<1x256xf32>
    tpu.vector_store %arg20[%c0_54, %c512_55], %83 {strides = array<i32>} : memref<1x1024xf32, #tpu.memory_space<vmem>>, vector<1x256xf32>,
    %c0_56 = arith.constant 0 : index
    %c768 = arith.constant 768 : index
    %85 = vector.load %arg11[%c0_56, %c768] : memref<128x1024xf32, #tpu.memory_space<vmem>>, vector<128x256xf32>
    %cst_57 = arith.constant dense<0.000000e+00> : vector<64x256xf32>
    %86 = tpu.matmul %48, %85, %cst_57 {dimension_numbers = #tpu.dot_dimension_numbers<[1], [0], [0], [1], [0, 0, 1, 1], [], []>} : vector<64x128xf32>, vector<128x256xf32>, vector<64x256xf32> -> vector<64x256xf32>
    %c0_58 = arith.constant 0 : index
    %c768_59 = arith.constant 768 : index
    %87 = vector.load %arg12[%c0_58, %c768_59] : memref<1x1024xf32, #tpu.memory_space<vmem>>, vector<1x256xf32>
    %88 = vector.broadcast %87 : vector<1x256xf32> to vector<64x256xf32>
    %89 = arith.addf %86, %88 : vector<64x256xf32>
    %cst_60 = arith.constant 0.000000e+00 : f32
    %90 = vector.broadcast %cst_60 : f32 to vector<64x256xf32>
    %91 = arith.maximumf %89, %90 : vector<64x256xf32>
    %92 = vector.shape_cast %91 : vector<64x256xf32> to vector<1x64x256xf32>
    %cst_61 = arith.constant dense<0xFF800000> : vector<1x256xf32>
    %93 = vector.multi_reduction <maximumf>, %92, %cst_61 [1] : vector<1x64x256xf32> to vector<1x256xf32>
    %c0_62 = arith.constant 0 : index
    %c768_63 = arith.constant 768 : index
    %94 = vector.load %arg20[%c0_62, %c768_63] : memref<1x1024xf32, #tpu.memory_space<vmem>>, vector<1x256xf32>
    %95 = arith.maximumf %94, %93 : vector<1x256xf32>
    %c0_64 = arith.constant 0 : index
    %c768_65 = arith.constant 768 : index
    %96 = vector.load %arg20[%c0_64, %c768_65] : memref<1x1024xf32, #tpu.memory_space<vmem>>, vector<1x256xf32>
    tpu.vector_store %arg20[%c0_64, %c768_65], %95 {strides = array<i32>} : memref<1x1024xf32, #tpu.memory_space<vmem>>, vector<1x256xf32>,
    %c0_i32_66 = arith.constant 0 : i32
    %97 = arith.cmpi eq, %arg1, %c0_i32_66 : i32
    %98 = arith.extui %97 : i1 to i32
    %c0_i32_67 = arith.constant 0 : i32
    %99 = arith.cmpi ne, %98, %c0_i32_67 : i32
    scf.if %99 {
      %c0_68 = arith.constant 0 : index
      %c0_69 = arith.constant 0 : index
      %100 = vector.load %arg20[%c0_68, %c0_69] : memref<1x1024xf32, #tpu.memory_space<vmem>>, vector<1x1024xf32>
      %c0_70 = arith.constant 0 : index
      %c0_71 = arith.constant 0 : index
      %101 = vector.load %arg13[%c0_70, %c0_71] : memref<1024x512xf32, #tpu.memory_space<vmem>>, vector<1024x512xf32>
      %cst_72 = arith.constant dense<0.000000e+00> : vector<1x512xf32>
      %102 = tpu.matmul %100, %101, %cst_72 {dimension_numbers = #tpu.dot_dimension_numbers<[1], [0], [0], [1], [0, 0, 1, 1], [], []>} : vector<1x1024xf32>, vector<1024x512xf32>, vector<1x512xf32> -> vector<1x512xf32>
      %c0_73 = arith.constant 0 : index
      %c0_74 = arith.constant 0 : index
      %103 = vector.load %arg14[%c0_73, %c0_74] : memref<1x512xf32, #tpu.memory_space<vmem>>, vector<1x512xf32>
      %104 = arith.addf %102, %103 : vector<1x512xf32>
      %cst_75 = arith.constant 0.000000e+00 : f32
      %105 = vector.broadcast %cst_75 : f32 to vector<1x512xf32>
      %106 = arith.maximumf %104, %105 : vector<1x512xf32>
      %c0_76 = arith.constant 0 : index
      %c0_77 = arith.constant 0 : index
      %107 = vector.load %arg15[%c0_76, %c0_77] : memref<512x256xf32, #tpu.memory_space<vmem>>, vector<512x256xf32>
      %cst_78 = arith.constant dense<0.000000e+00> : vector<1x256xf32>
      %108 = tpu.matmul %106, %107, %cst_78 {dimension_numbers = #tpu.dot_dimension_numbers<[1], [0], [0], [1], [0, 0, 1, 1], [], []>} : vector<1x512xf32>, vector<512x256xf32>, vector<1x256xf32> -> vector<1x256xf32>
      %c0_79 = arith.constant 0 : index
      %c0_80 = arith.constant 0 : index
      %109 = vector.load %arg16[%c0_79, %c0_80] : memref<1x256xf32, #tpu.memory_space<vmem>>, vector<1x256xf32>
      %110 = arith.addf %108, %109 : vector<1x256xf32>
      %cst_81 = arith.constant 0.000000e+00 : f32
      %111 = vector.broadcast %cst_81 : f32 to vector<1x256xf32>
      %112 = arith.maximumf %110, %111 : vector<1x256xf32>
      %c0_82 = arith.constant 0 : index
      %c0_83 = arith.constant 0 : index
      %113 = vector.load %arg17[%c0_82, %c0_83] : memref<256x128xf32, #tpu.memory_space<vmem>>, vector<256x128xf32>
      %cst_84 = arith.constant dense<0.000000e+00> : vector<1x128xf32>
      %114 = tpu.matmul %112, %113, %cst_84 {dimension_numbers = #tpu.dot_dimension_numbers<[1], [0], [0], [1], [0, 0, 1, 1], [], []>} : vector<1x256xf32>, vector<256x128xf32>, vector<1x128xf32> -> vector<1x128xf32>
      %c0_85 = arith.constant 0 : index
      %c0_86 = arith.constant 0 : index
      %115 = vector.load %arg18[%c0_85, %c0_86] : memref<1x128xf32, #tpu.memory_space<vmem>>, vector<1x128xf32>
      %116 = arith.addf %114, %115 : vector<1x128xf32>
      %117 = vector.shape_cast %116 : vector<1x128xf32> to vector<1x1x128xf32>
      %c0_87 = arith.constant 0 : index
      %c0_88 = arith.constant 0 : index
      %c0_89 = arith.constant 0 : index
      %118 = vector.load %arg19[%c0_87, %c0_88, %c0_89] : memref<1x1x128xf32, #tpu.memory_space<vmem>>, vector<1x1x128xf32>
      tpu.vector_store %arg19[%c0_87, %c0_88, %c0_89], %117 {strides = array<i32>} : memref<1x1x128xf32, #tpu.memory_space<vmem>>, vector<1x1x128xf32>,
    } else {
    }
    return
  }
  func.func @transform_0(%arg0: i32, %arg1: i32) -> (i32, i32, i32) {
    %c0_i32 = arith.constant 0 : i32
    %c0_i32_0 = arith.constant 0 : i32
    return %arg0, %arg1, %c0_i32 : i32, i32, i32
  }
  func.func @transform_1(%arg0: i32, %arg1: i32) -> (i32, i32) {
    %c0_i32 = arith.constant 0 : i32
    %c0_i32_0 = arith.constant 0 : i32
    %c0_i32_1 = arith.constant 0 : i32
    return %c0_i32, %c0_i32_0 : i32, i32
  }
  func.func @transform_2(%arg0: i32, %arg1: i32) -> (i32, i32) {
    %c0_i32 = arith.constant 0 : i32
    %c0_i32_0 = arith.constant 0 : i32
    %c0_i32_1 = arith.constant 0 : i32
    return %c0_i32, %c0_i32_0 : i32, i32
  }
  func.func @transform_3(%arg0: i32, %arg1: i32) -> (i32, i32) {
    %c0_i32 = arith.constant 0 : i32
    %c0_i32_0 = arith.constant 0 : i32
    %c0_i32_1 = arith.constant 0 : i32
    return %c0_i32, %c0_i32_0 : i32, i32
  }
  func.func @transform_4(%arg0: i32, %arg1: i32) -> (i32, i32) {
    %c0_i32 = arith.constant 0 : i32
    %c0_i32_0 = arith.constant 0 : i32
    %c0_i32_1 = arith.constant 0 : i32
    return %c0_i32, %c0_i32_0 : i32, i32
  }
  func.func @transform_5(%arg0: i32, %arg1: i32) -> (i32, i32) {
    %c0_i32 = arith.constant 0 : i32
    %c0_i32_0 = arith.constant 0 : i32
    %c0_i32_1 = arith.constant 0 : i32
    return %c0_i32, %c0_i32_0 : i32, i32
  }
  func.func @transform_6(%arg0: i32, %arg1: i32) -> (i32, i32) {
    %c0_i32 = arith.constant 0 : i32
    %c0_i32_0 = arith.constant 0 : i32
    %c0_i32_1 = arith.constant 0 : i32
    return %c0_i32, %c0_i32_0 : i32, i32
  }
  func.func @transform_7(%arg0: i32, %arg1: i32) -> (i32, i32) {
    %c0_i32 = arith.constant 0 : i32
    %c0_i32_0 = arith.constant 0 : i32
    %c0_i32_1 = arith.constant 0 : i32
    return %c0_i32, %c0_i32_0 : i32, i32
  }
  func.func @transform_8(%arg0: i32, %arg1: i32) -> (i32, i32) {
    %c0_i32 = arith.constant 0 : i32
    %c0_i32_0 = arith.constant 0 : i32
    %c0_i32_1 = arith.constant 0 : i32
    return %c0_i32, %c0_i32_0 : i32, i32
  }
  func.func @transform_9(%arg0: i32, %arg1: i32) -> (i32, i32) {
    %c0_i32 = arith.constant 0 : i32
    %c0_i32_0 = arith.constant 0 : i32
    %c0_i32_1 = arith.constant 0 : i32
    return %c0_i32, %c0_i32_0 : i32, i32
  }
  func.func @transform_10(%arg0: i32, %arg1: i32) -> (i32, i32) {
    %c0_i32 = arith.constant 0 : i32
    %c0_i32_0 = arith.constant 0 : i32
    %c0_i32_1 = arith.constant 0 : i32
    return %c0_i32, %c0_i32_0 : i32, i32
  }
  func.func @transform_11(%arg0: i32, %arg1: i32) -> (i32, i32) {
    %c0_i32 = arith.constant 0 : i32
    %c0_i32_0 = arith.constant 0 : i32
    %c0_i32_1 = arith.constant 0 : i32
    return %c0_i32, %c0_i32_0 : i32, i32
  }
  func.func @transform_12(%arg0: i32, %arg1: i32) -> (i32, i32) {
    %c0_i32 = arith.constant 0 : i32
    %c0_i32_0 = arith.constant 0 : i32
    %c0_i32_1 = arith.constant 0 : i32
    return %c0_i32, %c0_i32_0 : i32, i32
  }
  func.func @transform_13(%arg0: i32, %arg1: i32) -> (i32, i32) {
    %c0_i32 = arith.constant 0 : i32
    %c0_i32_0 = arith.constant 0 : i32
    %c0_i32_1 = arith.constant 0 : i32
    return %c0_i32, %c0_i32_0 : i32, i32
  }
  func.func @transform_14(%arg0: i32, %arg1: i32) -> (i32, i32) {
    %c0_i32 = arith.constant 0 : i32
    %c0_i32_0 = arith.constant 0 : i32
    %c0_i32_1 = arith.constant 0 : i32
    return %c0_i32, %c0_i32_0 : i32, i32
  }
  func.func @transform_15(%arg0: i32, %arg1: i32) -> (i32, i32) {
    %c0_i32 = arith.constant 0 : i32
    %c0_i32_0 = arith.constant 0 : i32
    %c0_i32_1 = arith.constant 0 : i32
    return %c0_i32, %c0_i32_0 : i32, i32
  }
  func.func @transform_16(%arg0: i32, %arg1: i32) -> (i32, i32) {
    %c0_i32 = arith.constant 0 : i32
    %c0_i32_0 = arith.constant 0 : i32
    %c0_i32_1 = arith.constant 0 : i32
    return %c0_i32, %c0_i32_0 : i32, i32
  }
  func.func @transform_17(%arg0: i32, %arg1: i32) -> (i32, i32, i32) {
    %c0_i32 = arith.constant 0 : i32
    %c0_i32_0 = arith.constant 0 : i32
    %c0_i32_1 = arith.constant 0 : i32
    return %arg0, %c0_i32, %c0_i32_0 : i32, i32, i32
  }
}

</mosaic_0001>

<bundles_post_ra>
// kernel: tpu_custom_call.1
= control target key start
LH: loop header
LB: loop body
LE: loop exit
PB: predicated region body
PF: predicated region fallthrough
CT: control target
= control target key end

     0   :  { %s5888_s0 = inlined_call_operand.vmem [shape: f32[2,64,3], index: 0, kind: input, shape index: {}]   ;;  %s5889_s1 = inlined_call_operand.hbm [shape: f32[3,128], index: 1, kind: input, shape index: {}]   ;;  %s5890_s2 = inlined_call_operand.hbm [shape: f32[1,128], index: 2, kind: input, shape index: {}]   ;;  %s5891_s3 = inlined_call_operand.hbm [shape: f32[128,128], index: 3, kind: input, shape index: {}]   ;;  %s5892_s4 = inlined_call_operand.hbm [shape: f32[1,128], index: 4, kind: input, shape index: {}]   ;;  %s5893_s5 = inlined_call_operand.hbm [shape: f32[128,128], index: 5, kind: input, shape index: {}]   ;;  %s5894_s6 = inlined_call_operand.hbm [shape: f32[1,128], index: 6, kind: input, shape index: {}]   ;;  %s5895_s7 = inlined_call_operand.hbm [shape: f32[128,128], index: 7, kind: input, shape index: {}]   ;;  %s5896_s8 = inlined_call_operand.hbm [shape: f32[1,128], index: 8, kind: input, shape index: {}]   ;;  %s5897_s9 = inlined_call_operand.hbm [shape: f32[128,1024], index: 9, kind: input, shape index: {}]   ;;  %s5898_s10 = inlined_call_operand.hbm [shape: f32[1,1024], index: 10, kind: input, shape index: {}]   ;;  %s5899_s11 = inlined_call_operand.hbm [shape: f32[1024,512], index: 11, kind: input, shape index: {}]   ;;  %s5900_s12 = inlined_call_operand.hbm [shape: f32[1,512], index: 12, kind: input, shape index: {}]   ;;  %s5901_s13 = inlined_call_operand.hbm [shape: f32[512,256], index: 13, kind: input, shape index: {}]   ;;  %s5902_s14 = inlined_call_operand.hbm [shape: f32[1,256], index: 14, kind: input, shape index: {}]   ;;  %s5903_s15 = inlined_call_operand.hbm [shape: f32[256,128], index: 15, kind: input, shape index: {}]   ;;  %s5904_s16 = inlined_call_operand.hbm [shape: f32[1,128], index: 16, kind: input, shape index: {}]   ;;  %s5905_s17 = inlined_call_operand.hbm [shape: f32[2,1,128], index: 17, kind: output, shape index: {}]  }
   0x1   :  { %5920 = sst [smem:[#allocation47_spill]] %s5888_s0 }
   0x2   :  { %5921 = sst [smem:[#allocation48_spill]] %s5889_s1 }
   0x3   :  { %5922 = sst [smem:[#allocation49_spill]] %s5890_s2 }
   0x4   :  { %5923 = sst [smem:[#allocation50_spill]] %s5891_s3 }
   0x5   :  { %5924 = sst [smem:[#allocation51_spill]] %s5905_s17 }
   0x6   :  { %22 = vsyncpa [#allocation4], 0 }
   0x7   :  { %23 = vsyncpa [#allocation7], 0 }
   0x8   :  { %24 = vsyncpa [#allocation10], 0 }
   0x9   :  { %25 = vsyncpa [#allocation13], 0 }
   0xa   :  { %26 = vsyncpa [#allocation16], 0 }
   0xb   :  { %27 = vsyncpa [#allocation19], 0 }
   0xc   :  { %28 = vsyncpa [#allocation22], 0 }
   0xd   :  { %29 = vsyncpa [#allocation25], 0 }
   0xe   :  { %30 = vsyncpa [#allocation28], 0 }
   0xf   :  { %31 = vsyncpa [#allocation5], 0 }
  0x10   :  { %33 = vsyncpa [#allocation5 + $0x1], 0  ;;  %s5233_s24 = smov 0   ;;  %s5235_s25 = smov 0  }
  0x11   :  { %s5237_s26 = smov 0   ;;  %s5239_s27 = smov 0  }
  0x12   :  { %s5241_s28 = smov 0   ;;  %s5243_s29 = smov 0  }
  0x13 LB: > { %5925 = sst [smem:[#allocation40_spill]] %s5091_s24  ;;  %s4050_s0 = sadd.s32 4294967295, %s5111_s29   ;;  %s5111_s29 = sphi %s5243_s29, %s39_s29   ;;  %s5107_s28 = sphi %s5241_s28, %s5957_s28   ;;  %s5103_s27 = sphi %s5239_s27, %s5960_s27   ;;  %s5099_s26 = sphi %s5237_s26, %s5955_s26   ;;  %s5095_s25 = sphi %s5235_s25, %s5959_s25   ;;  %s5091_s24 = sphi %s5233_s24, %s5958_s24  }
  0x14   : > { %5926 = sst [smem:[#allocation41_spill]] %s5099_s26  ;;  %s4051_s30 = sadd.s32 4294967294, %s5111_s29  }
  0x15   : > { %5927 = sst [smem:[#allocation42_spill]] %s5107_s28  ;;  %s51_s18 = sadd.s32 1, %s5107_s28 }
  0x16   : > { %5928 = sst [smem:[#allocation43_spill]] %s5111_s29  ;;  %s422_s19 = sadd.s32 1, %s5099_s26 }
  0x17   : > { %p53_p0 = scmp.ge.s32.totalorder %s51_s18, 2  ;;  %p432_p1 = scmp.ne.s32.totalorder %s5099_s26, %s5095_s25 }
  0x18   : > { %p433_p2 = scmp.eq.s32.totalorder %s4050_s0, 1  ;;  %p438_p3 = scmp.ne.s32.totalorder %s5095_s25, %s5091_s24 }
  0x19   : > { %s5962_s18 = smov (%p53_p0, %s51_s18), 0  ;;  %p439_p5 = scmp.eq.s32.totalorder %s4051_s30, 1 }
  0x1a   : > { %5929 = sst [smem:[#allocation44_spill]] %s5962_s18  ;;  %p5273_p4 = por %p433_p2, %p432_p1 }
  0x1b   : > { %s419_s20 = ssub.s32 %s5107_s28, %s5962_s18  ;;  %p4052_p6 = scmp.ge.s32.totalorder %s5111_s29, 1 }
  0x1c   : > { %s5930_s1 = scalar_select %p5273_p4, 1, 0 }
  0x1d   : > { %p420_p7 = scmp.eq.s32.totalorder %s419_s20, 0  ;;  %p5280_p8 = por %p439_p5, %p438_p3 }
  0x1e   : > { %p446_p9 = scmp.lt.s32.totalorder %s5111_s29, 3  ;;  %p5292_p11 = scmp.eq.s32.totalorder %s4050_s0, 0 }
  0x1f   : > { %s5931_s21 = scalar_select %p5280_p8, 1, 0 }
  0x20   : > { %s5286_s22 = scalar_select %p420_p7, %s5099_s26, %s422_s19  }
  0x21   : > { %5932 = sst [smem:[#allocation45_spill]] %s5931_s21  ;;  %p5288_p10 = pnand %p4052_p6, %p446_p9 }
  0x22   : > { %5933 = sst [smem:[#allocation46_spill]] %s5286_s22  ;;  %s5113_s30 = smov [#allocation6]  }
  0x23   : > { %s5934_s23 = scalar_select %p5288_p10, 1, 0 }
  0x24   : > { %s5935_s24 = scalar_select %p5292_p11, 1, 0 }
  0x25   : > { %p4402_p12 = pneg %p5288_p10  ;;  %s470_s20 = sshll.u32 %s5113_s30, 4  ;;  %s471_s20 = int_to_ptr.vmem [resolvable:$true] %s470_s20 }
  0x26   : > { %s5114_s18 = smov [#allocation9]   ;;  %s5115_s22 = smov [#allocation12]  }
  0x27   : > { %s494_s28 = sshll.u32 %s5114_s18, 4  ;;  %p5300_p13 = pnand %p5292_p11, %p4402_p12  ;;  %s495_s28 = int_to_ptr.vmem [resolvable:$true] %s494_s28 }
  0x28   : > { %s518_s0 = sshll.u32 %s5115_s22, 4  ;;  %s4594_s21 = scalar_lea.vmem %s471_s20, 16  ;;  %s519_s0 = int_to_ptr.vmem [resolvable:$true] %s518_s0 }
  0x29   : > { %p5306_p0 = pneg %p5300_p13  ;;  %p4595_p1 = scmp.ne.s32.totalorder %s471_s20, %s4594_s21 }
  0x2a   : > { %s4601_s18 = scalar_lea.vmem %s471_s20, 32  ;;  %p4602_p5 = scmp.lt.s32.totalorder %s471_s20, %s471_s20 }
  0x2b   : > { %p4597_p2 = pnand %p4595_p1, %p5306_p0  ;;  %p4603_p6 = scmp.lt.s32.totalorder %s4601_s18, %s4594_s21 }
  0x2d   : > { %p4598_p3 = pneg %p4597_p2  ;;  %p4604_p7 = por %p4603_p6, %p4602_p5 }
  0x2f   : > { %p4605_p9 = pnand %p4604_p7, %p4598_p3 }
  0x31   : > { %4608 = shalt.err (!%p4605_p9)
}
  0x32   : > { %s5938_s2 = sld [smem:[#allocation49_spill]]  ;;  %s4620_s29 = scalar_lea.vmem %s495_s28, 16 }
  0x33   : > { %p4621_p12 = scmp.ne.s32.totalorder %s495_s28, %s4620_s29  ;;  %s4627_s17 = scalar_lea.vmem %s495_s28, 32 }
  0x34   : > { %p4628_p1 = scmp.lt.s32.totalorder %s495_s28, %s495_s28  ;;  %p4629_p2 = scmp.lt.s32.totalorder %s4627_s17, %s4620_s29 }
  0x35   : > { %p4623_p8 = pnand %p4621_p12, %p5306_p0 }
  0x36   : > { %p4630_p11 = por %p4629_p2, %p4628_p1 }
  0x37   : > { %p4624_p4 = pneg %p4623_p8 }
  0x38   : > { %4408 = dma.hbm_to_vmem [thread:$0]  (!%p5300_p13), %s5938_s2, 16, %s471_s20, [#allocation7]  }
  0x39   : > { %p4631_p10 = pnand %p4630_p11, %p4624_p4 }
  0x3b   : > { %4634 = shalt.err (!%p4631_p10)
}
  0x3c   : > { %4414 = dma.hbm_to_vmem [thread:$0]  (!%p5300_p13), %s5892_s4, 16, %s495_s28, [#allocation10]  }
  0x3d   : > { %s5116_s20 = smov [#allocation15]   ;;  %s4646_s30 = scalar_lea.vmem %s519_s0, 16 }
  0x3e   : > { %s542_s22 = sshll.u32 %s5116_s20, 4  ;;  %p4647_p3 = scmp.ne.s32.totalorder %s519_s0, %s4646_s30  ;;  %s543_s22 = int_to_ptr.vmem [resolvable:$true] %s542_s22 }
  0x3f   : > { %s4653_s2 = scalar_lea.vmem %s519_s0, 32  ;;  %p4654_p6 = scmp.lt.s32.totalorder %s519_s0, %s519_s0 }
  0x40   : > { %p4649_p8 = pnand %p4647_p3, %p5306_p0  ;;  %p4655_p7 = scmp.lt.s32.totalorder %s4653_s2, %s4646_s30 }
  0x42   : > { %p4650_p5 = pneg %p4649_p8  ;;  %p4656_p4 = por %p4655_p7, %p4654_p6 }
  0x44   : > { %p4657_p10 = pnand %p4656_p4, %p4650_p5 }
  0x46   : > { %4660 = shalt.err (!%p4657_p10)
}
  0x47   : > { %4420 = dma.hbm_to_vmem [thread:$0]  (!%p5300_p13), %s5894_s6, 16, %s519_s0, [#allocation13]  }
  0x48   : > { %s4672_s28 = scalar_lea.vmem %s543_s22, 16  ;;  %s4679_s21 = scalar_lea.vmem %s543_s22, 32 }
  0x49   : > { %p4673_p11 = scmp.ne.s32.totalorder %s543_s22, %s4672_s28  ;;  %p4680_p1 = scmp.lt.s32.totalorder %s543_s22, %s543_s22 }
  0x4a   : > { %p4681_p2 = scmp.lt.s32.totalorder %s4679_s21, %s4672_s28 }
  0x4b   : > { %p4675_p9 = pnand %p4673_p11, %p5306_p0 }
  0x4c   : > { %p4682_p3 = por %p4681_p2, %p4680_p1 }
  0x4d   : > { %p4676_p12 = pneg %p4675_p9 }
  0x4f   : > { %p4683_p8 = pnand %p4682_p3, %p4676_p12 }
  0x51   : > { %4686 = shalt.err (!%p4683_p8)
}
  0x52   : > { %4426 = dma.hbm_to_vmem [thread:$0]  (!%p5300_p13), %s5896_s8, 16, %s543_s22, [#allocation16]  }
  0x53   : > { %s5117_s0 = smov [#allocation18]   ;;  %s5118_s30 = smov [#allocation21]  }
  0x54   : > { %s566_s20 = sshll.u32 %s5117_s0, 4  ;;  %s590_s17 = sshll.u32 %s5118_s30, 4  ;;  %s567_s20 = int_to_ptr.vmem [resolvable:$true] %s566_s20  ;;  %s591_s17 = int_to_ptr.vmem [resolvable:$true] %s590_s17 }
  0x55   : > { %s4698_s29 = scalar_lea.vmem %s567_s20, 128  ;;  %p4706_p4 = scmp.lt.s32.totalorder %s567_s20, %s567_s20 }
  0x56   : > { %p4699_p5 = scmp.ne.s32.totalorder %s567_s20, %s4698_s29  ;;  %p4707_p10 = scmp.lt.s32.totalorder %s4698_s29, %s4698_s29 }
  0x58   : > { %p4701_p6 = pnand %p4699_p5, %p5306_p0  ;;  %p4708_p11 = por %p4707_p10, %p4706_p4 }
  0x5a   : > { %p4702_p7 = pneg %p4701_p6 }
  0x5c   : > { %p4709_p9 = pnand %p4708_p11, %p4702_p7 }
  0x5e   : > { %4712 = shalt.err (!%p4709_p9)
}
  0x5f   : > { %4432 = dma.hbm_to_vmem [thread:$0]  (!%p5300_p13), %s5898_s10, 128, %s567_s20, [#allocation19]  }
  0x60   : > { %s4724_s22 = scalar_lea.vmem %s591_s17, 64  ;;  %p4732_p3 = scmp.lt.s32.totalorder %s591_s17, %s591_s17 }
  0x61   : > { %p4725_p12 = scmp.ne.s32.totalorder %s591_s17, %s4724_s22  ;;  %p4733_p8 = scmp.lt.s32.totalorder %s4724_s22, %s4724_s22 }
  0x63   : > { %p4727_p1 = pnand %p4725_p12, %p5306_p0  ;;  %p4734_p5 = por %p4733_p8, %p4732_p3 }
  0x65   : > { %p4728_p2 = pneg %p4727_p1 }
  0x67   : > { %p4735_p6 = pnand %p4734_p5, %p4728_p2 }
  0x69   : > { %4738 = shalt.err (!%p4735_p6)
}
  0x6a   : > { %4438 = dma.hbm_to_vmem [thread:$0]  (!%p5300_p13), %s5900_s12, 64, %s591_s17, [#allocation22]  }
  0x6b   : > { %s5119_s0 = smov [#allocation24]  }
  0x6c   : > { %s614_s20 = sshll.u32 %s5119_s0, 4  ;;  %s615_s20 = int_to_ptr.vmem [resolvable:$true] %s614_s20 }
  0x6d   : > { %s4750_s30 = scalar_lea.vmem %s615_s20, 32  ;;  %p4758_p11 = scmp.lt.s32.totalorder %s615_s20, %s615_s20 }
  0x6e   : > { %p4751_p7 = scmp.ne.s32.totalorder %s615_s20, %s4750_s30  ;;  %p4759_p9 = scmp.lt.s32.totalorder %s4750_s30, %s4750_s30 }
  0x70   : > { %p4753_p4 = pnand %p4751_p7, %p5306_p0  ;;  %p4760_p12 = por %p4759_p9, %p4758_p11 }
  0x72   : > { %p4754_p10 = pneg %p4753_p4 }
  0x74   : > { %p4761_p1 = pnand %p4760_p12, %p4754_p10 }
  0x76   : > { %4764 = shalt.err (!%p4761_p1)
}
  0x77   : > { %4444 = dma.hbm_to_vmem [thread:$0]  (!%p5300_p13), %s5902_s14, 32, %s615_s20, [#allocation25]  }
  0x78   : > { %s5120_s17 = smov [#allocation3]   ;;  %s5121_s22 = smov [#allocation8]  }
  0x79   : > { %s459_s21 = sshll.u32 %s5120_s17, 4  ;;  %s480_s2 = sshll.u32 %s5121_s22, 4  ;;  %s460_s21 = int_to_ptr.vmem [resolvable:$true] %s459_s21  ;;  %s481_s2 = int_to_ptr.vmem [resolvable:$true] %s480_s2 }
  0x7a   : > { %s4776_s18 = scalar_lea.vmem %s460_s21, 64  ;;  %p4784_p5 = scmp.lt.s32.totalorder %s460_s21, %s460_s21 }
  0x7b   : > { %p4777_p2 = scmp.ne.s32.totalorder %s460_s21, %s4776_s18  ;;  %p4785_p6 = scmp.lt.s32.totalorder %s4776_s18, %s4776_s18 }
  0x7d   : > { %p4779_p3 = pnand %p4777_p2, %p5306_p0  ;;  %p4786_p7 = por %p4785_p6, %p4784_p5 }
  0x7f   : > { %p4780_p8 = pneg %p4779_p3 }
  0x81   : > { %p4787_p4 = pnand %p4786_p7, %p4780_p8 }
  0x83   : > { %4790 = shalt.err (!%p4787_p4)
}
  0x84   : > { %s5939_s30 = sld [smem:[#allocation48_spill]]  ;;  %s4802_s29 = scalar_lea.vmem %s481_s2, 2048 }
  0x85   : > { %p4803_p10 = scmp.ne.s32.totalorder %s481_s2, %s4802_s29  ;;  %p4810_p12 = scmp.lt.s32.totalorder %s481_s2, %s481_s2 }
  0x86   : > { %p4811_p1 = scmp.lt.s32.totalorder %s4802_s29, %s4802_s29 }
  0x87   : > { %p4805_p11 = pnand %p4803_p10, %p5306_p0 }
  0x88   : > { %p4812_p2 = por %p4811_p1, %p4810_p12 }
  0x89   : > { %p4806_p9 = pneg %p4805_p11 }
  0x8a   : > { %4405 = dma.hbm_to_vmem [thread:$0]  (!%p5300_p13), %s5939_s30, 64, %s460_s21, [#allocation4]  }
  0x8b   : > { %p4813_p3 = pnand %p4812_p2, %p4806_p9 }
  0x8d   : > { %4816 = shalt.err (!%p4813_p3)
}
  0x8e   : > { %s5918_s28 = smov 128   ;;  %s5919_s17 = smov 8  }
  0x8f   : > { %s5940_s3 = sld [smem:[#allocation50_spill]]  ;;  %s5124_s18 = smov [#allocation11]  }
  0x90   : > { %s504_s0 = sshll.u32 %s5124_s18, 4  ;;  %s5125_s20 = smov [#allocation14]   ;;  %s505_s0 = int_to_ptr.vmem [resolvable:$true] %s504_s0 }
  0x91   : > { %s528_s30 = sshll.u32 %s5125_s20, 4  ;;  %s4828_s29 = scalar_lea.vmem %s505_s0, 2048  ;;  %s529_s30 = int_to_ptr.vmem [resolvable:$true] %s528_s30 }
  0x92   : > { %p4829_p8 = scmp.ne.s32.totalorder %s505_s0, %s4828_s29  ;;  %p4836_p7 = scmp.lt.s32.totalorder %s505_s0, %s505_s0 }
  0x93   : > { %p4837_p4 = scmp.lt.s32.totalorder %s4828_s29, %s4828_s29 }
  0x94   : > { %p4831_p5 = pnand %p4829_p8, %p5306_p0 }
  0x95   : > { %4411 = dma.hbm_to_vmem [thread:$0]  (!%p5300_p13), %s5940_s3, 2048, %s481_s2, [#allocation7], %s5918_s28, %s5918_s28, %s5919_s17  }
  0x96   : > { %p4832_p6 = pneg %p4831_p5  ;;  %p4838_p10 = por %p4837_p4, %p4836_p7 }
  0x98   : > { %p4839_p11 = pnand %p4838_p10, %p4832_p6 }
  0x9a   : > { %4842 = shalt.err (!%p4839_p11)
}
  0x9b   : > { %4417 = dma.hbm_to_vmem [thread:$0]  (!%p5300_p13), %s5893_s5, 2048, %s505_s0, [#allocation10], %s5918_s28, %s5918_s28, %s5919_s17  }
  0x9c   : > { %s4854_s21 = scalar_lea.vmem %s529_s30, 2048  ;;  %p4862_p2 = scmp.lt.s32.totalorder %s529_s30, %s529_s30 }
  0x9d   : > { %p4855_p9 = scmp.ne.s32.totalorder %s529_s30, %s4854_s21  ;;  %p4863_p3 = scmp.lt.s32.totalorder %s4854_s21, %s4854_s21 }
  0x9f   : > { %p4857_p12 = pnand %p4855_p9, %p5306_p0  ;;  %p4864_p8 = por %p4863_p3, %p4862_p2 }
  0xa1   : > { %p4858_p1 = pneg %p4857_p12 }
  0xa3   : > { %p4865_p5 = pnand %p4864_p8, %p4858_p1 }
  0xa5   : > { %4868 = shalt.err (!%p4865_p5)
}
  0xa6   : > { %4423 = dma.hbm_to_vmem [thread:$0]  (!%p5300_p13), %s5895_s7, 2048, %s529_s30, [#allocation13], %s5918_s28, %s5918_s28, %s5919_s17  }
  0xa7   : > { %s5126_s0 = smov [#allocation17]  }
  0xa8   : > { %s552_s29 = sshll.u32 %s5126_s0, 4  ;;  %s553_s29 = int_to_ptr.vmem [resolvable:$true] %s552_s29 }
  0xa9   : > { %s4880_s2 = scalar_lea.vmem %s553_s29, 16384  ;;  %p4888_p10 = scmp.lt.s32.totalorder %s553_s29, %s553_s29 }
  0xaa   : > { %p4881_p6 = scmp.ne.s32.totalorder %s553_s29, %s4880_s2  ;;  %p4889_p11 = scmp.lt.s32.totalorder %s4880_s2, %s4880_s2 }
  0xac   : > { %p4883_p7 = pnand %p4881_p6, %p5306_p0  ;;  %p4890_p9 = por %p4889_p11, %p4888_p10 }
  0xae   : > { %p4884_p4 = pneg %p4883_p7 }
  0xb0   : > { %p4891_p12 = pnand %p4890_p9, %p4884_p4 }
  0xb2   : > { %4894 = shalt.err (!%p4891_p12)
}
  0xb3   : > { %s5127_s22 = smov 1024   ;;  %s5128_s21 = smov 64  }
  0xb4   : > { %4429 = dma.hbm_to_vmem [thread:$0]  (!%p5300_p13), %s5897_s9, 16384, %s553_s29, [#allocation16], %s5127_s22, %s5127_s22, %s5128_s21  }
  0xb5   : > { %s5129_s20 = smov [#allocation20]  }
  0xb6   : > { %s576_s0 = sshll.u32 %s5129_s20, 4  ;;  %s577_s0 = int_to_ptr.vmem [resolvable:$true] %s576_s0 }
  0xb7   : > { %s4906_s28 = scalar_lea.vmem %s577_s0, 65536  ;;  %p4914_p8 = scmp.lt.s32.totalorder %s577_s0, %s577_s0 }
  0xb8   : > { %p4907_p1 = scmp.ne.s32.totalorder %s577_s0, %s4906_s28  ;;  %p4915_p5 = scmp.lt.s32.totalorder %s4906_s28, %s4906_s28 }
  0xba   : > { %p4909_p2 = pnand %p4907_p1, %p5306_p0  ;;  %p4916_p6 = por %p4915_p5, %p4914_p8 }
  0xbc   : > { %p4910_p3 = pneg %p4909_p2 }
  0xbe   : > { %p4917_p7 = pnand %p4916_p6, %p4910_p3 }
  0xc0   : > { %4920 = shalt.err (!%p4917_p7)
}
  0xc1   : > { %s5130_s2 = smov 512   ;;  %s5131_s17 = smov 32  }
  0xc2   : > { %4435 = dma.hbm_to_vmem [thread:$0]  (!%p5300_p13), %s5899_s11, 65536, %s577_s0, [#allocation19], %s5130_s2, %s5130_s2, %s5131_s17  }
  0xc3   : > { %s5132_s22 = smov [#allocation23]  }
  0xc4   : > { %s600_s21 = sshll.u32 %s5132_s22, 4  ;;  %s601_s21 = int_to_ptr.vmem [resolvable:$true] %s600_s21 }
  0xc5   : > { %s4932_s30 = scalar_lea.vmem %s601_s21, 16384  ;;  %p4940_p9 = scmp.lt.s32.totalorder %s601_s21, %s601_s21 }
  0xc6   : > { %p4933_p4 = scmp.ne.s32.totalorder %s601_s21, %s4932_s30  ;;  %p4941_p12 = scmp.lt.s32.totalorder %s4932_s30, %s4932_s30 }
  0xc8   : > { %p4935_p10 = pnand %p4933_p4, %p5306_p0  ;;  %p4942_p1 = por %p4941_p12, %p4940_p9 }
  0xca   : > { %p4936_p11 = pneg %p4935_p10 }
  0xcc   : > { %p4943_p2 = pnand %p4942_p1, %p4936_p11 }
  0xce   : > { %4946 = shalt.err (!%p4943_p2)
}
  0xcf   : > { %s5133_s28 = smov 256   ;;  %s5134_s20 = smov 16  }
  0xd0   : > { %4441 = dma.hbm_to_vmem [thread:$0]  (!%p5300_p13), %s5901_s13, 16384, %s601_s21, [#allocation22], %s5133_s28, %s5133_s28, %s5134_s20  }
  0xd1   : > { %s5135_s0 = smov [#allocation26]   ;;  %s5136_s29 = smov [#allocation27]  }
  0xd2   : > { %s624_s2 = sshll.u32 %s5135_s0, 4  ;;  %s638_s22 = sshll.u32 %s5136_s29, 4  ;;  %s625_s2 = int_to_ptr.vmem [resolvable:$true] %s624_s2  ;;  %s639_s22 = int_to_ptr.vmem [resolvable:$true] %s638_s22 }
  0xd3   : > { %s4958_s3 = scalar_lea.vmem %s625_s2, 4096  ;;  %p4966_p6 = scmp.lt.s32.totalorder %s625_s2, %s625_s2 }
  0xd4   : > { %p4959_p3 = scmp.ne.s32.totalorder %s625_s2, %s4958_s3  ;;  %p4967_p7 = scmp.lt.s32.totalorder %s4958_s3, %s4958_s3 }
  0xd6   : > { %p4961_p8 = pnand %p4959_p3, %p5306_p0  ;;  %p4968_p4 = por %p4967_p7, %p4966_p6 }
  0xd8   : > { %p4962_p5 = pneg %p4961_p8 }
  0xda   : > { %p4969_p10 = pnand %p4968_p4, %p4962_p5 }
  0xdc   : > { %4972 = shalt.err (!%p4969_p10)
}
  0xdd   : > { %s5941_s30 = smov 8   ;;  %s5942_s18 = smov 128  }
  0xde   : > { %4447 = dma.hbm_to_vmem [thread:$0]  (!%p5300_p13), %s5903_s15, 4096, %s625_s2, [#allocation25], %s5942_s18, %s5942_s18, %s5941_s30  }
  0xdf   : > { %s4984_s20 = scalar_lea.vmem %s639_s22, 16  ;;  %s4991_s3 = scalar_lea.vmem %s639_s22, 32 }
  0xe0   : > { %p4985_p11 = scmp.ne.s32.totalorder %s639_s22, %s4984_s20  ;;  %p4992_p1 = scmp.lt.s32.totalorder %s639_s22, %s639_s22 }
  0xe1   : > { %p4993_p2 = scmp.lt.s32.totalorder %s4991_s3, %s4984_s20 }
  0xe2   : > { %p4987_p9 = pnand %p4985_p11, %p5306_p0 }
  0xe3   : > { %p4994_p3 = por %p4993_p2, %p4992_p1 }
  0xe4   : > { %p4988_p12 = pneg %p4987_p9 }
  0xe6   : > { %p4995_p8 = pnand %p4994_p3, %p4988_p12 }
  0xe8   : > { %4998 = shalt.err (!%p4995_p8)
}
  0xe9   : > { %4450 = dma.hbm_to_vmem [thread:$0]  (!%p5300_p13), %s5904_s16, 16, %s639_s22, [#allocation28]  }
  0xea   : > { %p5943_p5 = scmp.ne.s32.totalorder %s5934_s23, 0 }
  0xeb   : > { %p5944_p6 = scmp.ne.s32.totalorder (!%p5943_p5), %s5935_s24, 0 }
  0xec   : > { %664 = sbr.rel (%p5943_p5) target bundleno = 2146 (0x862), region = 88 }
  0xf1   : > { %5050 = dma.done.wait (%p5944_p6), [#allocation4], 64  }
  0xf2   : > { %5052 = vsyncadd (%p5944_p6), [#allocation4], 4294967232 }
  0xf3   : > { %5054 = dma.done.wait (%p5944_p6), [#allocation7], 2064  }
  0xf4   : > { %5056 = vsyncadd (%p5944_p6), [#allocation7], 4294965232 }
  0xf5   : > { %5058 = dma.done.wait (%p5944_p6), [#allocation10], 2064  }
  0xf6   : > { %5060 = vsyncadd (%p5944_p6), [#allocation10], 4294965232 }
  0xf7   : > { %5062 = dma.done.wait (%p5944_p6), [#allocation13], 2064  }
  0xf8   : > { %5064 = vsyncadd (%p5944_p6), [#allocation13], 4294965232 }
  0xf9   : > { %5066 = dma.done.wait (%p5944_p6), [#allocation16], 16400  }
  0xfa   : > { %5068 = vsyncadd (%p5944_p6), [#allocation16], 4294950896 }
  0xfb   : > { %5070 = dma.done.wait (%p5944_p6), [#allocation19], 65664  }
  0xfc   : > { %5072 = vsyncadd (%p5944_p6), [#allocation19], 4294901632 }
  0xfd   : > { %5074 = dma.done.wait (%p5944_p6), [#allocation22], 16448  }
  0xfe   : > { %5076 = vsyncadd (%p5944_p6), [#allocation22], 4294950848 }
  0xff   : > { %5078 = dma.done.wait (%p5944_p6), [#allocation25], 4128  }
 0x100   : > { %5080 = vsyncadd (%p5944_p6), [#allocation25], 4294963168 }
 0x101   : > { %5082 = dma.done.wait (%p5944_p6), [#allocation28], 16  }
 0x102   : > { %5084 = vsyncadd (%p5944_p6), [#allocation28], 4294967280  ;;  %p780_p13 = scmp.lt.s32.totalorder %s5103_s27, 1  ;;  %v5137_v0 = vmov 0   ;;  %s5945_s29 = sld [smem:[#allocation47_spill]]  ;;  %v997_v3 = vld [vmem:[#allocation8 + $0x78] sm:$0xff]  ;;  %v843_v39 = vlaneseq }
 0x103   : > { %4567 = vset.pattern.permute.xlu1 %v5137_v0  ;;  %4565 = vset.pattern.permute.xlu0 %v5137_v0  ;;  %v996_v4 = vld [vmem:[#allocation8 + $0x70] sm:$0xff]  ;;  %v5138_v5 = vmov 1   ;;  %v995_v6 = vld [vmem:[#allocation8 + $0x68] sm:$0xff]  ;;  %v5139_v8 = vmov 2   ;;  %v994_v9 = vld [vmem:[#allocation8 + $0x60] sm:$0xff]  ;;  %s777_s24 = sand.u32 1, %s5095_s25  }
 0x104   : > { %s781_s26 = scalar_select %p780_p13, %s5103_s27, 1  ;;  %4204 = vmatprep.subr.mxu0 %v997_v3  ;;  %v993_v11 = vld [vmem:[#allocation8 + $0x58] sm:$0xff]  ;;  %v992_v12 = vld [vmem:[#allocation8 + $0x50] sm:$0xff]  ;;  %v991_v13 = vld [vmem:[#allocation8 + $0x48] sm:$0xff]  ;;  %v5506_v40 = vshrl.u32 %v843_v39, 7  ;;  %vm5744_vm0 = vcmp.lt.s32.totalorder %v843_v39, 256 }
 0x105   : > { %4205 = vmatpush3.msra.mxu0 %v997_v3  ;;  %v990_v15 = vld [vmem:[#allocation8 + $0x40] sm:$0xff]  ;;  %v989_v16 = vld [vmem:[#allocation8 + $0x38] sm:$0xff]  ;;  %v988_v17 = vld [vmem:[#allocation8 + $0x30] sm:$0xff]  ;;  %s4093_s30 = sshll.u32 %s5103_s27, 4  ;;  %s778_s18 = scalar_lea.vmem [#allocation29], %s777_s24 }
 0x106   : > { %s4096_s23 = sshll.u32 %s781_s26, 6  ;;  %4206 = vmatprep.subr.mxu0 %v996_v4  ;;  %v987_v18 = vld [vmem:[#allocation8 + $0x28] sm:$0xff]  ;;  %v986_v20 = vld [vmem:[#allocation8 + $0x20] sm:$0xff]  ;;  %v985_v22 = vld [vmem:[#allocation8 + $0x18] sm:$0xff]  ;;  %v5509_v41 = vsub.s32 0, %v5506_v40  ;;  %v5512_v45 = vsub.s32 1, %v5506_v40 }
 0x107   : > { %4207 = vmatpush3.msra.mxu0 %v996_v4  ;;  %v984_v23 = vld [vmem:[#allocation8 + $0x10] sm:$0xff]  ;;  %v983_v24 = vld [vmem:[#allocation8 + $0x8] sm:$0xff]  ;;  %v982_v25 = vld [vmem:[#allocation8] sm:$0xff]  ;;  %v5518_v47 = vsub.s32 2, %v5506_v40  ;;  %s3826_s21 = sshll.u32 %s778_s18, 4  ;;  %s5948_s3 = sld [smem:[#allocation51_spill]]  ;;  %s3827_s21 = int_to_ptr.vmem [resolvable:$true] %s3826_s21 }
 0x108   : > { %s5479_s22 = scalar_lea.vmem %s5945_s29, %s4096_s23  ;;  %4208 = vmatprep.subr.mxu0 %v995_v6  ;;  %v1133_v27 = vld [vmem:[#allocation11 + $0x78] sm:$0xff]  ;;  %v1132_v28 = vld [vmem:[#allocation11 + $0x70] sm:$0xff]  ;;  %v1131_v29 = vld [vmem:[#allocation11 + $0x68] sm:$0xff]  ;;  %s3814_s0 = scalar_lea.sflag [#allocation5], %s777_s24 }
 0x109   : > { %v795_v1 = vld [vmem:[%s5479_s22 + $0x8] sm:$0xff]  ;;  %v794_v2 = vld [vmem:[%s5479_s22] sm:$0xff]  ;;  %v797_v7 = vld [vmem:[%s5479_s22 + $0x18] sm:$0xff]  ;;  %4209 = vmatpush3.msra.mxu0 %v995_v6  ;;  %4248 = vmatprep.subr.mxu1 %v1133_v27  ;;  %s4999_s26 = scalar_lea.vmem %s3827_s21, 16  ;;  %p5949_p7 = scmp.ne.s32.totalorder %s5930_s1, 0 }
 0x10a   : > { %810 = vperm.xlu1 %4567, %v795_v1   ;;  %805 = vperm.xlu0 %4565, %v794_v2   ;;  %v796_v10 = vld [vmem:[%s5479_s22 + $0x10] sm:$0xff]  ;;  %v799_v14 = vld [vmem:[%s5479_s22 + $0x28] sm:$0xff]  ;;  %v801_v19 = vld [vmem:[%s5479_s22 + $0x38] sm:$0xff]  ;;  %p5000_p0 = scmp.ne.s32.totalorder %s3827_s21, %s4999_s26  ;;  %s5142_s23 = smov [#allocation29]  }
 0x10b   : > { %4210 = vmatprep.subr.mxu0 %v994_v9  ;;  %v798_v21 = vld [vmem:[%s5479_s22 + $0x20] sm:$0xff]  ;;  %v800_v26 = vld [vmem:[%s5479_s22 + $0x30] sm:$0xff]  ;;  %4249 = vmatpush3.msra.mxu1 %v1133_v27  ;;  %v1129_v31 = vld [vmem:[#allocation11 + $0x58] sm:$0xff]  ;;  %s5003_s19 = sshll.u32 %s5142_s23, 4  ;;  %s5004_s19 = int_to_ptr.vmem [resolvable:$false] %s5003_s19 }
 0x10c   : > { %4211 = vmatpush3.msra.mxu0 %v994_v9  ;;  %4250 = vmatprep.subr.mxu1 %v1132_v28  ;;  %v1130_v30 = vld [vmem:[#allocation11 + $0x60] sm:$0xff]  ;;  %v1128_v32 = vld [vmem:[#allocation11 + $0x50] sm:$0xff]  ;;  %v1127_v33 = vld [vmem:[#allocation11 + $0x48] sm:$0xff]  ;;  %p5001_p4 = pnand %p5000_p0, %p5949_p7  ;;  %s5005_s27 = scalar_lea.vmem %s5004_s19, 32 }
 0x10d   : > { %4212 = vmatprep.subr.mxu0 %v993_v11  ;;  %4251 = vmatpush3.msra.mxu1 %v1132_v28  ;;  %v1126_v34 = vld [vmem:[#allocation11 + $0x40] sm:$0xff]  ;;  %v1125_v35 = vld [vmem:[#allocation11 + $0x38] sm:$0xff]  ;;  %v1124_v36 = vld [vmem:[#allocation11 + $0x30] sm:$0xff]  ;;  %s3824_s17 = scalar_lea.hbm %s5948_s3, %s4093_s30  ;;  %p5006_p11 = scmp.lt.s32.totalorder %s3827_s21, %s5004_s19 }
 0x10e   : > { %4568 = vset.pattern.permute.xlu1 %v5138_v5  ;;  %4566 = vset.pattern.permute.xlu0 %v5138_v5  ;;  %v1123_v37 = vld [vmem:[#allocation11 + $0x28] sm:$0xff]  ;;  %v1122_v38 = vld [vmem:[#allocation11 + $0x20] sm:$0xff]  ;;  %v802_v42 = vld [vmem:[#allocation3] sm:$0x7]  ;;  %p5002_p10 = pneg %p5001_p4  ;;  %p5007_p9 = scmp.lt.s32.totalorder %s5005_s27, %s4999_s26 }
 0x10f   : > { %860 = vperm.xlu1 %4568, %v795_v1   ;;  %856 = vperm.xlu0 %4566, %v794_v2   ;;  %v5515_v46 = vrot.slane %v802_v42, %v5509_v41  ;;  %v5521_v48 = vrot.slane %v802_v42, %v5512_v45  ;;  %v5526_v53 = vrot.slane %v802_v42, %v5518_v47  ;;  %v5530_v59 = vld [vmem:[#allocation6] ss:$0 sm:$0xff] }
 0x110   : > { %4213 = vmatpush3.msra.mxu0 %v993_v11  ;;  %4252 = vmatprep.subr.mxu1 %v1131_v29  ;;  %p5008_p12 = por %p5007_p9, %p5006_p11 }
 0x111   : > { %4214 = vmatprep.subr.mxu0 %v992_v12  ;;  %4253 = vmatpush3.msra.mxu1 %v1131_v29 }
 0x112   : > { %4215 = vmatpush3.msra.mxu0 %v992_v12  ;;  %4254 = vmatprep.subr.mxu1 %v1130_v30  ;;  %p5009_p1 = pnand %p5008_p12, %p5002_p10 }
 0x113   : > { %4569 = vset.pattern.permute.xlu1 %v5139_v8  ;;  %4572 = vset.pattern.permute.xlu0 %v5137_v0 }
 0x114   : > { %908 = vperm.xlu1 %4569, %v794_v2   ;;  %820 = vperm.xlu0 %4572, %v797_v7  }
 0x115   : > { %4216 = vmatprep.subr.mxu0 %v991_v13  ;;  %4255 = vmatpush3.msra.mxu1 %v1130_v30 }
 0x116   : > { %4217 = vmatpush3.msra.mxu0 %v991_v13  ;;  %4256 = vmatprep.subr.mxu1 %v1129_v31 }
 0x117   : > { %4218 = vmatprep.subr.mxu0 %v990_v15  ;;  %4257 = vmatpush3.msra.mxu1 %v1129_v31 }
 0x118   : > { %4570 = vset.pattern.permute.xlu1 %v5137_v0  ;;  %4573 = vset.pattern.permute.xlu0 %v5139_v8 }
 0x119   : > { %815 = vperm.xlu1 %4570, %v796_v10   ;;  %912 = vperm.xlu0 %4573, %v795_v1  }
 0x11a   : > { %4219 = vmatpush3.msra.mxu0 %v990_v15  ;;  %4258 = vmatprep.subr.mxu1 %v1128_v32 }
 0x11b   : > { %4220 = vmatprep.subr.mxu0 %v989_v16  ;;  %4259 = vmatpush3.msra.mxu1 %v1128_v32 }
 0x11c   : > { %4221 = vmatpush3.msra.mxu0 %v989_v16  ;;  %4260 = vmatprep.subr.mxu1 %v1127_v33 }
 0x11d   : > { %4571 = vset.pattern.permute.xlu1 %v5138_v5  ;;  %920 = vperm.xlu0 %4573, %v797_v7  }
 0x11e   : > { %864 = vperm.xlu1 %4571, %v796_v10   ;;  %4222 = vmatprep.subr.mxu0 %v988_v17 }
 0x11f   : > { %4223 = vmatpush3.msra.mxu0 %v988_v17  ;;  %4261 = vmatpush3.msra.mxu1 %v1127_v33 }
 0x120   : > { %4224 = vmatprep.subr.mxu0 %v987_v18  ;;  %4262 = vmatprep.subr.mxu1 %v1126_v34 }
 0x121   : > { %928 = vperm.xlu0 %4573, %v799_v14   ;;  %4225 = vmatpush3.msra.mxu0 %v987_v18 }
 0x122   : > { %868 = vperm.xlu1 %4571, %v797_v7   ;;  %4226 = vmatprep.subr.mxu0 %v986_v20 }
 0x123   : > { %4227 = vmatpush3.msra.mxu0 %v986_v20  ;;  %4263 = vmatpush3.msra.mxu1 %v1126_v34 }
 0x124   : > { %4228 = vmatprep.subr.mxu0 %v985_v22  ;;  %4264 = vmatprep.subr.mxu1 %v1125_v35 }
 0x125   : > { %4578 = vset.pattern.permute.xlu0 %v5137_v0  ;;  %4229 = vmatpush3.msra.mxu0 %v985_v22 }
 0x126   : > { %4574 = vset.pattern.permute.xlu1 %v5139_v8  ;;  %830 = vperm.xlu0 %4578, %v799_v14  }
 0x127   : > { %916 = vperm.xlu1 %4574, %v796_v10   ;;  %4230 = vmatprep.subr.mxu0 %v984_v23 }
 0x128   : > { %4231 = vmatpush3.msra.mxu0 %v984_v23  ;;  %4265 = vmatpush3.msra.mxu1 %v1125_v35 }
 0x129   : > { %4232 = vmatprep.subr.mxu0 %v983_v24  ;;  %4266 = vmatprep.subr.mxu1 %v1124_v36 }
 0x12a   : > { %840 = vperm.xlu0 %4578, %v801_v19   ;;  %4233 = vmatpush3.msra.mxu0 %v983_v24 }
 0x12b   : > { %4575 = vset.pattern.permute.xlu1 %v5137_v0  ;;  %4234 = vmatprep.subr.mxu0 %v982_v25 }
 0x12c   : > { %825 = vperm.xlu1 %4575, %v798_v21   ;;  %4235 = vmatpush3.msra.mxu0 %v982_v25 }
 0x12d   : > { %4267 = vmatpush3.msra.mxu1 %v1124_v36 }
 0x12e   : > { %4582 = vset.pattern.permute.xlu0 %v5139_v8  ;;  %4268 = vmatprep.subr.mxu1 %v1123_v37 }
 0x12f   : > { %936 = vperm.xlu0 %4582, %v801_v19   ;;  %4269 = vmatpush3.msra.mxu1 %v1123_v37 }
 0x130   : > { %4576 = vset.pattern.permute.xlu1 %v5138_v5  ;;  %4270 = vmatprep.subr.mxu1 %v1122_v38 }
 0x131   : > { %872 = vperm.xlu1 %4576, %v798_v21   ;;  %4271 = vmatpush3.msra.mxu1 %v1122_v38 }
 0x135   : > { %876 = vperm.xlu1 %4576, %v799_v14  }
 0x139   : > { %4577 = vset.pattern.permute.xlu1 %v5139_v8 }
 0x13a   : > { %924 = vperm.xlu1 %4577, %v798_v21  }
 0x13e   : > { %4579 = vset.pattern.permute.xlu1 %v5137_v0 }
 0x13f   : > { %835 = vperm.xlu1 %4579, %v800_v26  }
 0x143   : > { %4580 = vset.pattern.permute.xlu1 %v5138_v5 }
 0x144   : > { %880 = vperm.xlu1 %4580, %v800_v26  }
 0x148   : > { %884 = vperm.xlu1 %4580, %v801_v19  }
 0x14c   : > { %4581 = vset.pattern.permute.xlu1 %v5139_v8 }
 0x14d   : > { %932 = vperm.xlu1 %4581, %v800_v26  }
 0x185   : > { %v811_v43 = vpop.permute.xlu1 %810  ;;  %v806_v44 = vpop.permute.xlu0 %805 }
 0x186   : > { %v847_v49 = vmul.f32 %v5515_v46, %v806_v44  ;;  %v848_v61 = vmul.f32 %v5515_v46, %v811_v43 }
 0x18a   : > { %v861_v50 = vpop.permute.xlu1 %860  ;;  %v857_v51 = vpop.permute.xlu0 %856 }
 0x18b   : > { %v891_v52 = vmul.f32 %v5521_v48, %v857_v51  ;;  %v892_v58 = vmul.f32 %v5521_v48, %v861_v50 }
 0x18d   : > { %v899_v54 = vadd.f32 %v891_v52, %v847_v49  ;;  %v900_v1 = vadd.f32 %v892_v58, %v848_v61 }
 0x18f   : > { %v909_v55 = vpop.permute.xlu1 %908  ;;  %v821_v56 = vpop.permute.xlu0 %820 }
 0x190   : > { %v943_v57 = vmul.f32 %v5526_v53, %v909_v55  ;;  %v850_v9 = vmul.f32 %v5515_v46, %v821_v56 }
 0x192   : > { %v951_v60 = vadd.f32 %v943_v57, %v899_v54 }
 0x194   : > { %v816_v62 = vpop.permute.xlu1 %815  ;;  %v913_v63 = vpop.permute.xlu0 %912  ;;  %v966_v0 = vadd.f32 %v5530_v59, %v951_v60 }
 0x195   : > { %v944_v2 = vmul.f32 %v5526_v53, %v913_v63  ;;  %v849_v15 = vmul.f32 %v5515_v46, %v816_v62 }
 0x196   : > { %v974_v3 = vmax.f32 %v966_v0, 0.0 }
 0x197   : > { %v952_v4 = vadd.f32 %v944_v2, %v900_v1 }
 0x198   : > { %4236 = vmatprep.mubr.f32.mxu0 %v974_v3  ;;  %v921_v8 = vpop.permute.xlu0 %920 }
 0x199   : > { %v865_v5 = vpop.permute.xlu1 %864  ;;  %v967_v6 = vadd.f32 %v5530_v59, %v952_v4  ;;  %v946_v12 = vmul.f32 %v5526_v53, %v921_v8 }
 0x19a   : > { %v893_v13 = vmul.f32 %v5521_v48, %v865_v5 }
 0x19b   : > { %v975_v7 = vmax.f32 %v967_v6, 0.0 }
 0x19c   : > { %v901_v18 = vadd.f32 %v893_v13, %v849_v15  ;;  %v929_v22 = vpop.permute.xlu0 %928  ;;  %v1266_v13 = vld [vmem:[#allocation14 + $0x60] sm:$0xff]  ;;  %v1264_v15 = vld [vmem:[#allocation14 + $0x50] sm:$0xff] }
 0x19d   : > { %v869_v10 = vpop.permute.xlu1 %868  ;;  %4237 = vmatmul.mubr.f32.vlgmr.msra.gmra.mxu0 %v975_v7  ;;  %v948_v31 = vmul.f32 %v5526_v53, %v929_v22  ;;  %v4090_v22 = vld [vmem:[#allocation9] ss:$0 sm:$0xff] }
 0x19e   : > { %v894_v11 = vmul.f32 %v5521_v48, %v869_v10  ;;  %v1121_v10 = vld [vmem:[#allocation11 + $0x18] sm:$0xff] }
 0x19f   : > { %4272 = vmatprep.subr.mxu1 %v1121_v10 }
 0x1a0   : > { %v902_v14 = vadd.f32 %v894_v11, %v850_v9  ;;  %4273 = vmatpush3.msra.mxu1 %v1121_v10  ;;  %v1118_v11 = vld [vmem:[#allocation11] sm:$0xff] }
 0x1a1   : > { %v831_v28 = vpop.permute.xlu0 %830  ;;  %v1408_v10 = vld [vmem:[#allocation17 + $0x240] sm:$0xff] }
 0x1a2   : > { %v954_v16 = vadd.f32 %v946_v12, %v902_v14  ;;  %v917_v17 = vpop.permute.xlu1 %916  ;;  %v852_v29 = vmul.f32 %v5515_v46, %v831_v28  ;;  %v1268_v12 = vld [vmem:[#allocation14 + $0x70] sm:$0xff]  ;;  %v1265_v14 = vld [vmem:[#allocation14 + $0x58] sm:$0xff] }
 0x1a3   : > { %v945_v19 = vmul.f32 %v5526_v53, %v917_v17  ;;  %v1262_v17 = vld [vmem:[#allocation14 + $0x40] sm:$0xff] }
 0x1a4   : > { %v969_v21 = vadd.f32 %v5530_v59, %v954_v16  ;;  %v1263_v16 = vld [vmem:[#allocation14 + $0x48] sm:$0xff] }
 0x1a5   : > { %v953_v20 = vadd.f32 %v945_v19, %v901_v18  ;;  %v841_v54 = vpop.permute.xlu0 %840  ;;  %v1261_v18 = vld [vmem:[#allocation14 + $0x38] sm:$0xff]  ;;  %v1260_v19 = vld [vmem:[#allocation14 + $0x30] sm:$0xff] }
 0x1a6   : > { %v977_v26 = vmax.f32 %v969_v21, 0.0  ;;  %v854_v58 = vmul.f32 %v5515_v46, %v841_v54  ;;  %v1258_v21 = vld [vmem:[#allocation14 + $0x20] sm:$0xff] }
 0x1a7   : > { %v826_v23 = vpop.permute.xlu1 %825  ;;  %v968_v24 = vadd.f32 %v5530_v59, %v953_v20  ;;  %v1259_v20 = vld [vmem:[#allocation14 + $0x28] sm:$0xff] }
 0x1a8   : > { %v851_v35 = vmul.f32 %v5515_v46, %v826_v23 }
 0x1a9   : > { %v976_v25 = vmax.f32 %v968_v24, 0.0 }
 0x1aa   : > { %v937_v56 = vpop.permute.xlu0 %936 }
 0x1ab   : > { %4239 = vmatprep.mubr.f32.mxu0 %v976_v25  ;;  %v950_v61 = vmul.f32 %v5526_v53, %v937_v56  ;;  %v1256_v56 = vld [vmem:[#allocation14 + $0x10] sm:$0xff] }
 0x1ac   : > { %v873_v27 = vpop.permute.xlu1 %872  ;;  %4240 = vmatmul.mubr.f32.gmra.mxu0 %v977_v26 }
 0x1ad   : > { %v895_v33 = vmul.f32 %v5521_v48, %v873_v27 }
 0x1af   : > { %v903_v38 = vadd.f32 %v895_v33, %v851_v35 }
 0x1b0   : > { %v877_v30 = vpop.permute.xlu1 %876 }
 0x1b1   : > { %v896_v32 = vmul.f32 %v5521_v48, %v877_v30 }
 0x1b3   : > { %v904_v34 = vadd.f32 %v896_v32, %v852_v29 }
 0x1b5   : > { %v956_v36 = vadd.f32 %v948_v31, %v904_v34  ;;  %v925_v37 = vpop.permute.xlu1 %924 }
 0x1b6   : > { %v947_v42 = vmul.f32 %v5526_v53, %v925_v37 }
 0x1b7   : > { %v971_v44 = vadd.f32 %v5530_v59, %v956_v36 }
 0x1b8   : > { %v955_v43 = vadd.f32 %v947_v42, %v903_v38 }
 0x1b9   : > { %v979_v52 = vmax.f32 %v971_v44, 0.0 }
 0x1ba   : > { %v836_v49 = vpop.permute.xlu1 %835  ;;  %v970_v50 = vadd.f32 %v5530_v59, %v955_v43 }
 0x1bb   : > { %v853_v0 = vmul.f32 %v5515_v46, %v836_v49  ;;  %v1119_v46 = vld [vmem:[#allocation11 + $0x8] sm:$0xff] }
 0x1bc   : > { %v978_v51 = vmax.f32 %v970_v50, 0.0 }
 0x1be   : > { %4242 = vmatprep.mubr.f32.mxu0 %v978_v51 }
 0x1bf   : > { %v881_v55 = vpop.permute.xlu1 %880  ;;  %4243 = vmatmul.mubr.f32.gmra.mxu0 %v979_v52 }
 0x1c0   : > { %v897_v62 = vmul.f32 %v5521_v48, %v881_v55  ;;  %v1257_v55 = vld [vmem:[#allocation14 + $0x18] sm:$0xff] }
 0x1c2   : > { %v905_v3 = vadd.f32 %v897_v62, %v853_v0  ;;  %v1420_v62 = vld [vmem:[#allocation17 + $0x3c0] sm:$0xff] }
 0x1c3   : > { %v885_v57 = vpop.permute.xlu1 %884  ;;  %v1418_v0 = vld [vmem:[#allocation17 + $0x380] sm:$0xff] }
 0x1c4   : > { %v898_v60 = vmul.f32 %v5521_v48, %v885_v57  ;;  %v1120_v48 = vld [vmem:[#allocation11 + $0x10] sm:$0xff] }
 0x1c5   : > { %4274 = vmatprep.subr.mxu1 %v1120_v48  ;;  %v1255_v57 = vld [vmem:[#allocation14 + $0x8] sm:$0xff] }
 0x1c6   : > { %v906_v63 = vadd.f32 %v898_v60, %v854_v58  ;;  %4275 = vmatpush3.msra.mxu1 %v1120_v48  ;;  %v1254_v58 = vld [vmem:[#allocation14] sm:$0xff]  ;;  %v1421_v60 = vld [vmem:[#allocation17 + $0x3c8] sm:$0xff] }
 0x1c7   : > { %4276 = vmatprep.subr.mxu1 %v1119_v46  ;;  %v1407_v48 = vld [vmem:[#allocation17 + $0x208] sm:$0xff] }
 0x1c8   : > { %v958_v1 = vadd.f32 %v950_v61, %v906_v63  ;;  %v933_v2 = vpop.permute.xlu1 %932  ;;  %4277 = vmatpush3.msra.mxu1 %v1119_v46  ;;  %v1645_v61 = vld [vmem:[#allocation17 + $0x3d8] sm:$0xff]  ;;  %v1419_v63 = vld [vmem:[#allocation17 + $0x388] sm:$0xff]  ;;  %v1406_v46 = vld [vmem:[#allocation17 + $0x200] sm:$0xff] }
 0x1c9   : > { %v949_v4 = vmul.f32 %v5526_v53, %v933_v2  ;;  %4278 = vmatprep.subr.mxu1 %v1118_v11  ;;  %v1269_v53 = vld [vmem:[#allocation14 + $0x78] sm:$0xff]  ;;  %v1416_v2 = vld [vmem:[#allocation17 + $0x340] sm:$0xff] }
 0x1ca   : > { %v973_v6 = vadd.f32 %v5530_v59, %v958_v1  ;;  %4279 = vmatpush3.msra.mxu1 %v1118_v11  ;;  %4292 = vmatprep.subr.mxu0 %v1269_v53  ;;  %v1417_v1 = vld [vmem:[#allocation17 + $0x348] sm:$0xff] }
 0x1cb   : > { %v957_v5 = vadd.f32 %v949_v4, %v905_v3  ;;  %4293 = vmatpush3.msra.mxu0 %v1269_v53  ;;  %1434 = vmatprep.subr.mxu1 %v1421_v60  ;;  %v1415_v3 = vld [vmem:[#allocation17 + $0x308] sm:$0xff]  ;;  %v1414_v4 = vld [vmem:[#allocation17 + $0x300] sm:$0xff]  ;;  %v1624_v60 = vld [vmem:[#allocation17 + $0x150] sm:$0xff] }
 0x1cc   : > { %v981_v9 = vmax.f32 %v973_v6, 0.0  ;;  %4294 = vmatprep.subr.mxu0 %v1268_v12  ;;  %v1412_v6 = vld [vmem:[#allocation17 + $0x2c0] sm:$0xff]  ;;  %v1405_v11 = vld [vmem:[#allocation17 + $0x1c8] sm:$0xff] }
 0x1cd   : > { %v972_v7 = vadd.f32 %v5530_v59, %v957_v5  ;;  %v1267_v59 = vld [vmem:[#allocation14 + $0x68] sm:$0xff]  ;;  %4295 = vmatpush3.msra.mxu0 %v1268_v12 }
 0x1ce   : > { %4296 = vmatprep.subr.mxu0 %v1267_v59  ;;  %v1413_v5 = vld [vmem:[#allocation17 + $0x2c8] sm:$0xff]  ;;  %v1404_v53 = vld [vmem:[#allocation17 + $0x1c0] sm:$0xff] }
 0x1cf   : > { %v980_v8 = vmax.f32 %v972_v7, 0.0  ;;  %4297 = vmatpush3.msra.mxu0 %v1267_v59  ;;  %v1411_v7 = vld [vmem:[#allocation17 + $0x288] sm:$0xff]  ;;  %v1402_v59 = vld [vmem:[#allocation17 + $0x180] sm:$0xff] }
 0x1d0   : > { %4298 = vmatprep.subr.mxu0 %v1266_v13  ;;  %v1403_v12 = vld [vmem:[#allocation17 + $0x188] sm:$0xff] }
 0x1d1   : > { %4245 = vmatprep.mubr.f32.mxu0 %v980_v8  ;;  %4299 = vmatpush3.msra.mxu0 %v1266_v13  ;;  %v1410_v8 = vld [vmem:[#allocation17 + $0x280] sm:$0xff]  ;;  %v1401_v13 = vld [vmem:[#allocation17 + $0x148] sm:$0xff] }
 0x1d2   : > { %4246 = vmatmul.mubr.f32.gmra.mxu0 %v981_v9  ;;  %4300 = vmatprep.subr.mxu0 %v1265_v14  ;;  %v1409_v9 = vld [vmem:[#allocation17 + $0x248] sm:$0xff] }
 0x1d3   : > { %4301 = vmatpush3.msra.mxu0 %v1265_v14  ;;  %v1400_v14 = vld [vmem:[#allocation17 + $0x140] sm:$0xff] }
 0x1d4   : > { %4302 = vmatprep.subr.mxu0 %v1264_v15 }
 0x1d5   : > { %4303 = vmatpush3.msra.mxu0 %v1264_v15  ;;  %v1399_v15 = vld [vmem:[#allocation17 + $0x108] sm:$0xff] }
 0x1d6   : > { %4304 = vmatprep.subr.mxu0 %v1263_v16 }
 0x1d7   : > { %4305 = vmatpush3.msra.mxu0 %v1263_v16  ;;  %v1398_v16 = vld [vmem:[#allocation17 + $0x100] sm:$0xff] }
 0x1d8   : > { %4306 = vmatprep.subr.mxu0 %v1262_v17 }
 0x1d9   : > { %4307 = vmatpush3.msra.mxu0 %v1262_v17  ;;  %v1397_v17 = vld [vmem:[#allocation17 + $0xc8] sm:$0xff] }
 0x1da   : > { %4308 = vmatprep.subr.mxu0 %v1261_v18 }
 0x1db   : > { %4309 = vmatpush3.msra.mxu0 %v1261_v18  ;;  %v5560_v18 = vld [vmem:[#allocation12] ss:$0 sm:$0xff] }
 0x1dc   : > { %4310 = vmatprep.subr.mxu0 %v1260_v19 }
 0x1dd   : > { %4311 = vmatpush3.msra.mxu0 %v1260_v19 }
 0x1de   : > { %4312 = vmatprep.subr.mxu0 %v1259_v20 }
 0x1df   : > { %4313 = vmatpush3.msra.mxu0 %v1259_v20 }
 0x1e0   : > { %4314 = vmatprep.subr.mxu0 %v1258_v21 }
 0x1e1   : > { %4315 = vmatpush3.msra.mxu0 %v1258_v21 }
 0x1e2   : > { %4316 = vmatprep.subr.mxu0 %v1257_v55 }
 0x1e3   : > { %4317 = vmatpush3.msra.mxu0 %v1257_v55  ;;  %v1628_v55 = vld [vmem:[#allocation17 + $0x1d0] sm:$0xff] }
 0x1e4   : > { %4318 = vmatprep.subr.mxu0 %v1256_v56 }
 0x1e5   : > { %4319 = vmatpush3.msra.mxu0 %v1256_v56  ;;  %v1627_v56 = vld [vmem:[#allocation17 + $0x198] sm:$0xff] }
 0x1e6   : > { %4320 = vmatprep.subr.mxu0 %v1255_v57 }
 0x1e7   : > { %4321 = vmatpush3.msra.mxu0 %v1255_v57  ;;  %v1626_v57 = vld [vmem:[#allocation17 + $0x190] sm:$0xff] }
 0x1e8   : > { %4322 = vmatprep.subr.mxu0 %v1254_v58 }
 0x1e9   : > { %4323 = vmatpush3.msra.mxu0 %v1254_v58  ;;  %v1625_v58 = vld [vmem:[#allocation17 + $0x158] sm:$0xff] }
 0x1ea   : > { %1658 = vmatprep.subr.mxu0 %v1645_v61  ;;  %v1623_v61 = vld [vmem:[#allocation17 + $0x118] sm:$0xff] }
 0x25d   : > { %v4238_v23 = vpop.f32.mrf.mxu0 }
 0x25e   : > { %v1077_v24 = vadd.f32 %v4238_v23, %v4090_v22 }
 0x25f   : > { %v1071_v25 = vpop.f32.mrf.mxu0 }
 0x260   : > { %v1072_v26 = vadd.f32 %v4090_v22, %v1071_v25  ;;  %v1111_v28 = vmax.f32 %v1077_v24, 0.0  ;;  %v1644_v25 = vld [vmem:[#allocation17 + $0x3d0] sm:$0xff] }
 0x262   : > { %v1110_v27 = vmax.f32 %v1072_v26, 0.0  ;;  %v1643_v26 = vld [vmem:[#allocation17 + $0x398] sm:$0xff] }
 0x264   : > { %4280 = vmatprep.mubr.f32.mxu1 %v1110_v27  ;;  %v1642_v27 = vld [vmem:[#allocation17 + $0x390] sm:$0xff] }
 0x265   : > { %4281 = vmatmul.mubr.f32.vlgmr.msra.gmra.mxu1 %v1111_v28  ;;  %v1641_v28 = vld [vmem:[#allocation17 + $0x358] sm:$0xff] }
 0x266   : > { %1435 = vmatpush1.msra.mxu1 %v1420_v62  ;;  %v1622_v62 = vld [vmem:[#allocation17 + $0x110] sm:$0xff] }
 0x267   : > { %1436 = vmatprep.subr.mxu1 %v1419_v63  ;;  %v1621_v63 = vld [vmem:[#allocation17 + $0xd8] sm:$0xff] }
 0x268   : > { %1437 = vmatpush1.msra.mxu1 %v1418_v0 }
 0x269   : > { %1438 = vmatprep.subr.mxu1 %v1417_v1 }
 0x26a   : > { %1439 = vmatpush1.msra.mxu1 %v1416_v2 }
 0x26b   : > { %1440 = vmatprep.subr.mxu1 %v1415_v3 }
 0x26c   : > { %v4241_v29 = vpop.f32.mrf.mxu0  ;;  %1441 = vmatpush1.msra.mxu1 %v1414_v4 }
 0x26d   : > { %v1087_v30 = vadd.f32 %v4241_v29, %v4090_v22  ;;  %1442 = vmatprep.subr.mxu1 %v1413_v5  ;;  %v1640_v29 = vld [vmem:[#allocation17 + $0x350] sm:$0xff] }
 0x26e   : > { %v1081_v31 = vpop.f32.mrf.mxu0  ;;  %1443 = vmatpush1.msra.mxu1 %v1412_v6 }
 0x26f   : > { %v1082_v32 = vadd.f32 %v4090_v22, %v1081_v31  ;;  %v1113_v34 = vmax.f32 %v1087_v30, 0.0  ;;  %1444 = vmatprep.subr.mxu1 %v1411_v7  ;;  %v1639_v30 = vld [vmem:[#allocation17 + $0x318] sm:$0xff]  ;;  %v1638_v31 = vld [vmem:[#allocation17 + $0x310] sm:$0xff] }
 0x270   : > { %1445 = vmatpush1.msra.mxu1 %v1410_v8 }
 0x271   : > { %v1112_v33 = vmax.f32 %v1082_v32, 0.0  ;;  %1446 = vmatprep.subr.mxu1 %v1409_v9  ;;  %v1637_v32 = vld [vmem:[#allocation17 + $0x2d8] sm:$0xff] }
 0x272   : > { %1447 = vmatpush1.msra.mxu1 %v1408_v10 }
 0x273   : > { %4283 = vmatprep.mubr.f32.mxu1 %v1112_v33  ;;  %1448 = vmatprep.subr.mxu1 %v1407_v48  ;;  %v1636_v33 = vld [vmem:[#allocation17 + $0x2d0] sm:$0xff] }
 0x274   : > { %4284 = vmatmul.mubr.f32.gmra.mxu1 %v1113_v34 }
 0x275   : > { %1449 = vmatpush1.msra.mxu1 %v1406_v46  ;;  %v1396_v46 = vld [vmem:[#allocation17 + $0xc0] sm:$0xff] }
 0x276   : > { %1450 = vmatprep.subr.mxu1 %v1405_v11  ;;  %v1620_v11 = vld [vmem:[#allocation17 + $0xd0] sm:$0xff] }
 0x277   : > { %1451 = vmatpush1.msra.mxu1 %v1404_v53  ;;  %v1395_v53 = vld [vmem:[#allocation17 + $0x88] sm:$0xff] }
 0x278   : > { %1452 = vmatprep.subr.mxu1 %v1403_v12  ;;  %v1619_v12 = vld [vmem:[#allocation17 + $0x98] sm:$0xff] }
 0x279   : > { %1453 = vmatpush1.msra.mxu1 %v1402_v59  ;;  %v1394_v59 = vld [vmem:[#allocation17 + $0x80] sm:$0xff] }
 0x27a   : > { %1454 = vmatprep.subr.mxu1 %v1401_v13  ;;  %v1618_v13 = vld [vmem:[#allocation17 + $0x90] sm:$0xff] }
 0x27b   : > { %1455 = vmatpush1.msra.mxu1 %v1400_v14  ;;  %v1393_v14 = vld [vmem:[#allocation17 + $0x48] sm:$0xff] }
 0x27c   : > { %1456 = vmatprep.subr.mxu1 %v1399_v15  ;;  %v1617_v15 = vld [vmem:[#allocation17 + $0x58] sm:$0xff] }
 0x27d   : > { %1457 = vmatpush1.msra.mxu1 %v1398_v16  ;;  %v1392_v16 = vld [vmem:[#allocation17 + $0x40] sm:$0xff] }
 0x27e   : > { %1458 = vmatprep.subr.mxu1 %v1397_v17  ;;  %v1616_v17 = vld [vmem:[#allocation17 + $0x50] sm:$0xff] }
 0x27f   : > { %v4244_v35 = vpop.f32.mrf.mxu0  ;;  %1459 = vmatpush1.msra.mxu1 %v1396_v46  ;;  %v2070_v46 = vld [vmem:[#allocation17 + $0x230] sm:$0xff] }
 0x280   : > { %v1097_v36 = vadd.f32 %v4244_v35, %v4090_v22  ;;  %v1635_v35 = vld [vmem:[#allocation17 + $0x298] sm:$0xff]  ;;  %1460 = vmatprep.subr.mxu1 %v1395_v53 }
 0x281   : > { %v1091_v37 = vpop.f32.mrf.mxu0  ;;  %1461 = vmatpush1.msra.mxu1 %v1394_v59  ;;  %v2069_v53 = vld [vmem:[#allocation17 + $0x1f8] sm:$0xff]  ;;  %v2068_v59 = vld [vmem:[#allocation17 + $0x1f0] sm:$0xff] }
 0x282   : > { %v1092_v38 = vadd.f32 %v4090_v22, %v1091_v37  ;;  %v1115_v43 = vmax.f32 %v1097_v36, 0.0  ;;  %v1634_v36 = vld [vmem:[#allocation17 + $0x290] sm:$0xff]  ;;  %1462 = vmatprep.subr.mxu1 %v1393_v14  ;;  %v2067_v14 = vld [vmem:[#allocation17 + $0x1b8] sm:$0xff] }
 0x283   : > { %1463 = vmatpush1.msra.mxu1 %v1392_v16  ;;  %v2066_v16 = vld [vmem:[#allocation17 + $0x1b0] sm:$0xff] }
 0x284   : > { %v1114_v42 = vmax.f32 %v1092_v38, 0.0 }
 0x286   : > { %4286 = vmatprep.mubr.f32.mxu1 %v1114_v42  ;;  %v1633_v42 = vld [vmem:[#allocation17 + $0x258] sm:$0xff] }
 0x287   : > { %4287 = vmatmul.mubr.f32.gmra.mxu1 %v1115_v43 }
 0x292   : > { %v4247_v44 = vpop.f32.mrf.mxu0 }
 0x293   : > { %v1107_v49 = vadd.f32 %v4247_v44, %v4090_v22  ;;  %v1632_v44 = vld [vmem:[#allocation17 + $0x250] sm:$0xff] }
 0x294   : > { %v1101_v50 = vpop.f32.mrf.mxu0 }
 0x295   : > { %v1102_v51 = vadd.f32 %v4090_v22, %v1101_v50  ;;  %v1117_v54 = vmax.f32 %v1107_v49, 0.0  ;;  %v1631_v49 = vld [vmem:[#allocation17 + $0x218] sm:$0xff] }
 0x297   : > { %v1116_v52 = vmax.f32 %v1102_v51, 0.0 }
 0x299   : > { %4289 = vmatprep.mubr.f32.mxu1 %v1116_v52  ;;  %v1630_v52 = vld [vmem:[#allocation17 + $0x210] sm:$0xff] }
 0x29a   : > { %4290 = vmatmul.mubr.f32.gmra.mxu1 %v1117_v54  ;;  %v1629_v54 = vld [vmem:[#allocation17 + $0x1d8] sm:$0xff] }
 0x325   : > { %v4282_v19 = vpop.f32.mrf.mxu1 }
 0x326   : > { %v1213_v20 = vadd.f32 %v4282_v19, %v5560_v18  ;;  %v1615_v19 = vld [vmem:[#allocation17 + $0x18] sm:$0xff] }
 0x327   : > { %v1207_v21 = vpop.f32.mrf.mxu1 }
 0x328   : > { %v1208_v22 = vadd.f32 %v5560_v18, %v1207_v21  ;;  %v1247_v24 = vmax.f32 %v1213_v20, 0.0  ;;  %v1390_v20 = vld [vmem:[#allocation17] sm:$0xff]  ;;  %v1614_v21 = vld [vmem:[#allocation17 + $0x10] sm:$0xff] }
 0x32a   : > { %v1246_v23 = vmax.f32 %v1208_v22, 0.0  ;;  %v5140_v22 = vmov 0.0  }
 0x32b   : > { %1498 = vmatprep.mubr.f32.mxu1 %v5140_v22  ;;  %793 = vst [vmem:[#allocation2] sm:$0xff] %v5140_v22 }
 0x32c   : > { %4324 = vmatprep.mubr.f32.mxu0 %v1246_v23  ;;  %v1865_v23 = vld [vmem:[#allocation17 + $0x3e8] sm:$0xff] }
 0x32d   : > { %4325 = vmatmul.mubr.f32.vlgmr.msra.gmra.mxu0 %v1247_v24  ;;  %v2085_v24 = vld [vmem:[#allocation17 + $0x3f8] sm:$0xff] }
 0x32e   : > { %1659 = vmatpush1.msra.mxu0 %v1644_v25 }
 0x32f   : > { %1660 = vmatprep.subr.mxu0 %v1643_v26  ;;  %v5573_v26 = vld [vmem:[#allocation15] ss:$0 sm:$0xff] }
 0x330   : > { %1661 = vmatpush1.msra.mxu0 %v1642_v27 }
 0x331   : > { %1662 = vmatprep.subr.mxu0 %v1641_v28 }
 0x332   : > { %1663 = vmatpush1.msra.mxu0 %v1640_v29 }
 0x333   : > { %1664 = vmatprep.subr.mxu0 %v1639_v30 }
 0x334   : > { %v4285_v34 = vpop.f32.mrf.mxu1  ;;  %1665 = vmatpush1.msra.mxu0 %v1638_v31  ;;  %v1864_v31 = vld [vmem:[#allocation17 + $0x3e0] sm:$0xff] }
 0x335   : > { %1666 = vmatprep.subr.mxu0 %v1637_v32  ;;  %v1223_v37 = vadd.f32 %v4285_v34, %v5560_v18  ;;  %v2084_v32 = vld [vmem:[#allocation17 + $0x3f0] sm:$0xff]  ;;  %v2083_v34 = vld [vmem:[#allocation17 + $0x3b8] sm:$0xff] }
 0x336   : > { %v1217_v38 = vpop.f32.mrf.mxu1  ;;  %1667 = vmatpush1.msra.mxu0 %v1636_v33  ;;  %v1863_v33 = vld [vmem:[#allocation17 + $0x3a8] sm:$0xff] }
 0x337   : > { %v1218_v43 = vadd.f32 %v5560_v18, %v1217_v38  ;;  %1668 = vmatprep.subr.mxu0 %v1635_v35  ;;  %v1249_v51 = vmax.f32 %v1223_v37, 0.0  ;;  %v2082_v37 = vld [vmem:[#allocation17 + $0x3b0] sm:$0xff]  ;;  %v1861_v38 = vld [vmem:[#allocation17 + $0x368] sm:$0xff] }
 0x338   : > { %1669 = vmatpush1.msra.mxu0 %v1634_v36  ;;  %v1862_v36 = vld [vmem:[#allocation17 + $0x3a0] sm:$0xff] }
 0x339   : > { %v1248_v50 = vmax.f32 %v1218_v43, 0.0  ;;  %1670 = vmatprep.subr.mxu0 %v1633_v42  ;;  %v2081_v42 = vld [vmem:[#allocation17 + $0x378] sm:$0xff]  ;;  %v1860_v43 = vld [vmem:[#allocation17 + $0x360] sm:$0xff] }
 0x33a   : > { %1671 = vmatpush1.msra.mxu0 %v1632_v44  ;;  %v2080_v44 = vld [vmem:[#allocation17 + $0x370] sm:$0xff] }
 0x33b   : > { %4327 = vmatprep.mubr.f32.mxu0 %v1248_v50  ;;  %1672 = vmatprep.subr.mxu0 %v1631_v49  ;;  %v1859_v49 = vld [vmem:[#allocation17 + $0x328] sm:$0xff]  ;;  %v2079_v50 = vld [vmem:[#allocation17 + $0x338] sm:$0xff] }
 0x33c   : > { %4328 = vmatmul.mubr.f32.gmra.mxu0 %v1249_v51  ;;  %v1858_v51 = vld [vmem:[#allocation17 + $0x320] sm:$0xff] }
 0x33d   : > { %1673 = vmatpush1.msra.mxu0 %v1630_v52  ;;  %v2078_v52 = vld [vmem:[#allocation17 + $0x330] sm:$0xff] }
 0x33e   : > { %1674 = vmatprep.subr.mxu0 %v1629_v54 }
 0x33f   : > { %1675 = vmatpush1.msra.mxu0 %v1628_v55  ;;  %v1857_v55 = vld [vmem:[#allocation17 + $0x2e8] sm:$0xff] }
 0x340   : > { %1676 = vmatprep.subr.mxu0 %v1627_v56  ;;  %v2077_v56 = vld [vmem:[#allocation17 + $0x2f8] sm:$0xff] }
 0x341   : > { %1677 = vmatpush1.msra.mxu0 %v1626_v57  ;;  %v1856_v57 = vld [vmem:[#allocation17 + $0x2e0] sm:$0xff] }
 0x342   : > { %1678 = vmatprep.subr.mxu0 %v1625_v58  ;;  %v2076_v58 = vld [vmem:[#allocation17 + $0x2f0] sm:$0xff] }
 0x343   : > { %1679 = vmatpush1.msra.mxu0 %v1624_v60 }
 0x344   : > { %1680 = vmatprep.subr.mxu0 %v1623_v61  ;;  %v1855_v61 = vld [vmem:[#allocation17 + $0x2a8] sm:$0xff] }
 0x345   : > { %1681 = vmatpush1.msra.mxu0 %v1622_v62  ;;  %v2075_v62 = vld [vmem:[#allocation17 + $0x2b8] sm:$0xff] }
 0x346   : > { %1682 = vmatprep.subr.mxu0 %v1621_v63 }
 0x347   : > { %v4288_v0 = vpop.f32.mrf.mxu1  ;;  %1683 = vmatpush1.msra.mxu0 %v1620_v11  ;;  %v1849_v11 = vld [vmem:[#allocation17 + $0x1e8] sm:$0xff] }
 0x348   : > { %v1233_v1 = vadd.f32 %v4288_v0, %v5560_v18  ;;  %1684 = vmatprep.subr.mxu0 %v1619_v12  ;;  %v1854_v0 = vld [vmem:[#allocation17 + $0x2a0] sm:$0xff] }
 0x349   : > { %v1227_v2 = vpop.f32.mrf.mxu1  ;;  %1685 = vmatpush1.msra.mxu0 %v1618_v13  ;;  %v1848_v12 = vld [vmem:[#allocation17 + $0x1e0] sm:$0xff]  ;;  %v1847_v13 = vld [vmem:[#allocation17 + $0x1a8] sm:$0xff] }
 0x34a   : > { %v1228_v3 = vadd.f32 %v5560_v18, %v1227_v2  ;;  %v1251_v5 = vmax.f32 %v1233_v1, 0.0  ;;  %1686 = vmatprep.subr.mxu0 %v1617_v15  ;;  %v2074_v1 = vld [vmem:[#allocation17 + $0x2b0] sm:$0xff]  ;;  %v1846_v15 = vld [vmem:[#allocation17 + $0x1a0] sm:$0xff] }
 0x34b   : > { %1687 = vmatpush1.msra.mxu0 %v1616_v17  ;;  %v1845_v17 = vld [vmem:[#allocation17 + $0x168] sm:$0xff] }
 0x34c   : > { %v1250_v4 = vmax.f32 %v1228_v3, 0.0  ;;  %1688 = vmatprep.subr.mxu0 %v1615_v19  ;;  %v1844_v19 = vld [vmem:[#allocation17 + $0x160] sm:$0xff] }
 0x34d   : > { %1689 = vmatpush1.msra.mxu0 %v1614_v21  ;;  %v1843_v21 = vld [vmem:[#allocation17 + $0x128] sm:$0xff] }
 0x34e   : > { %4330 = vmatprep.mubr.f32.mxu0 %v1250_v4  ;;  %2098 = vmatprep.subr.mxu0 %v2085_v24  ;;  %v1853_v4 = vld [vmem:[#allocation17 + $0x268] sm:$0xff] }
 0x34f   : > { %4331 = vmatmul.mubr.f32.gmra.mxu0 %v1251_v5  ;;  %v2073_v5 = vld [vmem:[#allocation17 + $0x278] sm:$0xff] }
 0x35a   : > { %v4291_v6 = vpop.f32.mrf.mxu1 }
 0x35b   : > { %v1243_v7 = vadd.f32 %v4291_v6, %v5560_v18  ;;  %v1852_v6 = vld [vmem:[#allocation17 + $0x260] sm:$0xff] }
 0x35c   : > { %v1237_v8 = vpop.f32.mrf.mxu1 }
 0x35d   : > { %v1238_v9 = vadd.f32 %v5560_v18, %v1237_v8  ;;  %v1253_v48 = vmax.f32 %v1243_v7, 0.0  ;;  %v1391_v18 = vld [vmem:[#allocation17 + $0x8] sm:$0xff]  ;;  %v2072_v7 = vld [vmem:[#allocation17 + $0x270] sm:$0xff] }
 0x35e   : > { %1464 = vmatprep.subr.mxu1 %v1391_v18  ;;  %v2065_v18 = vld [vmem:[#allocation17 + $0x178] sm:$0xff] }
 0x35f   : > { %v1252_v10 = vmax.f32 %v1238_v9, 0.0  ;;  %1465 = vmatpush1.msra.mxu1 %v1390_v20  ;;  %v1851_v9 = vld [vmem:[#allocation17 + $0x228] sm:$0xff]  ;;  %v2064_v20 = vld [vmem:[#allocation17 + $0x170] sm:$0xff] }
 0x360   : > { %1878 = vmatprep.subr.mxu1 %v1865_v23  ;;  %v2063_v23 = vld [vmem:[#allocation17 + $0x138] sm:$0xff] }
 0x361   : > { %4333 = vmatprep.mubr.f32.mxu0 %v1252_v10  ;;  %v2071_v10 = vld [vmem:[#allocation17 + $0x238] sm:$0xff] }
 0x362   : > { %4334 = vmatmul.mubr.f32.gmra.mxu0 %v1253_v48  ;;  %v1850_v48 = vld [vmem:[#allocation17 + $0x220] sm:$0xff] }
 0x363   : > { %1722 = vmatprep.mubr.f32.mxu0 %v5140_v22 }
 0x3ed   : > { %v4326_v25 = vpop.f32.mrf.mxu0 }
 0x3ee   : > { %v1349_v29 = vadd.f32 %v4326_v25, %v5573_v26  ;;  %v1842_v25 = vld [vmem:[#allocation17 + $0x120] sm:$0xff] }
 0x3ef   : > { %v1343_v27 = vpop.f32.mrf.mxu0 }
 0x3f0   : > { %v1344_v28 = vadd.f32 %v5573_v26, %v1343_v27  ;;  %v5583_v35 = vmax.f32 %v1349_v29, 0.0  ;;  %v2062_v27 = vld [vmem:[#allocation17 + $0x130] sm:$0xff]  ;;  %v2061_v29 = vld [vmem:[#allocation17 + $0xf8] sm:$0xff] }
 0x3f2   : > { %v5577_v30 = vmax.f32 %v1344_v28, 0.0  ;;  %v1841_v28 = vld [vmem:[#allocation17 + $0xe8] sm:$0xff] }
 0x3f4   : > { %1499 = vmatmul.mubr.f32.vlgmr.msra.gmra.mxu1 %v5577_v30  ;;  %1723 = vmatmul.mubr.f32.vlgmr.msra.gmra.mxu0 %v5577_v30 }
 0x3f5   : > { %1504 = vmatprep.mubr.f32.mxu1 %v5140_v22  ;;  %1728 = vmatprep.mubr.f32.mxu0 %v5140_v22 }
 0x3f6   : > { %1879 = vmatpush1.msra.mxu1 %v1864_v31  ;;  %2099 = vmatpush1.msra.mxu0 %v2084_v32  ;;  %v1840_v32 = vld [vmem:[#allocation17 + $0xe0] sm:$0xff] }
 0x3f7   : > { %1880 = vmatprep.subr.mxu1 %v1863_v33  ;;  %2100 = vmatprep.subr.mxu0 %v2083_v34  ;;  %v2060_v33 = vld [vmem:[#allocation17 + $0xf0] sm:$0xff] }
 0x3f8   : > { %1505 = vmatmul.mubr.f32.gmra.mxu1 %v5583_v35  ;;  %1729 = vmatmul.mubr.f32.gmra.mxu0 %v5583_v35 }
 0x3f9   : > { %1510 = vmatprep.mubr.f32.mxu1 %v5140_v22  ;;  %1734 = vmatprep.mubr.f32.mxu0 %v5140_v22 }
 0x3fa   : > { %1881 = vmatpush1.msra.mxu1 %v1862_v36  ;;  %2101 = vmatpush1.msra.mxu0 %v2082_v37  ;;  %v1839_v36 = vld [vmem:[#allocation17 + $0xa8] sm:$0xff]  ;;  %v2059_v37 = vld [vmem:[#allocation17 + $0xb8] sm:$0xff] }
 0x3fb   : > { %1882 = vmatprep.subr.mxu1 %v1861_v38  ;;  %2102 = vmatprep.subr.mxu0 %v2081_v42 }
 0x3fc   : > { %v4329_v54 = vpop.f32.mrf.mxu0  ;;  %1883 = vmatpush1.msra.mxu1 %v1860_v43  ;;  %2103 = vmatpush1.msra.mxu0 %v2080_v44  ;;  %v1838_v43 = vld [vmem:[#allocation17 + $0xa0] sm:$0xff]  ;;  %v2058_v44 = vld [vmem:[#allocation17 + $0xb0] sm:$0xff] }
 0x3fd   : > { %1884 = vmatprep.subr.mxu1 %v1859_v49  ;;  %2104 = vmatprep.subr.mxu0 %v2079_v50  ;;  %v1359_v2 = vadd.f32 %v4329_v54, %v5573_v26  ;;  %v1837_v49 = vld [vmem:[#allocation17 + $0x68] sm:$0xff]  ;;  %v2057_v50 = vld [vmem:[#allocation17 + $0x78] sm:$0xff]  ;;  %v2056_v54 = vld [vmem:[#allocation17 + $0x70] sm:$0xff] }
 0x3fe   : > { %v1353_v60 = vpop.f32.mrf.mxu0  ;;  %1885 = vmatpush1.msra.mxu1 %v1858_v51  ;;  %2105 = vmatpush1.msra.mxu0 %v2078_v52  ;;  %v1836_v52 = vld [vmem:[#allocation17 + $0x60] sm:$0xff] }
 0x3ff   : > { %v1354_v63 = vadd.f32 %v5573_v26, %v1353_v60  ;;  %1886 = vmatprep.subr.mxu1 %v1857_v55  ;;  %2106 = vmatprep.subr.mxu0 %v2077_v56  ;;  %v5597_v8 = vmax.f32 %v1359_v2, 0.0  ;;  %v1835_v55 = vld [vmem:[#allocation17 + $0x28] sm:$0xff]  ;;  %v2055_v56 = vld [vmem:[#allocation17 + $0x38] sm:$0xff] }
 0x400   : > { %1887 = vmatpush1.msra.mxu1 %v1856_v57  ;;  %2107 = vmatpush1.msra.mxu0 %v2076_v58  ;;  %v1834_v57 = vld [vmem:[#allocation17 + $0x20] sm:$0xff]  ;;  %v2054_v58 = vld [vmem:[#allocation17 + $0x30] sm:$0xff]  ;;  %v2466_v2 = vld [vmem:[#allocation20 + $0x5e0] sm:$0xff] }
 0x401   : > { %v5591_v3 = vmax.f32 %v1354_v63, 0.0  ;;  %1888 = vmatprep.subr.mxu1 %v1855_v61  ;;  %2108 = vmatprep.subr.mxu0 %v2075_v62 }
 0x402   : > { %1889 = vmatpush1.msra.mxu1 %v1854_v0  ;;  %2109 = vmatpush1.msra.mxu0 %v2074_v1 }
 0x403   : > { %1511 = vmatmul.mubr.f32.gmra.mxu1 %v5591_v3  ;;  %1735 = vmatmul.mubr.f32.gmra.mxu0 %v5591_v3 }
 0x404   : > { %1516 = vmatprep.mubr.f32.mxu1 %v5140_v22  ;;  %1740 = vmatprep.mubr.f32.mxu0 %v5140_v22 }
 0x405   : > { %1890 = vmatprep.subr.mxu1 %v1853_v4  ;;  %2110 = vmatprep.subr.mxu0 %v2073_v5  ;;  %v2463_v4 = vld [vmem:[#allocation20 + $0x5c8] sm:$0xff]  ;;  %v2334_v5 = vld [vmem:[#allocation20 + $0x1c0] sm:$0xff] }
 0x406   : > { %1891 = vmatpush1.msra.mxu1 %v1852_v6  ;;  %2111 = vmatpush1.msra.mxu0 %v2072_v7  ;;  %v2462_v6 = vld [vmem:[#allocation20 + $0x5c0] sm:$0xff]  ;;  %v2331_v7 = vld [vmem:[#allocation20 + $0x1a8] sm:$0xff] }
 0x407   : > { %1517 = vmatmul.mubr.f32.gmra.mxu1 %v5597_v8  ;;  %1741 = vmatmul.mubr.f32.gmra.mxu0 %v5597_v8 }
 0x408   : > { %1522 = vmatprep.mubr.f32.mxu1 %v5140_v22  ;;  %1746 = vmatprep.mubr.f32.mxu0 %v5140_v22 }
 0x409   : > { %1892 = vmatprep.subr.mxu1 %v1851_v9  ;;  %2112 = vmatprep.subr.mxu0 %v2071_v10  ;;  %v2458_v9 = vld [vmem:[#allocation20 + $0x5a0] sm:$0xff]  ;;  %v2327_v10 = vld [vmem:[#allocation20 + $0x188] sm:$0xff] }
 0x40a   : > { %1893 = vmatpush1.msra.mxu1 %v1850_v48  ;;  %2113 = vmatpush1.msra.mxu0 %v2070_v46  ;;  %v2455_v48 = vld [vmem:[#allocation20 + $0x588] sm:$0xff]  ;;  %v2326_v46 = vld [vmem:[#allocation20 + $0x180] sm:$0xff] }
 0x40b   : > { %1894 = vmatprep.subr.mxu1 %v1849_v11  ;;  %2114 = vmatprep.subr.mxu0 %v2069_v53  ;;  %v2454_v11 = vld [vmem:[#allocation20 + $0x580] sm:$0xff]  ;;  %v2323_v53 = vld [vmem:[#allocation20 + $0x168] sm:$0xff] }
 0x40c   : > { %1895 = vmatpush1.msra.mxu1 %v1848_v12  ;;  %2115 = vmatpush1.msra.mxu0 %v2068_v59  ;;  %v2451_v12 = vld [vmem:[#allocation20 + $0x568] sm:$0xff]  ;;  %v2322_v59 = vld [vmem:[#allocation20 + $0x160] sm:$0xff] }
 0x40d   : > { %1896 = vmatprep.subr.mxu1 %v1847_v13  ;;  %2116 = vmatprep.subr.mxu0 %v2067_v14  ;;  %v2450_v13 = vld [vmem:[#allocation20 + $0x560] sm:$0xff]  ;;  %v2319_v14 = vld [vmem:[#allocation20 + $0x148] sm:$0xff] }
 0x40e   : > { %1897 = vmatpush1.msra.mxu1 %v1846_v15  ;;  %2117 = vmatpush1.msra.mxu0 %v2066_v16  ;;  %v2447_v15 = vld [vmem:[#allocation20 + $0x548] sm:$0xff]  ;;  %v2318_v16 = vld [vmem:[#allocation20 + $0x140] sm:$0xff] }
 0x40f   : > { %v4332_v24 = vpop.f32.mrf.mxu0  ;;  %1898 = vmatprep.subr.mxu1 %v1845_v17  ;;  %2118 = vmatprep.subr.mxu0 %v2065_v18  ;;  %v2446_v17 = vld [vmem:[#allocation20 + $0x540] sm:$0xff]  ;;  %v2315_v18 = vld [vmem:[#allocation20 + $0x128] sm:$0xff] }
 0x410   : > { %1899 = vmatpush1.msra.mxu1 %v1844_v19  ;;  %2119 = vmatpush1.msra.mxu0 %v2064_v20  ;;  %v1369_v38 = vadd.f32 %v4332_v24, %v5573_v26  ;;  %v2443_v19 = vld [vmem:[#allocation20 + $0x528] sm:$0xff]  ;;  %v2314_v20 = vld [vmem:[#allocation20 + $0x120] sm:$0xff] }
 0x411   : > { %v1363_v31 = vpop.f32.mrf.mxu0  ;;  %1900 = vmatprep.subr.mxu1 %v1843_v21  ;;  %2120 = vmatprep.subr.mxu0 %v2063_v23  ;;  %v2442_v21 = vld [vmem:[#allocation20 + $0x520] sm:$0xff]  ;;  %v2311_v23 = vld [vmem:[#allocation20 + $0x108] sm:$0xff] }
 0x412   : > { %v1364_v34 = vadd.f32 %v5573_v26, %v1363_v31  ;;  %1901 = vmatpush1.msra.mxu1 %v1842_v25  ;;  %2121 = vmatpush1.msra.mxu0 %v2062_v27  ;;  %v1387_v51 = vmax.f32 %v1369_v38, 0.0  ;;  %v2439_v24 = vld [vmem:[#allocation20 + $0x508] sm:$0xff]  ;;  %v2310_v25 = vld [vmem:[#allocation20 + $0x100] sm:$0xff] }
 0x413   : > { %1902 = vmatprep.subr.mxu1 %v1841_v28  ;;  %2122 = vmatprep.subr.mxu0 %v2061_v29  ;;  %v2438_v27 = vld [vmem:[#allocation20 + $0x500] sm:$0xff]  ;;  %v2307_v28 = vld [vmem:[#allocation20 + $0xe8] sm:$0xff] }
 0x414   : > { %v5605_v42 = vmax.f32 %v1364_v34, 0.0  ;;  %1903 = vmatpush1.msra.mxu1 %v1840_v32  ;;  %2123 = vmatpush1.msra.mxu0 %v2060_v33  ;;  %v2435_v29 = vld [vmem:[#allocation20 + $0x4e8] sm:$0xff]  ;;  %v2306_v31 = vld [vmem:[#allocation20 + $0xe0] sm:$0xff] }
 0x415   : > { %1904 = vmatprep.subr.mxu1 %v1839_v36  ;;  %2124 = vmatprep.subr.mxu0 %v2059_v37  ;;  %v2434_v32 = vld [vmem:[#allocation20 + $0x4e0] sm:$0xff]  ;;  %v2303_v33 = vld [vmem:[#allocation20 + $0xc8] sm:$0xff] }
 0x416   : > { %1523 = vmatmul.mubr.f32.gmra.mxu1 %v5605_v42  ;;  %1747 = vmatmul.mubr.f32.gmra.mxu0 %v5605_v42  ;;  %v2431_v34 = vld [vmem:[#allocation20 + $0x4c8] sm:$0xff]  ;;  %v2302_v36 = vld [vmem:[#allocation20 + $0xc0] sm:$0xff] }
 0x417   : > { %1528 = vmatprep.mubr.f32.mxu1 %v5140_v22  ;;  %1752 = vmatprep.mubr.f32.mxu0 %v5140_v22  ;;  %v2430_v37 = vld [vmem:[#allocation20 + $0x4c0] sm:$0xff]  ;;  %v2299_v38 = vld [vmem:[#allocation20 + $0xa8] sm:$0xff] }
 0x418   : > { %1905 = vmatpush1.msra.mxu1 %v1838_v43  ;;  %2125 = vmatpush1.msra.mxu0 %v2058_v44  ;;  %v2298_v43 = vld [vmem:[#allocation20 + $0xa0] sm:$0xff] }
 0x419   : > { %1906 = vmatprep.subr.mxu1 %v1837_v49  ;;  %2126 = vmatprep.subr.mxu0 %v2057_v50  ;;  %v2426_v44 = vld [vmem:[#allocation20 + $0x4a0] sm:$0xff]  ;;  %v2295_v49 = vld [vmem:[#allocation20 + $0x88] sm:$0xff] }
 0x41a   : > { %1529 = vmatmul.mubr.f32.gmra.mxu1 %v1387_v51  ;;  %1753 = vmatmul.mubr.f32.gmra.mxu0 %v1387_v51  ;;  %v2423_v50 = vld [vmem:[#allocation20 + $0x488] sm:$0xff] }
 0x41b   : > { %1534 = vmatprep.mubr.f32.mxu1 %v5140_v22  ;;  %1758 = vmatprep.mubr.f32.mxu0 %v5140_v22 }
 0x41c   : > { %1907 = vmatpush1.msra.mxu1 %v1836_v52  ;;  %2127 = vmatpush1.msra.mxu0 %v2056_v54  ;;  %v2422_v52 = vld [vmem:[#allocation20 + $0x480] sm:$0xff]  ;;  %v2291_v54 = vld [vmem:[#allocation20 + $0x68] sm:$0xff] }
 0x41d   : > { %1908 = vmatprep.subr.mxu1 %v1835_v55  ;;  %2128 = vmatprep.subr.mxu0 %v2055_v56  ;;  %v2419_v55 = vld [vmem:[#allocation20 + $0x468] sm:$0xff]  ;;  %v2290_v56 = vld [vmem:[#allocation20 + $0x60] sm:$0xff] }
 0x41e   : > { %1909 = vmatpush1.msra.mxu1 %v1834_v57  ;;  %2129 = vmatpush1.msra.mxu0 %v2054_v58  ;;  %v2418_v57 = vld [vmem:[#allocation20 + $0x460] sm:$0xff]  ;;  %v2287_v58 = vld [vmem:[#allocation20 + $0x48] sm:$0xff] }
 0x422   : > { %v4335_v60 = vpop.f32.mrf.mxu0 }
 0x423   : > { %v1379_v63 = vadd.f32 %v4335_v60, %v5573_v26  ;;  %v2415_v60 = vld [vmem:[#allocation20 + $0x448] sm:$0xff] }
 0x424   : > { %v1373_v61 = vpop.f32.mrf.mxu0 }
 0x425   : > { %v1374_v62 = vadd.f32 %v5573_v26, %v1373_v61  ;;  %v1389_v1 = vmax.f32 %v1379_v63, 0.0  ;;  %v2339_v26 = vld [vmem:[#allocation20 + $0x1e8] sm:$0xff]  ;;  %v2286_v61 = vld [vmem:[#allocation20 + $0x40] sm:$0xff] }
 0x426   : > { %2853 = vmatprep.subr.mxu1 %v2339_v26  ;;  %v2283_v63 = vld [vmem:[#allocation20 + $0x28] sm:$0xff]  ;;  %v2410_v26 = vld [vmem:[#allocation20 + $0x420] sm:$0xff] }
 0x427   : > { %v1388_v0 = vmax.f32 %v1374_v62, 0.0  ;;  %v2414_v62 = vld [vmem:[#allocation20 + $0x440] sm:$0xff] }
 0x429   : > { %1535 = vmatmul.mubr.f32.gmra.mxu1 %v1388_v0  ;;  %1759 = vmatmul.mubr.f32.gmra.mxu0 %v1388_v0 }
 0x42a   : > { %1540 = vmatprep.mubr.f32.mxu1 %v5140_v22  ;;  %1764 = vmatprep.mubr.f32.mxu0 %v5140_v22 }
 0x42d   : > { %1541 = vmatmul.mubr.f32.gmra.mxu1 %v1389_v1  ;;  %1765 = vmatmul.mubr.f32.gmra.mxu0 %v1389_v1 }
 0x42e   : > { %1942 = vmatprep.mubr.f32.mxu1 %v5140_v22  ;;  %2162 = vmatprep.mubr.f32.mxu0 %v5140_v22 }
 0x431   : > { %1943 = vmatmul.mubr.f32.vlgmr.msra.gmra.mxu1 %v5577_v30  ;;  %2163 = vmatmul.mubr.f32.vlgmr.msra.gmra.mxu0 %v5577_v30  ;;  %v2467_v30 = vld [vmem:[#allocation20 + $0x5e8] sm:$0xff] }
 0x432   : > { %1948 = vmatprep.mubr.f32.mxu1 %v5140_v22  ;;  %2168 = vmatprep.mubr.f32.mxu0 %v5140_v22 }
 0x433   : > { %2924 = vmatprep.subr.mxu0 %v2467_v30  ;;  %v2279_v30 = vld [vmem:[#allocation20 + $0x8] sm:$0xff] }
 0x434   : > { %2925 = vmatpush1.msra.mxu0 %v2466_v2  ;;  %v2278_v2 = vld [vmem:[#allocation20] sm:$0xff] }
 0x435   : > { %1949 = vmatmul.mubr.f32.gmra.mxu1 %v5583_v35  ;;  %2169 = vmatmul.mubr.f32.gmra.mxu0 %v5583_v35  ;;  %v2338_v35 = vld [vmem:[#allocation20 + $0x1e0] sm:$0xff] }
 0x436   : > { %1954 = vmatprep.mubr.f32.mxu1 %v5140_v22  ;;  %2174 = vmatprep.mubr.f32.mxu0 %v5140_v22 }
 0x437   : > { %2854 = vmatpush1.msra.mxu1 %v2338_v35  ;;  %2926 = vmatprep.subr.mxu0 %v2463_v4  ;;  %v2407_v35 = vld [vmem:[#allocation20 + $0x408] sm:$0xff] }
 0x438   : > { %2927 = vmatpush1.msra.mxu0 %v2462_v6  ;;  %v2403_v4 = vld [vmem:[#allocation20 + $0x3e8] sm:$0xff]  ;;  %v2402_v6 = vld [vmem:[#allocation20 + $0x3e0] sm:$0xff] }
 0x439   : > { %1955 = vmatmul.mubr.f32.gmra.mxu1 %v5591_v3  ;;  %2175 = vmatmul.mubr.f32.gmra.mxu0 %v5591_v3  ;;  %v2335_v3 = vld [vmem:[#allocation20 + $0x1c8] sm:$0xff] }
 0x43a   : > { %1960 = vmatprep.mubr.f32.mxu1 %v5140_v22  ;;  %2180 = vmatprep.mubr.f32.mxu0 %v5140_v22 }
 0x43b   : > { %2855 = vmatprep.subr.mxu1 %v2335_v3  ;;  %v2406_v3 = vld [vmem:[#allocation20 + $0x400] sm:$0xff] }
 0x43c   : > { %2856 = vmatpush1.msra.mxu1 %v2334_v5  ;;  %v2531_v5 = vld [vmem:[#allocation20 + $0x7e8] sm:$0xff] }
 0x43d   : > { %1961 = vmatmul.mubr.f32.gmra.mxu1 %v5597_v8  ;;  %2181 = vmatmul.mubr.f32.gmra.mxu0 %v5597_v8  ;;  %v2330_v8 = vld [vmem:[#allocation20 + $0x1a0] sm:$0xff] }
 0x43e   : > { %1966 = vmatprep.mubr.f32.mxu1 %v5140_v22  ;;  %2186 = vmatprep.mubr.f32.mxu0 %v5140_v22 }
 0x43f   : > { %2857 = vmatprep.subr.mxu1 %v2331_v7  ;;  %v2530_v7 = vld [vmem:[#allocation20 + $0x7e0] sm:$0xff] }
 0x440   : > { %2858 = vmatpush1.msra.mxu1 %v2330_v8  ;;  %v2527_v8 = vld [vmem:[#allocation20 + $0x7c8] sm:$0xff] }
 0x441   : > { %1967 = vmatmul.mubr.f32.gmra.mxu1 %v5605_v42  ;;  %2187 = vmatmul.mubr.f32.gmra.mxu0 %v5605_v42  ;;  %v2427_v42 = vld [vmem:[#allocation20 + $0x4a8] sm:$0xff] }
 0x442   : > { %1972 = vmatprep.mubr.f32.mxu1 %v5140_v22  ;;  %2192 = vmatprep.mubr.f32.mxu0 %v5140_v22 }
 0x443   : > { %2859 = vmatprep.subr.mxu1 %v2327_v10  ;;  %v2526_v10 = vld [vmem:[#allocation20 + $0x7c0] sm:$0xff] }
 0x444   : > { %2860 = vmatpush1.msra.mxu1 %v2326_v46  ;;  %v2523_v46 = vld [vmem:[#allocation20 + $0x7a8] sm:$0xff] }
 0x445   : > { %1973 = vmatmul.mubr.f32.gmra.mxu1 %v1387_v51  ;;  %2193 = vmatmul.mubr.f32.gmra.mxu0 %v1387_v51  ;;  %v2294_v51 = vld [vmem:[#allocation20 + $0x80] sm:$0xff] }
 0x446   : > { %1978 = vmatprep.mubr.f32.mxu1 %v5140_v22  ;;  %2198 = vmatprep.mubr.f32.mxu0 %v5140_v22 }
 0x447   : > { %2861 = vmatprep.subr.mxu1 %v2323_v53  ;;  %v2522_v53 = vld [vmem:[#allocation20 + $0x7a0] sm:$0xff] }
 0x448   : > { %2862 = vmatpush1.msra.mxu1 %v2322_v59  ;;  %v2519_v59 = vld [vmem:[#allocation20 + $0x788] sm:$0xff] }
 0x449   : > { %1979 = vmatmul.mubr.f32.gmra.mxu1 %v1388_v0  ;;  %2199 = vmatmul.mubr.f32.gmra.mxu0 %v1388_v0  ;;  %v2411_v0 = vld [vmem:[#allocation20 + $0x428] sm:$0xff] }
 0x44a   : > { %1984 = vmatprep.mubr.f32.mxu1 %v5140_v22  ;;  %2204 = vmatprep.mubr.f32.mxu0 %v5140_v22  ;;  %v2459_v22 = vld [vmem:[#allocation20 + $0x5a8] sm:$0xff] }
 0x44b   : > { %2928 = vmatprep.subr.mxu0 %v2459_v22  ;;  %2863 = vmatprep.subr.mxu1 %v2319_v14  ;;  %v2399_v22 = vld [vmem:[#allocation20 + $0x3c8] sm:$0xff]  ;;  %v2518_v14 = vld [vmem:[#allocation20 + $0x780] sm:$0xff] }
 0x44c   : > { %2929 = vmatpush1.msra.mxu0 %v2458_v9  ;;  %2864 = vmatpush1.msra.mxu1 %v2318_v16  ;;  %v2398_v9 = vld [vmem:[#allocation20 + $0x3c0] sm:$0xff]  ;;  %v2515_v16 = vld [vmem:[#allocation20 + $0x768] sm:$0xff] }
 0x44d   : > { %1985 = vmatmul.mubr.f32.gmra.mxu1 %v1389_v1  ;;  %2205 = vmatmul.mubr.f32.gmra.mxu0 %v1389_v1  ;;  %v2282_v1 = vld [vmem:[#allocation20 + $0x20] sm:$0xff] }
 0x44e   : > { %2930 = vmatprep.subr.mxu0 %v2455_v48  ;;  %2865 = vmatprep.subr.mxu1 %v2315_v18  ;;  %v2395_v48 = vld [vmem:[#allocation20 + $0x3a8] sm:$0xff]  ;;  %v2514_v18 = vld [vmem:[#allocation20 + $0x760] sm:$0xff] }
 0x44f   : > { %2931 = vmatpush1.msra.mxu0 %v2454_v11  ;;  %2866 = vmatpush1.msra.mxu1 %v2314_v20  ;;  %v2394_v11 = vld [vmem:[#allocation20 + $0x3a0] sm:$0xff]  ;;  %v2511_v20 = vld [vmem:[#allocation20 + $0x748] sm:$0xff] }
 0x450   : > { %2932 = vmatprep.subr.mxu0 %v2451_v12  ;;  %2867 = vmatprep.subr.mxu1 %v2311_v23  ;;  %v2391_v12 = vld [vmem:[#allocation20 + $0x388] sm:$0xff]  ;;  %v2510_v23 = vld [vmem:[#allocation20 + $0x740] sm:$0xff] }
 0x451   : > { %2933 = vmatpush1.msra.mxu0 %v2450_v13  ;;  %2868 = vmatpush1.msra.mxu1 %v2310_v25  ;;  %v2390_v13 = vld [vmem:[#allocation20 + $0x380] sm:$0xff]  ;;  %v2507_v25 = vld [vmem:[#allocation20 + $0x728] sm:$0xff] }
 0x452   : > { %2934 = vmatprep.subr.mxu0 %v2447_v15  ;;  %2869 = vmatprep.subr.mxu1 %v2307_v28  ;;  %v2387_v15 = vld [vmem:[#allocation20 + $0x368] sm:$0xff]  ;;  %v2506_v28 = vld [vmem:[#allocation20 + $0x720] sm:$0xff] }
 0x453   : > { %2935 = vmatpush1.msra.mxu0 %v2446_v17  ;;  %2870 = vmatpush1.msra.mxu1 %v2306_v31  ;;  %v2386_v17 = vld [vmem:[#allocation20 + $0x360] sm:$0xff]  ;;  %v2503_v31 = vld [vmem:[#allocation20 + $0x708] sm:$0xff] }
 0x454   : > { %2936 = vmatprep.subr.mxu0 %v2443_v19  ;;  %2871 = vmatprep.subr.mxu1 %v2303_v33  ;;  %v2383_v19 = vld [vmem:[#allocation20 + $0x348] sm:$0xff]  ;;  %v2502_v33 = vld [vmem:[#allocation20 + $0x700] sm:$0xff] }
 0x455   : > { %2937 = vmatpush1.msra.mxu0 %v2442_v21  ;;  %2872 = vmatpush1.msra.mxu1 %v2302_v36  ;;  %v2382_v21 = vld [vmem:[#allocation20 + $0x340] sm:$0xff]  ;;  %v2499_v36 = vld [vmem:[#allocation20 + $0x6e8] sm:$0xff] }
 0x456   : > { %2938 = vmatprep.subr.mxu0 %v2439_v24  ;;  %2873 = vmatprep.subr.mxu1 %v2299_v38  ;;  %v2379_v24 = vld [vmem:[#allocation20 + $0x328] sm:$0xff]  ;;  %v2498_v38 = vld [vmem:[#allocation20 + $0x6e0] sm:$0xff] }
 0x457   : > { %2939 = vmatpush1.msra.mxu0 %v2438_v27  ;;  %2874 = vmatpush1.msra.mxu1 %v2298_v43  ;;  %v2378_v27 = vld [vmem:[#allocation20 + $0x320] sm:$0xff]  ;;  %v2495_v43 = vld [vmem:[#allocation20 + $0x6c8] sm:$0xff] }
 0x458   : > { %2940 = vmatprep.subr.mxu0 %v2435_v29  ;;  %2875 = vmatprep.subr.mxu1 %v2295_v49  ;;  %v2375_v29 = vld [vmem:[#allocation20 + $0x308] sm:$0xff]  ;;  %v2494_v49 = vld [vmem:[#allocation20 + $0x6c0] sm:$0xff] }
 0x459   : > { %2941 = vmatpush1.msra.mxu0 %v2434_v32  ;;  %2876 = vmatpush1.msra.mxu1 %v2294_v51  ;;  %v2374_v32 = vld [vmem:[#allocation20 + $0x300] sm:$0xff]  ;;  %v2491_v51 = vld [vmem:[#allocation20 + $0x6a8] sm:$0xff] }
 0x45a   : > { %2942 = vmatprep.subr.mxu0 %v2431_v34  ;;  %2877 = vmatprep.subr.mxu1 %v2291_v54  ;;  %v2371_v34 = vld [vmem:[#allocation20 + $0x2e8] sm:$0xff]  ;;  %v2490_v54 = vld [vmem:[#allocation20 + $0x6a0] sm:$0xff] }
 0x45b   : > { %2943 = vmatpush1.msra.mxu0 %v2430_v37  ;;  %2878 = vmatpush1.msra.mxu1 %v2290_v56  ;;  %v2370_v37 = vld [vmem:[#allocation20 + $0x2e0] sm:$0xff]  ;;  %v2487_v56 = vld [vmem:[#allocation20 + $0x688] sm:$0xff] }
 0x45c   : > { %2944 = vmatprep.subr.mxu0 %v2427_v42  ;;  %2879 = vmatprep.subr.mxu1 %v2287_v58  ;;  %v2367_v42 = vld [vmem:[#allocation20 + $0x2c8] sm:$0xff]  ;;  %v2486_v58 = vld [vmem:[#allocation20 + $0x680] sm:$0xff] }
 0x45d   : > { %2945 = vmatpush1.msra.mxu0 %v2426_v44  ;;  %2880 = vmatpush1.msra.mxu1 %v2286_v61  ;;  %v2366_v44 = vld [vmem:[#allocation20 + $0x2c0] sm:$0xff]  ;;  %v2483_v61 = vld [vmem:[#allocation20 + $0x668] sm:$0xff] }
 0x45e   : > { %2946 = vmatprep.subr.mxu0 %v2423_v50  ;;  %2881 = vmatprep.subr.mxu1 %v2283_v63  ;;  %v2363_v50 = vld [vmem:[#allocation20 + $0x2a8] sm:$0xff]  ;;  %v2482_v63 = vld [vmem:[#allocation20 + $0x660] sm:$0xff] }
 0x45f   : > { %2947 = vmatpush1.msra.mxu0 %v2422_v52  ;;  %2882 = vmatpush1.msra.mxu1 %v2282_v1  ;;  %v2362_v52 = vld [vmem:[#allocation20 + $0x2a0] sm:$0xff]  ;;  %v2479_v1 = vld [vmem:[#allocation20 + $0x648] sm:$0xff] }
 0x460   : > { %2948 = vmatprep.subr.mxu0 %v2419_v55  ;;  %2883 = vmatprep.subr.mxu1 %v2279_v30  ;;  %v2359_v55 = vld [vmem:[#allocation20 + $0x288] sm:$0xff]  ;;  %v2478_v30 = vld [vmem:[#allocation20 + $0x640] sm:$0xff] }
 0x461   : > { %2949 = vmatpush1.msra.mxu0 %v2418_v57  ;;  %2884 = vmatpush1.msra.mxu1 %v2278_v2  ;;  %v2358_v57 = vld [vmem:[#allocation20 + $0x280] sm:$0xff]  ;;  %v2475_v2 = vld [vmem:[#allocation20 + $0x628] sm:$0xff] }
 0x462   : > { %2950 = vmatprep.subr.mxu0 %v2415_v60  ;;  %2885 = vmatprep.subr.mxu1 %v2403_v4  ;;  %v2355_v60 = vld [vmem:[#allocation20 + $0x268] sm:$0xff]  ;;  %v2474_v4 = vld [vmem:[#allocation20 + $0x620] sm:$0xff] }
 0x463   : > { %2951 = vmatpush1.msra.mxu0 %v2414_v62  ;;  %2886 = vmatpush2.msra.mxu1 %v2402_v6  ;;  %v2354_v62 = vld [vmem:[#allocation20 + $0x260] sm:$0xff]  ;;  %v2471_v6 = vld [vmem:[#allocation20 + $0x608] sm:$0xff] }
 0x464   : > { %2952 = vmatprep.subr.mxu0 %v2411_v0  ;;  %2887 = vmatprep.subr.mxu1 %v2399_v22  ;;  %v2351_v0 = vld [vmem:[#allocation20 + $0x248] sm:$0xff]  ;;  %v2470_v22 = vld [vmem:[#allocation20 + $0x600] sm:$0xff] }
 0x465   : > { %2953 = vmatpush1.msra.mxu0 %v2410_v26  ;;  %2888 = vmatpush2.msra.mxu1 %v2398_v9  ;;  %v2350_v26 = vld [vmem:[#allocation20 + $0x240] sm:$0xff]  ;;  %v2723_v9 = vld [vmem:[#allocation20 + $0xde8] sm:$0xff] }
 0x466   : > { %2954 = vmatprep.subr.mxu0 %v2407_v35  ;;  %2889 = vmatprep.subr.mxu1 %v2395_v48  ;;  %v2347_v35 = vld [vmem:[#allocation20 + $0x228] sm:$0xff] }
 0x467   : > { %2955 = vmatpush1.msra.mxu0 %v2406_v3  ;;  %2890 = vmatpush2.msra.mxu1 %v2394_v11  ;;  %v2346_v3 = vld [vmem:[#allocation20 + $0x220] sm:$0xff] }
 0x468   : > { %2956 = vmatprep.subr.mxu0 %v2531_v5  ;;  %2891 = vmatprep.subr.mxu1 %v2391_v12  ;;  %v2343_v5 = vld [vmem:[#allocation20 + $0x208] sm:$0xff] }
 0x469   : > { %2957 = vmatpush2.msra.mxu0 %v2530_v7  ;;  %2892 = vmatpush2.msra.mxu1 %v2390_v13  ;;  %v2342_v7 = vld [vmem:[#allocation20 + $0x200] sm:$0xff] }
 0x46a   : > { %2958 = vmatprep.subr.mxu0 %v2527_v8  ;;  %2893 = vmatprep.subr.mxu1 %v2387_v15  ;;  %v2595_v8 = vld [vmem:[#allocation20 + $0x9e8] sm:$0xff] }
 0x46b   : > { %2959 = vmatpush2.msra.mxu0 %v2526_v10  ;;  %2894 = vmatpush2.msra.mxu1 %v2386_v17 }
 0x46c   : > { %2960 = vmatprep.subr.mxu0 %v2523_v46  ;;  %2895 = vmatprep.subr.mxu1 %v2383_v19 }
 0x46d   : > { %2961 = vmatpush2.msra.mxu0 %v2522_v53  ;;  %2896 = vmatpush2.msra.mxu1 %v2382_v21  ;;  %v1646_v21 = vld [vmem:[#allocation18 + $0x2] sm:$0x3] }
 0x46e   : > { %2962 = vmatprep.subr.mxu0 %v2519_v59  ;;  %2897 = vmatprep.subr.mxu1 %v2379_v24  ;;  %v5647_v24 = vrot.slane %v1646_v21, %v5509_v41 }
 0x46f   : > { %2963 = vmatpush2.msra.mxu0 %v2518_v14  ;;  %2898 = vmatpush2.msra.mxu1 %v2378_v27 }
 0x470   : > { %2964 = vmatprep.subr.mxu0 %v2515_v16  ;;  %2899 = vmatprep.subr.mxu1 %v2375_v29  ;;  %v5653_v29 = vrot.slane %v1646_v21, %v5512_v45 }
 0x471   : > { %2965 = vmatpush2.msra.mxu0 %v2514_v18  ;;  %2900 = vmatpush2.msra.mxu1 %v2374_v32 }
 0x472   : > { %2966 = vmatprep.subr.mxu0 %v2511_v20  ;;  %2901 = vmatprep.subr.mxu1 %v2371_v34  ;;  %v1422_v20 = vld [vmem:[#allocation18] sm:$0x3]  ;;  %v5141_v34 = vmov 1966171168  }
 0x473   : > { %2967 = vmatpush2.msra.mxu0 %v2510_v23  ;;  %2902 = vmatpush2.msra.mxu1 %v2370_v37  ;;  %v5644_v23 = vrot.slane %v1422_v20, %v5509_v41  ;;  %v2086_v37 = vld [vmem:[#allocation18 + $0x6] sm:$0x3] }
 0x474   : > { %2968 = vmatprep.subr.mxu0 %v2507_v25  ;;  %2903 = vmatprep.subr.mxu1 %v2367_v42 }
 0x475   : > { %2969 = vmatpush2.msra.mxu0 %v2506_v28  ;;  %2904 = vmatpush2.msra.mxu1 %v2366_v44  ;;  %v5650_v28 = vrot.slane %v1422_v20, %v5512_v45 }
 0x476   : > { %2970 = vmatprep.subr.mxu0 %v2503_v31  ;;  %2905 = vmatprep.subr.mxu1 %v2363_v50 }
 0x477   : > { %2971 = vmatpush2.msra.mxu0 %v2502_v33  ;;  %2906 = vmatpush2.msra.mxu1 %v2362_v52  ;;  %v1866_v33 = vld [vmem:[#allocation18 + $0x4] sm:$0x3] }
 0x478   : > { %2972 = vmatprep.subr.mxu0 %v2499_v36  ;;  %2907 = vmatprep.subr.mxu1 %v2359_v55  ;;  %v5655_v36 = vunpack.c.l.s4 %v5141_v34  ;;  %v5667_v55 = vrot.slane %v2086_v37, %v5509_v41 }
 0x479   : > { %2973 = vmatpush2.msra.mxu0 %v2498_v38  ;;  %2908 = vmatpush2.msra.mxu1 %v2358_v57 }
 0x47a   : > { %2974 = vmatprep.subr.mxu0 %v2495_v43  ;;  %2909 = vmatprep.subr.mxu1 %v2355_v60  ;;  %v1595_v60 = vunpack.c.0.s8 %v5655_v36 }
 0x47b   : > { %2975 = vmatpush2.msra.mxu0 %v2494_v49  ;;  %2910 = vmatpush2.msra.mxu1 %v2354_v62  ;;  %v5662_v49 = vrot.slane %v1866_v33, %v5509_v41 }
 0x47c   : > { %2976 = vmatprep.subr.mxu0 %v2491_v51  ;;  %2911 = vmatprep.subr.mxu1 %v2351_v0 }
 0x47d   : > { %2977 = vmatpush2.msra.mxu0 %v2490_v54  ;;  %2912 = vmatpush2.msra.mxu1 %v2350_v26 }
 0x47e   : > { %2978 = vmatprep.subr.mxu0 %v2487_v56  ;;  %2913 = vmatprep.subr.mxu1 %v2347_v35  ;;  %v5670_v56 = vrot.slane %v1866_v33, %v5512_v45 }
 0x47f   : > { %2979 = vmatpush2.msra.mxu0 %v2486_v58  ;;  %2914 = vmatpush2.msra.mxu1 %v2346_v3 }
 0x480   : > { %2980 = vmatprep.subr.mxu0 %v2483_v61  ;;  %2915 = vmatprep.subr.mxu1 %v2343_v5  ;;  %v5676_v61 = vrot.slane %v2086_v37, %v5512_v45 }
 0x481   : > { %2981 = vmatpush2.msra.mxu0 %v2482_v63  ;;  %2916 = vmatpush2.msra.mxu1 %v2342_v7 }
 0x482   : > { %2982 = vmatprep.subr.mxu0 %v2479_v1  ;;  %2995 = vmatprep.subr.mxu1 %v2595_v8 }
 0x483   : > { %2983 = vmatpush2.msra.mxu0 %v2478_v30 }
 0x484   : > { %2984 = vmatprep.subr.mxu0 %v2475_v2 }
 0x485   : > { %2985 = vmatpush2.msra.mxu0 %v2474_v4 }
 0x486   : > { %2986 = vmatprep.subr.mxu0 %v2471_v6 }
 0x487   : > { %2987 = vmatpush2.msra.mxu0 %v2470_v22 }
 0x488   : > { %3066 = vmatprep.subr.mxu0 %v2723_v9 }
 0x4b4   : > { %v1500_v10 = vpop.f32.mrf.mxu1  ;;  %v1724_v48 = vpop.f32.mrf.mxu0 }
 0x4b5   : > { %v1501_v38 = vadd.f32 %v1500_v10, %v5644_v23  ;;  %v1725_v42 = vadd.f32 %v1724_v48, %v5647_v24 }
 0x4b6   : > { %v1502_v46 = vpop.f32.mrf.mxu1  ;;  %v1726_v11 = vpop.f32.mrf.mxu0 }
 0x4b7   : > { %v1503_v43 = vadd.f32 %v1502_v46, %v5650_v28  ;;  %v1727_v44 = vadd.f32 %v1726_v11, %v5653_v29  ;;  %v1547_v62 = vmax.f32 %v1501_v38, 0.0  ;;  %v1771_v63 = vmax.f32 %v1725_v42, 0.0 }
 0x4b8   : > { %v1506_v53 = vpop.f32.mrf.mxu1  ;;  %v1730_v12 = vpop.f32.mrf.mxu0 }
 0x4b9   : > { %v1507_v0 = vadd.f32 %v1506_v53, %v5644_v23  ;;  %v1731_v1 = vadd.f32 %v1730_v12, %v5647_v24  ;;  %v1548_v26 = vmax.f32 %v1503_v43, 0.0  ;;  %v1772_v30 = vmax.f32 %v1727_v44, 0.0 }
 0x4ba   : > { %v1508_v59 = vpop.f32.mrf.mxu1  ;;  %v1732_v13 = vpop.f32.mrf.mxu0 }
 0x4bb   : > { %v1509_v35 = vadd.f32 %v1508_v59, %v5650_v28  ;;  %v1733_v2 = vadd.f32 %v1732_v13, %v5653_v29  ;;  %v1549_v46 = vmax.f32 %v1507_v0, 0.0  ;;  %v1773_v11 = vmax.f32 %v1731_v1, 0.0 }
 0x4bd   : > { %v1550_v59 = vmax.f32 %v1509_v35, 0.0  ;;  %v1774_v13 = vmax.f32 %v1733_v2, 0.0 }
 0x4c3   : > { %v1512_v14 = vpop.f32.mrf.mxu1  ;;  %v1736_v15 = vpop.f32.mrf.mxu0 }
 0x4c4   : > { %v1513_v50 = vadd.f32 %v1512_v14, %v5644_v23  ;;  %v1737_v51 = vadd.f32 %v1736_v15, %v5647_v24 }
 0x4c5   : > { %v1514_v16 = vpop.f32.mrf.mxu1  ;;  %v1738_v17 = vpop.f32.mrf.mxu0 }
 0x4c6   : > { %v1515_v57 = vadd.f32 %v1514_v16, %v5650_v28  ;;  %v1739_v58 = vadd.f32 %v1738_v17, %v5653_v29  ;;  %v1551_v3 = vmax.f32 %v1513_v50, 0.0  ;;  %v1775_v4 = vmax.f32 %v1737_v51, 0.0 }
 0x4c7   : > { %v1518_v18 = vpop.f32.mrf.mxu1  ;;  %v1742_v19 = vpop.f32.mrf.mxu0 }
 0x4c8   : > { %v1519_v5 = vadd.f32 %v1518_v18, %v5644_v23  ;;  %v1743_v6 = vadd.f32 %v1742_v19, %v5647_v24  ;;  %v1552_v8 = vmax.f32 %v1515_v57, 0.0  ;;  %v1776_v9 = vmax.f32 %v1739_v58, 0.0 }
 0x4c9   : > { %v1520_v25 = vpop.f32.mrf.mxu1  ;;  %v1744_v27 = vpop.f32.mrf.mxu0  ;;  %v1563_v16 = vmax.f32 %v1547_v62, %v1551_v3  ;;  %v1787_v17 = vmax.f32 %v1771_v63, %v1775_v4 }
 0x4ca   : > { %v1521_v10 = vadd.f32 %v1520_v25, %v5650_v28  ;;  %v1745_v48 = vadd.f32 %v1744_v27, %v5653_v29  ;;  %v1553_v18 = vmax.f32 %v1519_v5, 0.0  ;;  %v1777_v19 = vmax.f32 %v1743_v6, 0.0 }
 0x4cb   : > { %v1576_v25 = vmax.f32 %v1548_v26, %v1552_v8  ;;  %v1800_v27 = vmax.f32 %v1772_v30, %v1776_v9 }
 0x4cc   : > { %v1554_v33 = vmax.f32 %v1521_v10, 0.0  ;;  %v1778_v34 = vmax.f32 %v1745_v48, 0.0  ;;  %v1788_v57 = vmax.f32 %v1773_v11, %v1777_v19 }
 0x4ce   : > { %v1577_v1 = vmax.f32 %v1550_v59, %v1554_v33  ;;  %v1801_v26 = vmax.f32 %v1774_v13, %v1778_v34 }
 0x4d6   : > { %v1524_v31 = vpop.f32.mrf.mxu1  ;;  %v1748_v32 = vpop.f32.mrf.mxu0 }
 0x4d7   : > { %v1525_v53 = vadd.f32 %v1524_v31, %v5644_v23  ;;  %v1749_v12 = vadd.f32 %v1748_v32, %v5647_v24 }
 0x4d8   : > { %v1526_v52 = vpop.f32.mrf.mxu1  ;;  %v1750_v54 = vpop.f32.mrf.mxu0 }
 0x4d9   : > { %v1527_v14 = vadd.f32 %v1526_v52, %v5650_v28  ;;  %v1751_v15 = vadd.f32 %v1750_v54, %v5653_v29  ;;  %v1555_v37 = vmax.f32 %v1525_v53, 0.0  ;;  %v1779_v31 = vmax.f32 %v1749_v12, 0.0 }
 0x4da   : > { %v1530_v7 = vpop.f32.mrf.mxu1  ;;  %v1754_v22 = vpop.f32.mrf.mxu0  ;;  %v1564_v54 = vmax.f32 %v1549_v46, %v1553_v18 }
 0x4db   : > { %v1531_v32 = vadd.f32 %v1530_v7, %v5644_v23  ;;  %v1755_v38 = vadd.f32 %v1754_v22, %v5647_v24  ;;  %v1556_v44 = vmax.f32 %v1527_v14, 0.0  ;;  %v1780_v50 = vmax.f32 %v1751_v15, 0.0 }
 0x4dc   : > { %v1532_v20 = vpop.f32.mrf.mxu1  ;;  %v1756_v21 = vpop.f32.mrf.mxu0  ;;  %v1565_v2 = vmax.f32 %v1563_v16, %v1555_v37  ;;  %v1789_v3 = vmax.f32 %v1787_v17, %v1779_v31 }
 0x4dd   : > { %v1533_v51 = vadd.f32 %v1532_v20, %v5650_v28  ;;  %v1757_v52 = vadd.f32 %v1756_v21, %v5653_v29  ;;  %v1557_v4 = vmax.f32 %v1531_v32, 0.0  ;;  %v1781_v5 = vmax.f32 %v1755_v38, 0.0 }
 0x4de   : > { %v1578_v22 = vmax.f32 %v1576_v25, %v1556_v44  ;;  %v1802_v8 = vmax.f32 %v1800_v27, %v1780_v50 }
 0x4df   : > { %v1558_v9 = vmax.f32 %v1533_v51, 0.0  ;;  %v1782_v10 = vmax.f32 %v1757_v52, 0.0  ;;  %v1566_v17 = vmax.f32 %v1564_v54, %v1557_v4  ;;  %v1790_v18 = vmax.f32 %v1788_v57, %v1781_v5 }
 0x4e0   : > { %v5717_v4 = vsub.s32 %v1595_v60, %v5506_v40 }
 0x4e1   : > { %v1579_v27 = vmax.f32 %v1577_v1, %v1558_v9  ;;  %v1803_v33 = vmax.f32 %v1801_v26, %v1782_v10 }
 0x4e9   : > { %v1536_v42 = vpop.f32.mrf.mxu1  ;;  %v1760_v43 = vpop.f32.mrf.mxu0 }
 0x4ea   : > { %v1537_v58 = vadd.f32 %v1536_v42, %v5644_v23  ;;  %v1761_v62 = vadd.f32 %v1760_v43, %v5647_v24 }
 0x4eb   : > { %v1538_v63 = vpop.f32.mrf.mxu1  ;;  %v1762_v0 = vpop.f32.mrf.mxu0 }
 0x4ec   : > { %v1539_v30 = vadd.f32 %v1538_v63, %v5650_v28  ;;  %v1763_v35 = vadd.f32 %v1762_v0, %v5653_v29  ;;  %v1559_v48 = vmax.f32 %v1537_v58, 0.0  ;;  %v1783_v46 = vmax.f32 %v1761_v62, 0.0 }
 0x4ed   : > { %v1542_v6 = vpop.f32.mrf.mxu1  ;;  %v1766_v7 = vpop.f32.mrf.mxu0 }
 0x4ee   : > { %v1543_v11 = vadd.f32 %v1542_v6, %v5644_v23  ;;  %v1767_v53 = vadd.f32 %v1766_v7, %v5647_v24  ;;  %v1560_v13 = vmax.f32 %v1539_v30, 0.0  ;;  %v1784_v14 = vmax.f32 %v1763_v35, 0.0 }
 0x4ef   : > { %v1544_v12 = vpop.f32.mrf.mxu1  ;;  %v1768_v59 = vpop.f32.mrf.mxu0  ;;  %v1567_v37 = vmax.f32 %v1565_v2, %v1559_v48  ;;  %v1791_v24 = vmax.f32 %v1789_v3, %v1783_v46 }
 0x4f0   : > { %v1545_v15 = vadd.f32 %v1544_v12, %v5650_v28  ;;  %v1769_v16 = vadd.f32 %v1768_v59, %v5653_v29  ;;  %v1561_v19 = vmax.f32 %v1543_v11, 0.0  ;;  %v1785_v20 = vmax.f32 %v1767_v53, 0.0 }
 0x4f1   : > { %v1944_v21 = vpop.f32.mrf.mxu1  ;;  %v2164_v25 = vpop.f32.mrf.mxu0  ;;  %v1580_v43 = vmax.f32 %v1578_v22, %v1560_v13  ;;  %v1804_v28 = vmax.f32 %v1802_v8, %v1784_v14 }
 0x4f2   : > { %v1562_v34 = vmax.f32 %v1545_v15, 0.0  ;;  %v1786_v23 = vmax.f32 %v1769_v16, 0.0  ;;  %v1568_v31 = vmax.f32 %v1566_v17, %v1561_v19  ;;  %v1792_v32 = vmax.f32 %v1790_v18, %v1785_v20 }
 0x4f3   : > { %v1946_v38 = vpop.f32.mrf.mxu1  ;;  %v2166_v42 = vpop.f32.mrf.mxu0  ;;  %v5703_v52 = vadd.f32 %v1944_v21, %v5662_v49  ;;  %v5706_v54 = vadd.f32 %v2164_v25, %v5667_v55 }
 0x4f4   : > { %v1581_v44 = vmax.f32 %v1579_v27, %v1562_v34  ;;  %v1805_v29 = vmax.f32 %v1803_v33, %v1786_v23  ;;  %v1569_v50 = vmax.f32 %v1567_v37, %v1568_v31  ;;  %v1793_v51 = vmax.f32 %v1791_v24, %v1792_v32 }
 0x4f5   : > { %v1950_v57 = vpop.f32.mrf.mxu1  ;;  %v2170_v58 = vpop.f32.mrf.mxu0  ;;  %v5709_v26 = vadd.f32 %v1946_v38, %v5670_v56  ;;  %v5712_v30 = vadd.f32 %v2166_v42, %v5676_v61  ;;  %v1991_v22 = vmax.f32 %v5703_v52, 0.0  ;;  %v2211_v8 = vmax.f32 %v5706_v54, 0.0 }
 0x4f6   : > { %v1582_v62 = vmax.f32 %v1580_v43, %v1581_v44  ;;  %v1806_v63 = vmax.f32 %v1804_v28, %v1805_v29  ;;  %v1570_v0 = vrot.slane %v1569_v50, 4  ;;  %v1794_v1 = vrot.slane %v1793_v51, 4 }
 0x4f7   : > { %v1952_v35 = vpop.f32.mrf.mxu1  ;;  %v2172_v2 = vpop.f32.mrf.mxu0  ;;  %v5722_v11 = vadd.f32 %v1950_v57, %v5662_v49  ;;  %v5725_v53 = vadd.f32 %v2170_v58, %v5667_v55  ;;  %v1992_v12 = vmax.f32 %v5709_v26, 0.0  ;;  %v2212_v59 = vmax.f32 %v5712_v30, 0.0 }
 0x4f8   : > { %v1583_v3 = vrot.slane %v1582_v62, 4  ;;  %v1807_v5 = vrot.slane %v1806_v63, 4  ;;  %v1571_v6 = vmax.f32 %v1569_v50, %v1570_v0  ;;  %v1795_v7 = vmax.f32 %v1793_v51, %v1794_v1 }
 0x4f9   : > { %v1956_v9 = vpop.f32.mrf.mxu1  ;;  %v2176_v10 = vpop.f32.mrf.mxu0  ;;  %v1993_v37 = vmax.f32 %v5722_v11, 0.0  ;;  %v2213_v24 = vmax.f32 %v5725_v53, 0.0  ;;  %v5736_v38 = vadd.f32 %v1952_v35, %v5670_v56  ;;  %v5739_v42 = vadd.f32 %v2172_v2, %v5676_v61 }
 0x4fa   : > { %v1584_v48 = vmax.f32 %v1582_v62, %v1583_v3  ;;  %v1808_v46 = vmax.f32 %v1806_v63, %v1807_v5  ;;  %v1572_v36 = vrot.slane %v1571_v6, 2  ;;  %v1796_v60 = vrot.slane %v1795_v7, 2 }
 0x4fb   : > { %v1958_v13 = vpop.f32.mrf.mxu1  ;;  %v2178_v14 = vpop.f32.mrf.mxu0  ;;  %v1957_v17 = vadd.f32 %v1956_v9, %v5662_v49  ;;  %v2177_v18 = vadd.f32 %v2176_v10, %v5667_v55  ;;  %v1994_v2 = vmax.f32 %v5736_v38, 0.0  ;;  %v2214_v3 = vmax.f32 %v5739_v42, 0.0 }
 0x4fc   : > { %v1585_v15 = vrot.slane %v1584_v48, 2  ;;  %v1809_v16 = vrot.slane %v1808_v46, 2  ;;  %v1573_v19 = vmax.f32 %v1571_v6, %v1572_v36  ;;  %v1797_v20 = vmax.f32 %v1795_v7, %v1796_v60 }
 0x4fd   : > { %v1959_v21 = vadd.f32 %v1958_v13, %v5670_v56  ;;  %v2179_v25 = vadd.f32 %v2178_v14, %v5676_v61  ;;  %v1962_v27 = vpop.f32.mrf.mxu1  ;;  %v2182_v33 = vpop.f32.mrf.mxu0  ;;  %v1995_v54 = vmax.f32 %v1957_v17, 0.0  ;;  %v2215_v57 = vmax.f32 %v2177_v18, 0.0 }
 0x4fe   : > { %v1586_v34 = vmax.f32 %v1584_v48, %v1585_v15  ;;  %v1810_v23 = vmax.f32 %v1808_v46, %v1809_v16  ;;  %v1574_v31 = vrot.slane %v1573_v19, 1  ;;  %v1798_v32 = vrot.slane %v1797_v20, 1 }
 0x4ff   : > { %v1964_v43 = vpop.f32.mrf.mxu1  ;;  %v2184_v28 = vpop.f32.mrf.mxu0  ;;  %v1963_v50 = vadd.f32 %v1962_v27, %v5662_v49  ;;  %v2183_v51 = vadd.f32 %v2182_v33, %v5667_v55  ;;  %v1996_v58 = vmax.f32 %v1959_v21, 0.0  ;;  %v2216_v62 = vmax.f32 %v2179_v25, 0.0 }
 0x500   : > { %v1587_v44 = vrot.slane %v1586_v34, 1  ;;  %v1811_v29 = vrot.slane %v1810_v23, 1  ;;  %v1575_v1 = vmax.f32 %v1573_v19, %v1574_v31  ;;  %v1799_v26 = vmax.f32 %v1797_v20, %v1798_v32  ;;  %v1589_v19 = vld [vmem:[#allocation2] sm:$0x3]  ;;  %v1813_v20 = vld [vmem:[#allocation2 + $0x2] sm:$0x3] }
 0x501   : > { %v1968_v63 = vpop.f32.mrf.mxu1  ;;  %v2188_v0 = vpop.f32.mrf.mxu0  ;;  %v1997_v5 = vmax.f32 %v1963_v50, 0.0  ;;  %v2217_v6 = vmax.f32 %v2183_v51, 0.0  ;;  %v1965_v48 = vadd.f32 %v1964_v43, %v5670_v56  ;;  %v2185_v46 = vadd.f32 %v2184_v28, %v5676_v61 }
 0x502   : > { %v1588_v30 = vmax.f32 %v1586_v34, %v1587_v44  ;;  %v1812_v35 = vmax.f32 %v1810_v23, %v1811_v29  ;;  %v2007_v11 = vmax.f32 %v1991_v22, %v1995_v54  ;;  %v2227_v53 = vmax.f32 %v2211_v8, %v2215_v57 }
 0x503   : > { %v1970_v39 = vpop.f32.mrf.mxu1  ;;  %v2190_v7 = vpop.f32.mrf.mxu0  ;;  %v1969_v36 = vadd.f32 %v1968_v63, %v5662_v49  ;;  %v2189_v60 = vadd.f32 %v2188_v0, %v5667_v55  ;;  %v2020_v17 = vmax.f32 %v1992_v12, %v1996_v58  ;;  %v2240_v18 = vmax.f32 %v2212_v59, %v2216_v62 }
 0x504   : > { %v1592_v9 = vcombine.low %v1575_v1, %v1588_v30  ;;  %v1816_v10 = vcombine.low %v1799_v26, %v1812_v35  ;;  %v2008_v21 = vmax.f32 %v1993_v37, %v1997_v5  ;;  %v2228_v25 = vmax.f32 %v2213_v24, %v2217_v6 }
 0x505   : > { %v1974_v13 = vpop.f32.mrf.mxu1  ;;  %v2194_v14 = vpop.f32.mrf.mxu0  ;;  %v1971_v27 = vadd.f32 %v1970_v39, %v5670_v56  ;;  %v2191_v22 = vadd.f32 %v2190_v7, %v5676_v61  ;;  %v1998_v31 = vmax.f32 %v1965_v48, 0.0  ;;  %v2218_v32 = vmax.f32 %v2185_v46, 0.0 }
 0x506   : > { %v1599_v15 = vrot.slane %v1592_v9, %v5717_v4  ;;  %v1823_v16 = vrot.slane %v1816_v10, %v5717_v4  ;;  %v1999_v38 = vmax.f32 %v1969_v36, 0.0  ;;  %v2219_v42 = vmax.f32 %v2189_v60, 0.0 }
 0x507   : > { %v1976_v8 = vpop.f32.mrf.mxu1  ;;  %v2196_v33 = vpop.f32.mrf.mxu0  ;;  %v1975_v12 = vadd.f32 %v1974_v13, %v5662_v49  ;;  %v2195_v59 = vadd.f32 %v2194_v14, %v5667_v55  ;;  %v2000_v50 = vmax.f32 %v1971_v27, 0.0  ;;  %v2220_v51 = vmax.f32 %v2191_v22, 0.0 }
 0x508   : > { %v1606_v34 = vrot.slane %v1599_v15, %v5717_v4  ;;  %v1830_v23 = vrot.slane %v1823_v16, %v5717_v4  ;;  %v1977_v44 = vadd.f32 %v1976_v8, %v5670_v56  ;;  %v2197_v29 = vadd.f32 %v2196_v33, %v5676_v61 }
 0x509   : > { %v1980_v37 = vpop.f32.mrf.mxu1  ;;  %v2200_v24 = vpop.f32.mrf.mxu0  ;;  %v2001_v54 = vmax.f32 %v1975_v12, 0.0  ;;  %v2221_v57 = vmax.f32 %v2195_v59, 0.0  ;;  %v2021_v30 = vmax.f32 %v1994_v2, %v1998_v31  ;;  %v2241_v35 = vmax.f32 %v2214_v3, %v2218_v32 }
 0x50a   : > { %v1608_v43 = vmax.f32 %v1589_v19, %v1606_v34  ;;  %v1832_v28 = vmax.f32 %v1813_v20, %v1830_v23  ;;  %v1981_v63 = vadd.f32 %v1980_v37, %v5662_v49  ;;  %v2201_v0 = vadd.f32 %v2200_v24, %v5667_v55 }
 0x50b   : > { %v1982_v58 = vpop.f32.mrf.mxu1  ;;  %v2202_v62 = vpop.f32.mrf.mxu0  ;;  %v2009_v5 = vmax.f32 %v2007_v11, %v1999_v38  ;;  %v2229_v6 = vmax.f32 %v2227_v53, %v2219_v42  ;;  %v2002_v9 = vmax.f32 %v1977_v44, 0.0  ;;  %v2222_v10 = vmax.f32 %v2197_v29, 0.0 }
 0x50c   : > { %1613 = vst.msk [vmem:[#allocation2] sm:$0x3] %vm5744_vm0, %v1608_v43  ;;  %1833 = vst.msk [vmem:[#allocation2 + $0x2] sm:$0x3] %vm5744_vm0, %v1832_v28  ;;  %v1983_v1 = vadd.f32 %v1982_v58, %v5670_v56  ;;  %v2203_v26 = vadd.f32 %v2202_v62, %v5676_v61  ;;  %v2003_v48 = vmax.f32 %v1981_v63, 0.0  ;;  %v2223_v46 = vmax.f32 %v2201_v0, 0.0 }
 0x50d   : > { %v1986_v39 = vpop.f32.mrf.mxu1  ;;  %v2206_v7 = vpop.f32.mrf.mxu0  ;;  %v2022_v36 = vmax.f32 %v2020_v17, %v2000_v50  ;;  %v2242_v60 = vmax.f32 %v2240_v18, %v2220_v51  ;;  %v2010_v19 = vmax.f32 %v2008_v21, %v2001_v54  ;;  %v2230_v20 = vmax.f32 %v2228_v25, %v2221_v57 }
 0x50e   : > { %v1987_v13 = vadd.f32 %v1986_v39, %v5662_v49  ;;  %v2207_v14 = vadd.f32 %v2206_v7, %v5667_v55  ;;  %v2004_v2 = vmax.f32 %v1983_v1, 0.0  ;;  %v2224_v3 = vmax.f32 %v2203_v26, 0.0 }
 0x50f   : > { %v1988_v15 = vpop.f32.mrf.mxu1  ;;  %v2208_v16 = vpop.f32.mrf.mxu0  ;;  %v2023_v8 = vmax.f32 %v2021_v30, %v2002_v9  ;;  %v2243_v33 = vmax.f32 %v2241_v35, %v2222_v10  ;;  %v2011_v17 = vmax.f32 %v2009_v5, %v2003_v48  ;;  %v2231_v18 = vmax.f32 %v2229_v6, %v2223_v46 }
 0x510   : > { %v2005_v11 = vmax.f32 %v1987_v13, 0.0  ;;  %v2225_v53 = vmax.f32 %v2207_v14, 0.0  ;;  %v1989_v27 = vadd.f32 %v1988_v15, %v5670_v56  ;;  %v2209_v22 = vadd.f32 %v2208_v16, %v5676_v61 }
 0x511   : > { %v2024_v31 = vmax.f32 %v2022_v36, %v2004_v2  ;;  %v2244_v32 = vmax.f32 %v2242_v60, %v2224_v3  ;;  %v2033_v36 = vld [vmem:[#allocation2 + $0x4] sm:$0x3]  ;;  %v2253_v60 = vld [vmem:[#allocation2 + $0x6] sm:$0x3]  ;;  %v2814_v2 = vsub.s32 5, %v5506_v40  ;;  %v2822_v3 = vsub.s32 7, %v5506_v40 }
 0x512   : > { %v2012_v34 = vmax.f32 %v2010_v19, %v2005_v11  ;;  %v2232_v49 = vmax.f32 %v2230_v20, %v2225_v53  ;;  %v2006_v23 = vmax.f32 %v1989_v27, 0.0  ;;  %v2226_v55 = vmax.f32 %v2209_v22, 0.0  ;;  %v2594_v27 = vld [vmem:[#allocation20 + $0x9e0] sm:$0xff] }
 0x513   : > { %v2806_v19 = vsub.s32 3, %v5506_v40  ;;  %v2722_v22 = vld [vmem:[#allocation20 + $0xde0] sm:$0xff] }
 0x514   : > { %v2013_v21 = vmax.f32 %v2011_v17, %v2012_v34  ;;  %v2233_v25 = vmax.f32 %v2231_v18, %v2232_v49  ;;  %v2025_v38 = vmax.f32 %v2023_v8, %v2006_v23  ;;  %v2245_v42 = vmax.f32 %v2243_v33, %v2226_v55  ;;  %v2591_v8 = vld [vmem:[#allocation20 + $0x9c8] sm:$0xff]  ;;  %v2590_v34 = vld [vmem:[#allocation20 + $0x9c0] sm:$0xff] }
 0x515   : > { %v2719_v17 = vld [vmem:[#allocation20 + $0xdc8] sm:$0xff]  ;;  %v2718_v49 = vld [vmem:[#allocation20 + $0xdc0] sm:$0xff] }
 0x516   : > { %v2014_v12 = vrot.slane %v2013_v21, 4  ;;  %v2234_v59 = vrot.slane %v2233_v25, 4  ;;  %v2026_v37 = vmax.f32 %v2024_v31, %v2025_v38  ;;  %v2246_v56 = vmax.f32 %v2244_v32, %v2245_v42  ;;  %v2587_v23 = vld [vmem:[#allocation20 + $0x9a8] sm:$0xff]  ;;  %v2586_v31 = vld [vmem:[#allocation20 + $0x9a0] sm:$0xff] }
 0x517   : > { %v2715_v55 = vld [vmem:[#allocation20 + $0xda8] sm:$0xff]  ;;  %v2714_v32 = vld [vmem:[#allocation20 + $0xda0] sm:$0xff] }
 0x518   : > { %v2015_v24 = vmax.f32 %v2013_v21, %v2014_v12  ;;  %v2235_v61 = vmax.f32 %v2233_v25, %v2234_v59  ;;  %v2027_v43 = vrot.slane %v2026_v37, 4  ;;  %v2247_v28 = vrot.slane %v2246_v56, 4  ;;  %v2583_v21 = vld [vmem:[#allocation20 + $0x988] sm:$0xff]  ;;  %v2582_v38 = vld [vmem:[#allocation20 + $0x980] sm:$0xff] }
 0x519   : > { %v2711_v25 = vld [vmem:[#allocation20 + $0xd88] sm:$0xff]  ;;  %v2710_v42 = vld [vmem:[#allocation20 + $0xd80] sm:$0xff] }
 0x51a   : > { %v2016_v44 = vrot.slane %v2015_v24, 2  ;;  %v2236_v29 = vrot.slane %v2235_v61, 2  ;;  %v2028_v50 = vmax.f32 %v2026_v37, %v2027_v43  ;;  %v2248_v51 = vmax.f32 %v2246_v56, %v2247_v28  ;;  %v2579_v12 = vld [vmem:[#allocation20 + $0x968] sm:$0xff]  ;;  %v2578_v37 = vld [vmem:[#allocation20 + $0x960] sm:$0xff] }
 0x51b   : > { %v2707_v59 = vld [vmem:[#allocation20 + $0xd68] sm:$0xff]  ;;  %v2706_v56 = vld [vmem:[#allocation20 + $0xd60] sm:$0xff] }
 0x51c   : > { %v2017_v54 = vmax.f32 %v2015_v24, %v2016_v44  ;;  %v2237_v57 = vmax.f32 %v2235_v61, %v2236_v29  ;;  %v2029_v58 = vrot.slane %v2028_v50, 2  ;;  %v2249_v62 = vrot.slane %v2248_v51, 2  ;;  %v2575_v24 = vld [vmem:[#allocation20 + $0x948] sm:$0xff]  ;;  %v2574_v43 = vld [vmem:[#allocation20 + $0x940] sm:$0xff] }
 0x51d   : > { %v2703_v61 = vld [vmem:[#allocation20 + $0xd48] sm:$0xff]  ;;  %v2702_v28 = vld [vmem:[#allocation20 + $0xd40] sm:$0xff] }
 0x51e   : > { %v2018_v63 = vrot.slane %v2017_v54, 1  ;;  %v2238_v0 = vrot.slane %v2237_v57, 1  ;;  %v2030_v1 = vmax.f32 %v2028_v50, %v2029_v58  ;;  %v2250_v26 = vmax.f32 %v2248_v51, %v2249_v62  ;;  %v2571_v44 = vld [vmem:[#allocation20 + $0x928] sm:$0xff]  ;;  %v2570_v50 = vld [vmem:[#allocation20 + $0x920] sm:$0xff] }
 0x51f   : > { %v2699_v29 = vld [vmem:[#allocation20 + $0xd28] sm:$0xff]  ;;  %v2698_v51 = vld [vmem:[#allocation20 + $0xd20] sm:$0xff] }
 0x520   : > { %v2031_v30 = vrot.slane %v2030_v1, 1  ;;  %v2251_v35 = vrot.slane %v2250_v26, 1  ;;  %v2019_v5 = vmax.f32 %v2017_v54, %v2018_v63  ;;  %v2239_v6 = vmax.f32 %v2237_v57, %v2238_v0  ;;  %v2567_v54 = vld [vmem:[#allocation20 + $0x908] sm:$0xff]  ;;  %v2566_v58 = vld [vmem:[#allocation20 + $0x900] sm:$0xff] }
 0x521   : > { %v2695_v57 = vld [vmem:[#allocation20 + $0xd08] sm:$0xff]  ;;  %v2694_v62 = vld [vmem:[#allocation20 + $0xd00] sm:$0xff] }
 0x522   : > { %v2032_v39 = vmax.f32 %v2030_v1, %v2031_v30  ;;  %v2252_v7 = vmax.f32 %v2250_v26, %v2251_v35  ;;  %v2563_v63 = vld [vmem:[#allocation20 + $0x8e8] sm:$0xff]  ;;  %v2562_v1 = vld [vmem:[#allocation20 + $0x8e0] sm:$0xff] }
 0x523   : > { %v2691_v0 = vld [vmem:[#allocation20 + $0xce8] sm:$0xff]  ;;  %v2690_v26 = vld [vmem:[#allocation20 + $0xce0] sm:$0xff] }
 0x524   : > { %v2036_v9 = vcombine.low %v2019_v5, %v2032_v39  ;;  %v2256_v10 = vcombine.low %v2239_v6, %v2252_v7  ;;  %v2559_v30 = vld [vmem:[#allocation20 + $0x8c8] sm:$0xff]  ;;  %v2558_v5 = vld [vmem:[#allocation20 + $0x8c0] sm:$0xff] }
 0x525   : > { %v2687_v35 = vld [vmem:[#allocation20 + $0xcc8] sm:$0xff]  ;;  %v2686_v6 = vld [vmem:[#allocation20 + $0xcc0] sm:$0xff] }
 0x526   : > { %v2043_v48 = vrot.slane %v2036_v9, %v5717_v4  ;;  %v2263_v46 = vrot.slane %v2256_v10, %v5717_v4  ;;  %v2555_v39 = vld [vmem:[#allocation20 + $0x8a8] sm:$0xff]  ;;  %v2554_v9 = vld [vmem:[#allocation20 + $0x8a0] sm:$0xff] }
 0x527   : > { %v2683_v7 = vld [vmem:[#allocation20 + $0xca8] sm:$0xff]  ;;  %v2682_v10 = vld [vmem:[#allocation20 + $0xca0] sm:$0xff] }
 0x528   : > { %v2050_v13 = vrot.slane %v2043_v48, %v5717_v4  ;;  %v2270_v14 = vrot.slane %v2263_v46, %v5717_v4  ;;  %v2551_v48 = vld [vmem:[#allocation20 + $0x888] sm:$0xff] }
 0x529   : > { %v2679_v46 = vld [vmem:[#allocation20 + $0xc88] sm:$0xff] }
 0x52a   : > { %v2052_v15 = vmax.f32 %v2033_v36, %v2050_v13  ;;  %v2272_v16 = vmax.f32 %v2253_v60, %v2270_v14  ;;  %v2550_v36 = vld [vmem:[#allocation20 + $0x880] sm:$0xff]  ;;  %v2547_v13 = vld [vmem:[#allocation20 + $0x868] sm:$0xff] }
 0x52b   : > { %v2678_v60 = vld [vmem:[#allocation20 + $0xc80] sm:$0xff]  ;;  %v2675_v14 = vld [vmem:[#allocation20 + $0xc68] sm:$0xff] }
 0x52c   : > { %2053 = vst.msk [vmem:[#allocation2 + $0x4] sm:$0x3] %vm5744_vm0, %v2052_v15  ;;  %2273 = vst.msk [vmem:[#allocation2 + $0x6] sm:$0x3] %vm5744_vm0, %v2272_v16  ;;  %v2546_v15 = vld [vmem:[#allocation20 + $0x860] sm:$0xff] }
 0x52d   : > { %v2674_v16 = vld [vmem:[#allocation20 + $0xc60] sm:$0xff] }
 0x533   : > { %v5785_v20 = vld [vmem:[#allocation2] sm:$0xff] }
 0x534   : > { %v5791_v11 = vrot.slane %v5785_v20, %v5512_v45  ;;  %v5796_v4 = vrot.slane %v5785_v20, %v2806_v19  ;;  %v5800_v52 = vrot.slane %v5785_v20, %v5509_v41  ;;  %v5804_v53 = vrot.slane %v5785_v20, %v5518_v47 }
 0x535   : > { %v5811_v33 = vrot.slane %v5785_v20, %v2814_v2  ;;  %v5814_v18 = vrot.slane %v5785_v20, %v2822_v3  ;;  %v2543_v2 = vld [vmem:[#allocation20 + $0x848] sm:$0xff] }
 0x536   : > { %2917 = vmatprep.mubr.f32.mxu1 %v5791_v11  ;;  %2988 = vmatprep.mubr.f32.mxu0 %v5796_v4  ;;  %v2671_v3 = vld [vmem:[#allocation20 + $0xc48] sm:$0xff] }
 0x537   : > { %2918 = vmatmul.mubr.f32.vlgmr.msra.gmra.mxu1 %v5800_v52  ;;  %2989 = vmatmul.mubr.f32.vlgmr.msra.gmra.mxu0 %v5804_v53 }
 0x538   : > { %2996 = vmatpush1.msra.mxu1 %v2594_v27  ;;  %3067 = vmatpush1.msra.mxu0 %v2722_v22  ;;  %v2542_v27 = vld [vmem:[#allocation20 + $0x840] sm:$0xff] }
 0x539   : > { %2997 = vmatprep.subr.mxu1 %v2591_v8  ;;  %3059 = vmatprep.mubr.f32.mxu1 %v5811_v33  ;;  %v2670_v22 = vld [vmem:[#allocation20 + $0xc40] sm:$0xff]  ;;  %v2539_v8 = vld [vmem:[#allocation20 + $0x828] sm:$0xff] }
 0x53a   : > { %3068 = vmatprep.subr.mxu0 %v2719_v17  ;;  %3130 = vmatprep.mubr.f32.mxu0 %v5814_v18  ;;  %v2667_v17 = vld [vmem:[#allocation20 + $0xc28] sm:$0xff] }
 0x53b   : > { %2998 = vmatpush1.msra.mxu1 %v2590_v34  ;;  %3069 = vmatpush1.msra.mxu0 %v2718_v49  ;;  %v2538_v34 = vld [vmem:[#allocation20 + $0x820] sm:$0xff] }
 0x53c   : > { %2999 = vmatprep.subr.mxu1 %v2587_v23  ;;  %3070 = vmatprep.subr.mxu0 %v2715_v55  ;;  %v2666_v49 = vld [vmem:[#allocation20 + $0xc20] sm:$0xff]  ;;  %v2535_v23 = vld [vmem:[#allocation20 + $0x808] sm:$0xff] }
 0x53d   : > { %3000 = vmatpush1.msra.mxu1 %v2586_v31  ;;  %3071 = vmatpush1.msra.mxu0 %v2714_v32  ;;  %v2663_v55 = vld [vmem:[#allocation20 + $0xc08] sm:$0xff]  ;;  %v2534_v31 = vld [vmem:[#allocation20 + $0x800] sm:$0xff] }
 0x53e   : > { %3001 = vmatprep.subr.mxu1 %v2583_v21  ;;  %3072 = vmatprep.subr.mxu0 %v2711_v25  ;;  %v2662_v32 = vld [vmem:[#allocation20 + $0xc00] sm:$0xff]  ;;  %v2659_v21 = vld [vmem:[#allocation20 + $0xbe8] sm:$0xff] }
 0x53f   : > { %3002 = vmatpush1.msra.mxu1 %v2582_v38  ;;  %3073 = vmatpush1.msra.mxu0 %v2710_v42  ;;  %v2787_v25 = vld [vmem:[#allocation20 + $0xfe8] sm:$0xff]  ;;  %v2658_v38 = vld [vmem:[#allocation20 + $0xbe0] sm:$0xff] }
 0x540   : > { %3003 = vmatprep.subr.mxu1 %v2579_v12  ;;  %3074 = vmatprep.subr.mxu0 %v2707_v59  ;;  %v2786_v42 = vld [vmem:[#allocation20 + $0xfe0] sm:$0xff]  ;;  %v2655_v12 = vld [vmem:[#allocation20 + $0xbc8] sm:$0xff] }
 0x541   : > { %3004 = vmatpush1.msra.mxu1 %v2578_v37  ;;  %3075 = vmatpush1.msra.mxu0 %v2706_v56  ;;  %v2783_v59 = vld [vmem:[#allocation20 + $0xfc8] sm:$0xff]  ;;  %v2654_v37 = vld [vmem:[#allocation20 + $0xbc0] sm:$0xff] }
 0x542   : > { %3005 = vmatprep.subr.mxu1 %v2575_v24  ;;  %3076 = vmatprep.subr.mxu0 %v2703_v61  ;;  %v2782_v56 = vld [vmem:[#allocation20 + $0xfc0] sm:$0xff]  ;;  %v2651_v24 = vld [vmem:[#allocation20 + $0xba8] sm:$0xff] }
 0x543   : > { %3006 = vmatpush1.msra.mxu1 %v2574_v43  ;;  %3077 = vmatpush1.msra.mxu0 %v2702_v28  ;;  %v2779_v61 = vld [vmem:[#allocation20 + $0xfa8] sm:$0xff]  ;;  %v2650_v43 = vld [vmem:[#allocation20 + $0xba0] sm:$0xff] }
 0x544   : > { %3007 = vmatprep.subr.mxu1 %v2571_v44  ;;  %3078 = vmatprep.subr.mxu0 %v2699_v29  ;;  %v2778_v28 = vld [vmem:[#allocation20 + $0xfa0] sm:$0xff]  ;;  %v2647_v44 = vld [vmem:[#allocation20 + $0xb88] sm:$0xff] }
 0x545   : > { %3008 = vmatpush1.msra.mxu1 %v2570_v50  ;;  %3079 = vmatpush1.msra.mxu0 %v2698_v51  ;;  %v2775_v29 = vld [vmem:[#allocation20 + $0xf88] sm:$0xff]  ;;  %v2646_v50 = vld [vmem:[#allocation20 + $0xb80] sm:$0xff] }
 0x546   : > { %3009 = vmatprep.subr.mxu1 %v2567_v54  ;;  %3080 = vmatprep.subr.mxu0 %v2695_v57  ;;  %v2774_v51 = vld [vmem:[#allocation20 + $0xf80] sm:$0xff]  ;;  %v2643_v54 = vld [vmem:[#allocation20 + $0xb68] sm:$0xff] }
 0x547   : > { %3010 = vmatpush1.msra.mxu1 %v2566_v58  ;;  %3081 = vmatpush1.msra.mxu0 %v2694_v62  ;;  %v2771_v57 = vld [vmem:[#allocation20 + $0xf68] sm:$0xff]  ;;  %v2642_v58 = vld [vmem:[#allocation20 + $0xb60] sm:$0xff] }
 0x548   : > { %3011 = vmatprep.subr.mxu1 %v2563_v63  ;;  %3082 = vmatprep.subr.mxu0 %v2691_v0  ;;  %v2770_v62 = vld [vmem:[#allocation20 + $0xf60] sm:$0xff]  ;;  %v2639_v63 = vld [vmem:[#allocation20 + $0xb48] sm:$0xff] }
 0x549   : > { %3012 = vmatpush1.msra.mxu1 %v2562_v1  ;;  %3083 = vmatpush1.msra.mxu0 %v2690_v26  ;;  %v2767_v0 = vld [vmem:[#allocation20 + $0xf48] sm:$0xff]  ;;  %v2638_v1 = vld [vmem:[#allocation20 + $0xb40] sm:$0xff] }
 0x54a   : > { %3013 = vmatprep.subr.mxu1 %v2559_v30  ;;  %3084 = vmatprep.subr.mxu0 %v2687_v35  ;;  %v2766_v26 = vld [vmem:[#allocation20 + $0xf40] sm:$0xff]  ;;  %v2635_v30 = vld [vmem:[#allocation20 + $0xb28] sm:$0xff] }
 0x54b   : > { %3014 = vmatpush1.msra.mxu1 %v2558_v5  ;;  %3085 = vmatpush1.msra.mxu0 %v2686_v6  ;;  %v2763_v35 = vld [vmem:[#allocation20 + $0xf28] sm:$0xff]  ;;  %v2634_v5 = vld [vmem:[#allocation20 + $0xb20] sm:$0xff] }
 0x54c   : > { %3015 = vmatprep.subr.mxu1 %v2555_v39  ;;  %3086 = vmatprep.subr.mxu0 %v2683_v7  ;;  %v2762_v6 = vld [vmem:[#allocation20 + $0xf20] sm:$0xff]  ;;  %v2631_v39 = vld [vmem:[#allocation20 + $0xb08] sm:$0xff] }
 0x54d   : > { %3016 = vmatpush1.msra.mxu1 %v2554_v9  ;;  %3087 = vmatpush1.msra.mxu0 %v2682_v10  ;;  %v2759_v7 = vld [vmem:[#allocation20 + $0xf08] sm:$0xff]  ;;  %v2630_v9 = vld [vmem:[#allocation20 + $0xb00] sm:$0xff] }
 0x54e   : > { %3017 = vmatprep.subr.mxu1 %v2551_v48  ;;  %3088 = vmatprep.subr.mxu0 %v2679_v46  ;;  %v2758_v10 = vld [vmem:[#allocation20 + $0xf00] sm:$0xff]  ;;  %v2627_v48 = vld [vmem:[#allocation20 + $0xae8] sm:$0xff] }
 0x54f   : > { %3018 = vmatpush1.msra.mxu1 %v2550_v36  ;;  %3089 = vmatpush1.msra.mxu0 %v2678_v60  ;;  %v2755_v46 = vld [vmem:[#allocation20 + $0xee8] sm:$0xff]  ;;  %v2626_v36 = vld [vmem:[#allocation20 + $0xae0] sm:$0xff] }
 0x550   : > { %3019 = vmatprep.subr.mxu1 %v2547_v13  ;;  %3090 = vmatprep.subr.mxu0 %v2675_v14  ;;  %v2754_v60 = vld [vmem:[#allocation20 + $0xee0] sm:$0xff]  ;;  %v2623_v13 = vld [vmem:[#allocation20 + $0xac8] sm:$0xff] }
 0x551   : > { %3020 = vmatpush1.msra.mxu1 %v2546_v15  ;;  %3091 = vmatpush1.msra.mxu0 %v2674_v16  ;;  %v2751_v14 = vld [vmem:[#allocation20 + $0xec8] sm:$0xff]  ;;  %v2622_v15 = vld [vmem:[#allocation20 + $0xac0] sm:$0xff] }
 0x552   : > { %3021 = vmatprep.subr.mxu1 %v2543_v2  ;;  %3092 = vmatprep.subr.mxu0 %v2671_v3  ;;  %v2750_v16 = vld [vmem:[#allocation20 + $0xec0] sm:$0xff]  ;;  %v2619_v2 = vld [vmem:[#allocation20 + $0xaa8] sm:$0xff] }
 0x553   : > { %3022 = vmatpush1.msra.mxu1 %v2542_v27  ;;  %3093 = vmatpush1.msra.mxu0 %v2670_v22  ;;  %v2747_v3 = vld [vmem:[#allocation20 + $0xea8] sm:$0xff]  ;;  %v2618_v27 = vld [vmem:[#allocation20 + $0xaa0] sm:$0xff] }
 0x554   : > { %3023 = vmatprep.subr.mxu1 %v2539_v8  ;;  %3094 = vmatprep.subr.mxu0 %v2667_v17  ;;  %v2746_v22 = vld [vmem:[#allocation20 + $0xea0] sm:$0xff]  ;;  %v2615_v8 = vld [vmem:[#allocation20 + $0xa88] sm:$0xff] }
 0x555   : > { %3024 = vmatpush1.msra.mxu1 %v2538_v34  ;;  %3095 = vmatpush1.msra.mxu0 %v2666_v49  ;;  %v2743_v17 = vld [vmem:[#allocation20 + $0xe88] sm:$0xff]  ;;  %v2614_v34 = vld [vmem:[#allocation20 + $0xa80] sm:$0xff] }
 0x556   : > { %3025 = vmatprep.subr.mxu1 %v2535_v23  ;;  %3096 = vmatprep.subr.mxu0 %v2663_v55  ;;  %v2742_v49 = vld [vmem:[#allocation20 + $0xe80] sm:$0xff]  ;;  %v2611_v23 = vld [vmem:[#allocation20 + $0xa68] sm:$0xff] }
 0x557   : > { %3026 = vmatpush1.msra.mxu1 %v2534_v31  ;;  %3097 = vmatpush1.msra.mxu0 %v2662_v32  ;;  %v2739_v55 = vld [vmem:[#allocation20 + $0xe68] sm:$0xff]  ;;  %v2610_v31 = vld [vmem:[#allocation20 + $0xa60] sm:$0xff] }
 0x558   : > { %3027 = vmatprep.subr.mxu1 %v2659_v21  ;;  %3098 = vmatprep.subr.mxu0 %v2787_v25  ;;  %v2738_v32 = vld [vmem:[#allocation20 + $0xe60] sm:$0xff]  ;;  %v2607_v21 = vld [vmem:[#allocation20 + $0xa48] sm:$0xff] }
 0x559   : > { %3028 = vmatpush2.msra.mxu1 %v2658_v38  ;;  %3099 = vmatpush2.msra.mxu0 %v2786_v42  ;;  %v2735_v25 = vld [vmem:[#allocation20 + $0xe48] sm:$0xff]  ;;  %v2606_v38 = vld [vmem:[#allocation20 + $0xa40] sm:$0xff] }
 0x55a   : > { %3029 = vmatprep.subr.mxu1 %v2655_v12  ;;  %3100 = vmatprep.subr.mxu0 %v2783_v59  ;;  %v2734_v42 = vld [vmem:[#allocation20 + $0xe40] sm:$0xff]  ;;  %v2603_v12 = vld [vmem:[#allocation20 + $0xa28] sm:$0xff] }
 0x55b   : > { %3030 = vmatpush2.msra.mxu1 %v2654_v37  ;;  %3101 = vmatpush2.msra.mxu0 %v2782_v56  ;;  %v2731_v59 = vld [vmem:[#allocation20 + $0xe28] sm:$0xff]  ;;  %v2602_v37 = vld [vmem:[#allocation20 + $0xa20] sm:$0xff] }
 0x55c   : > { %3031 = vmatprep.subr.mxu1 %v2651_v24  ;;  %3102 = vmatprep.subr.mxu0 %v2779_v61  ;;  %v2730_v56 = vld [vmem:[#allocation20 + $0xe20] sm:$0xff]  ;;  %v2810_v24 = vsub.s32 4, %v5506_v40  ;;  %v2818_v61 = vsub.s32 6, %v5506_v40 }
 0x55d   : > { %3032 = vmatpush2.msra.mxu1 %v2650_v43  ;;  %3103 = vmatpush2.msra.mxu0 %v2778_v28  ;;  %v2599_v43 = vld [vmem:[#allocation20 + $0xa08] sm:$0xff]  ;;  %v3728_v40 = vld [vmem:[#allocation26 + $0x98] sm:$0xff] }
 0x55e   : > { %3033 = vmatprep.subr.mxu1 %v2647_v44  ;;  %3104 = vmatprep.subr.mxu0 %v2775_v29  ;;  %v2727_v28 = vld [vmem:[#allocation20 + $0xe08] sm:$0xff]  ;;  %v2598_v44 = vld [vmem:[#allocation20 + $0xa00] sm:$0xff] }
 0x55f   : > { %3034 = vmatpush2.msra.mxu1 %v2646_v50  ;;  %3105 = vmatpush2.msra.mxu0 %v2774_v51  ;;  %v2726_v29 = vld [vmem:[#allocation20 + $0xe00] sm:$0xff]  ;;  %v5821_v50 = vrot.slane %v5785_v20, %v2810_v24  ;;  %v5824_v51 = vrot.slane %v5785_v20, %v2818_v61  ;;  %v2464_v20 = vld [vmem:[#allocation20 + $0x5d0] sm:$0xff]  ;;  %v2293_v61 = vld [vmem:[#allocation20 + $0x78] sm:$0xff] }
 0x560   : > { %3035 = vmatprep.subr.mxu1 %v2643_v54  ;;  %3106 = vmatprep.subr.mxu0 %v2771_v57  ;;  %v2341_v54 = vld [vmem:[#allocation20 + $0x1f8] sm:$0xff]  ;;  %v2424_v24 = vld [vmem:[#allocation20 + $0x490] sm:$0xff] }
 0x561   : > { %3036 = vmatpush2.msra.mxu1 %v2642_v58  ;;  %3107 = vmatpush2.msra.mxu0 %v2770_v62  ;;  %v2469_v57 = vld [vmem:[#allocation20 + $0x5f8] sm:$0xff]  ;;  %v2340_v58 = vld [vmem:[#allocation20 + $0x1f0] sm:$0xff] }
 0x562   : > { %3037 = vmatprep.subr.mxu1 %v2639_v63  ;;  %3108 = vmatprep.subr.mxu0 %v2767_v0  ;;  %v2468_v62 = vld [vmem:[#allocation20 + $0x5f0] sm:$0xff]  ;;  %v2337_v63 = vld [vmem:[#allocation20 + $0x1d8] sm:$0xff] }
 0x563   : > { %3038 = vmatpush2.msra.mxu1 %v2638_v1  ;;  %3109 = vmatpush2.msra.mxu0 %v2766_v26  ;;  %v2465_v0 = vld [vmem:[#allocation20 + $0x5d8] sm:$0xff]  ;;  %v2336_v1 = vld [vmem:[#allocation20 + $0x1d0] sm:$0xff] }
 0x564   : > { %3039 = vmatprep.subr.mxu1 %v2635_v30  ;;  %3110 = vmatprep.subr.mxu0 %v2763_v35  ;;  %v2333_v26 = vld [vmem:[#allocation20 + $0x1b8] sm:$0xff]  ;;  %v2332_v35 = vld [vmem:[#allocation20 + $0x1b0] sm:$0xff] }
 0x565   : > { %3040 = vmatpush2.msra.mxu1 %v2634_v5  ;;  %3111 = vmatpush2.msra.mxu0 %v2762_v6  ;;  %v2461_v30 = vld [vmem:[#allocation20 + $0x5b8] sm:$0xff]  ;;  %v2460_v5 = vld [vmem:[#allocation20 + $0x5b0] sm:$0xff] }
 0x566   : > { %3041 = vmatprep.subr.mxu1 %v2631_v39  ;;  %3112 = vmatprep.subr.mxu0 %v2759_v7  ;;  %v2329_v6 = vld [vmem:[#allocation20 + $0x198] sm:$0xff]  ;;  %v2328_v7 = vld [vmem:[#allocation20 + $0x190] sm:$0xff] }
 0x567   : > { %3042 = vmatpush2.msra.mxu1 %v2630_v9  ;;  %3113 = vmatpush2.msra.mxu0 %v2758_v10  ;;  %v2457_v39 = vld [vmem:[#allocation20 + $0x598] sm:$0xff]  ;;  %v2456_v9 = vld [vmem:[#allocation20 + $0x590] sm:$0xff] }
 0x568   : > { %3043 = vmatprep.subr.mxu1 %v2627_v48  ;;  %3114 = vmatprep.subr.mxu0 %v2755_v46  ;;  %v2453_v10 = vld [vmem:[#allocation20 + $0x578] sm:$0xff]  ;;  %v2452_v48 = vld [vmem:[#allocation20 + $0x570] sm:$0xff] }
 0x569   : > { %3044 = vmatpush2.msra.mxu1 %v2626_v36  ;;  %3115 = vmatpush2.msra.mxu0 %v2754_v60  ;;  %v2321_v46 = vld [vmem:[#allocation20 + $0x158] sm:$0xff]  ;;  %v2320_v60 = vld [vmem:[#allocation20 + $0x150] sm:$0xff] }
 0x56a   : > { %3045 = vmatprep.subr.mxu1 %v2623_v13  ;;  %3116 = vmatprep.subr.mxu0 %v2751_v14  ;;  %v2449_v36 = vld [vmem:[#allocation20 + $0x558] sm:$0xff]  ;;  %v2448_v13 = vld [vmem:[#allocation20 + $0x550] sm:$0xff] }
 0x56b   : > { %3046 = vmatpush2.msra.mxu1 %v2622_v15  ;;  %3117 = vmatpush2.msra.mxu0 %v2750_v16  ;;  %v2317_v14 = vld [vmem:[#allocation20 + $0x138] sm:$0xff]  ;;  %v2316_v16 = vld [vmem:[#allocation20 + $0x130] sm:$0xff] }
 0x56c   : > { %3047 = vmatprep.subr.mxu1 %v2619_v2  ;;  %3118 = vmatprep.subr.mxu0 %v2747_v3  ;;  %v2445_v15 = vld [vmem:[#allocation20 + $0x538] sm:$0xff]  ;;  %v2444_v2 = vld [vmem:[#allocation20 + $0x530] sm:$0xff] }
 0x56d   : > { %3048 = vmatpush2.msra.mxu1 %v2618_v27  ;;  %3119 = vmatpush2.msra.mxu0 %v2746_v22  ;;  %v2313_v3 = vld [vmem:[#allocation20 + $0x118] sm:$0xff]  ;;  %v2312_v22 = vld [vmem:[#allocation20 + $0x110] sm:$0xff] }
 0x56e   : > { %3049 = vmatprep.subr.mxu1 %v2615_v8  ;;  %3120 = vmatprep.subr.mxu0 %v2743_v17  ;;  %v2441_v27 = vld [vmem:[#allocation20 + $0x518] sm:$0xff]  ;;  %v2440_v8 = vld [vmem:[#allocation20 + $0x510] sm:$0xff] }
 0x56f   : > { %3050 = vmatpush2.msra.mxu1 %v2614_v34  ;;  %3121 = vmatpush2.msra.mxu0 %v2742_v49  ;;  %v2309_v17 = vld [vmem:[#allocation20 + $0xf8] sm:$0xff]  ;;  %v2308_v49 = vld [vmem:[#allocation20 + $0xf0] sm:$0xff] }
 0x570   : > { %3051 = vmatprep.subr.mxu1 %v2611_v23  ;;  %3122 = vmatprep.subr.mxu0 %v2739_v55  ;;  %v2437_v34 = vld [vmem:[#allocation20 + $0x4f8] sm:$0xff]  ;;  %v2436_v23 = vld [vmem:[#allocation20 + $0x4f0] sm:$0xff] }
 0x571   : > { %3052 = vmatpush2.msra.mxu1 %v2610_v31  ;;  %3123 = vmatpush2.msra.mxu0 %v2738_v32  ;;  %v2305_v55 = vld [vmem:[#allocation20 + $0xd8] sm:$0xff]  ;;  %v2304_v32 = vld [vmem:[#allocation20 + $0xd0] sm:$0xff] }
 0x572   : > { %3053 = vmatprep.subr.mxu1 %v2607_v21  ;;  %3124 = vmatprep.subr.mxu0 %v2735_v25  ;;  %v2433_v31 = vld [vmem:[#allocation20 + $0x4d8] sm:$0xff]  ;;  %v2432_v21 = vld [vmem:[#allocation20 + $0x4d0] sm:$0xff] }
 0x573   : > { %3054 = vmatpush2.msra.mxu1 %v2606_v38  ;;  %3125 = vmatpush2.msra.mxu0 %v2734_v42  ;;  %v2301_v25 = vld [vmem:[#allocation20 + $0xb8] sm:$0xff]  ;;  %v2300_v42 = vld [vmem:[#allocation20 + $0xb0] sm:$0xff] }
 0x574   : > { %3055 = vmatprep.subr.mxu1 %v2603_v12  ;;  %3126 = vmatprep.subr.mxu0 %v2731_v59  ;;  %v2429_v38 = vld [vmem:[#allocation20 + $0x4b8] sm:$0xff]  ;;  %v2428_v12 = vld [vmem:[#allocation20 + $0x4b0] sm:$0xff] }
 0x575   : > { %3056 = vmatpush2.msra.mxu1 %v2602_v37  ;;  %3127 = vmatpush2.msra.mxu0 %v2730_v56  ;;  %v2297_v59 = vld [vmem:[#allocation20 + $0x98] sm:$0xff]  ;;  %v2296_v56 = vld [vmem:[#allocation20 + $0x90] sm:$0xff] }
 0x576   : > { %3057 = vmatprep.subr.mxu1 %v2599_v43  ;;  %3128 = vmatprep.subr.mxu0 %v2727_v28  ;;  %v2425_v37 = vld [vmem:[#allocation20 + $0x498] sm:$0xff]  ;;  %v2292_v28 = vld [vmem:[#allocation20 + $0x70] sm:$0xff] }
 0x577   : > { %3058 = vmatpush2.msra.mxu1 %v2598_v44  ;;  %3129 = vmatpush2.msra.mxu0 %v2726_v29  ;;  %v2421_v43 = vld [vmem:[#allocation20 + $0x478] sm:$0xff]  ;;  %v2420_v44 = vld [vmem:[#allocation20 + $0x470] sm:$0xff] }
 0x578   : > { %3060 = vmatmul.mubr.f32.vlgmr.msra.gmra.mxu1 %v5821_v50  ;;  %3131 = vmatmul.mubr.f32.vlgmr.msra.gmra.mxu0 %v5824_v51  ;;  %v2289_v29 = vld [vmem:[#allocation20 + $0x58] sm:$0xff] }
 0x579   : > { %3137 = vmatprep.subr.mxu1 %v2341_v54  ;;  %3208 = vmatprep.subr.mxu0 %v2469_v57  ;;  %v2417_v54 = vld [vmem:[#allocation20 + $0x458] sm:$0xff]  ;;  %v2288_v57 = vld [vmem:[#allocation20 + $0x50] sm:$0xff] }
 0x57a   : > { %3138 = vmatpush1.msra.mxu1 %v2340_v58  ;;  %3201 = vmatprep.mubr.f32.mxu1 %v5791_v11  ;;  %v2325_v11 = vld [vmem:[#allocation20 + $0x178] sm:$0xff]  ;;  %v2416_v58 = vld [vmem:[#allocation20 + $0x450] sm:$0xff] }
 0x57b   : > { %3209 = vmatpush1.msra.mxu0 %v2468_v62  ;;  %3272 = vmatprep.mubr.f32.mxu0 %v5796_v4  ;;  %v2324_v4 = vld [vmem:[#allocation20 + $0x170] sm:$0xff]  ;;  %v2285_v62 = vld [vmem:[#allocation20 + $0x38] sm:$0xff] }
 0x57c   : > { %3139 = vmatprep.subr.mxu1 %v2337_v63  ;;  %3210 = vmatprep.subr.mxu0 %v2465_v0  ;;  %v2413_v63 = vld [vmem:[#allocation20 + $0x438] sm:$0xff]  ;;  %v2284_v0 = vld [vmem:[#allocation20 + $0x30] sm:$0xff] }
 0x57d   : > { %3140 = vmatpush1.msra.mxu1 %v2336_v1  ;;  %3211 = vmatpush1.msra.mxu0 %v2464_v20  ;;  %v2412_v1 = vld [vmem:[#allocation20 + $0x430] sm:$0xff]  ;;  %v2281_v20 = vld [vmem:[#allocation20 + $0x18] sm:$0xff] }
 0x57e   : > { %3141 = vmatprep.subr.mxu1 %v2333_v26  ;;  %3212 = vmatprep.subr.mxu0 %v2461_v30  ;;  %v2409_v26 = vld [vmem:[#allocation20 + $0x418] sm:$0xff]  ;;  %v2280_v30 = vld [vmem:[#allocation20 + $0x10] sm:$0xff] }
 0x57f   : > { %3142 = vmatpush1.msra.mxu1 %v2332_v35  ;;  %3213 = vmatpush1.msra.mxu0 %v2460_v5  ;;  %v2408_v35 = vld [vmem:[#allocation20 + $0x410] sm:$0xff]  ;;  %v2405_v5 = vld [vmem:[#allocation20 + $0x3f8] sm:$0xff] }
 0x580   : > { %3143 = vmatprep.subr.mxu1 %v2329_v6  ;;  %3214 = vmatprep.subr.mxu0 %v2457_v39  ;;  %v2533_v6 = vld [vmem:[#allocation20 + $0x7f8] sm:$0xff]  ;;  %v2404_v39 = vld [vmem:[#allocation20 + $0x3f0] sm:$0xff] }
 0x581   : > { %3144 = vmatpush1.msra.mxu1 %v2328_v7  ;;  %3215 = vmatpush1.msra.mxu0 %v2456_v9  ;;  %v2532_v7 = vld [vmem:[#allocation20 + $0x7f0] sm:$0xff]  ;;  %v2401_v9 = vld [vmem:[#allocation20 + $0x3d8] sm:$0xff] }
 0x582   : > { %3145 = vmatprep.subr.mxu1 %v2325_v11  ;;  %3216 = vmatprep.subr.mxu0 %v2453_v10  ;;  %v2529_v11 = vld [vmem:[#allocation20 + $0x7d8] sm:$0xff]  ;;  %v2400_v10 = vld [vmem:[#allocation20 + $0x3d0] sm:$0xff] }
 0x583   : > { %3146 = vmatpush1.msra.mxu1 %v2324_v4  ;;  %3217 = vmatpush1.msra.mxu0 %v2452_v48  ;;  %v2528_v4 = vld [vmem:[#allocation20 + $0x7d0] sm:$0xff]  ;;  %v2397_v48 = vld [vmem:[#allocation20 + $0x3b8] sm:$0xff] }
 0x584   : > { %3147 = vmatprep.subr.mxu1 %v2321_v46  ;;  %3218 = vmatprep.subr.mxu0 %v2449_v36  ;;  %v2525_v46 = vld [vmem:[#allocation20 + $0x7b8] sm:$0xff]  ;;  %v2396_v36 = vld [vmem:[#allocation20 + $0x3b0] sm:$0xff] }
 0x585   : > { %3148 = vmatpush1.msra.mxu1 %v2320_v60  ;;  %3219 = vmatpush1.msra.mxu0 %v2448_v13  ;;  %v2524_v60 = vld [vmem:[#allocation20 + $0x7b0] sm:$0xff]  ;;  %v2393_v13 = vld [vmem:[#allocation20 + $0x398] sm:$0xff] }
 0x586   : > { %3149 = vmatprep.subr.mxu1 %v2317_v14  ;;  %3220 = vmatprep.subr.mxu0 %v2445_v15  ;;  %v2521_v14 = vld [vmem:[#allocation20 + $0x798] sm:$0xff]  ;;  %v2392_v15 = vld [vmem:[#allocation20 + $0x390] sm:$0xff] }
 0x587   : > { %3150 = vmatpush1.msra.mxu1 %v2316_v16  ;;  %3221 = vmatpush1.msra.mxu0 %v2444_v2  ;;  %v2520_v16 = vld [vmem:[#allocation20 + $0x790] sm:$0xff]  ;;  %v2389_v2 = vld [vmem:[#allocation20 + $0x378] sm:$0xff] }
 0x588   : > { %3151 = vmatprep.subr.mxu1 %v2313_v3  ;;  %3222 = vmatprep.subr.mxu0 %v2441_v27  ;;  %v2517_v3 = vld [vmem:[#allocation20 + $0x778] sm:$0xff]  ;;  %v2388_v27 = vld [vmem:[#allocation20 + $0x370] sm:$0xff] }
 0x589   : > { %3152 = vmatpush1.msra.mxu1 %v2312_v22  ;;  %3223 = vmatpush1.msra.mxu0 %v2440_v8  ;;  %v2516_v22 = vld [vmem:[#allocation20 + $0x770] sm:$0xff]  ;;  %v2385_v8 = vld [vmem:[#allocation20 + $0x358] sm:$0xff] }
 0x58a   : > { %3153 = vmatprep.subr.mxu1 %v2309_v17  ;;  %3224 = vmatprep.subr.mxu0 %v2437_v34  ;;  %v2513_v17 = vld [vmem:[#allocation20 + $0x758] sm:$0xff]  ;;  %v2384_v34 = vld [vmem:[#allocation20 + $0x350] sm:$0xff] }
 0x58b   : > { %3154 = vmatpush1.msra.mxu1 %v2308_v49  ;;  %3225 = vmatpush1.msra.mxu0 %v2436_v23  ;;  %v2512_v49 = vld [vmem:[#allocation20 + $0x750] sm:$0xff]  ;;  %v2381_v23 = vld [vmem:[#allocation20 + $0x338] sm:$0xff] }
 0x58c   : > { %3155 = vmatprep.subr.mxu1 %v2305_v55  ;;  %3226 = vmatprep.subr.mxu0 %v2433_v31  ;;  %v2509_v55 = vld [vmem:[#allocation20 + $0x738] sm:$0xff]  ;;  %v2380_v31 = vld [vmem:[#allocation20 + $0x330] sm:$0xff] }
 0x58d   : > { %3156 = vmatpush1.msra.mxu1 %v2304_v32  ;;  %3227 = vmatpush1.msra.mxu0 %v2432_v21  ;;  %v2508_v32 = vld [vmem:[#allocation20 + $0x730] sm:$0xff]  ;;  %v2377_v21 = vld [vmem:[#allocation20 + $0x318] sm:$0xff] }
 0x58e   : > { %3157 = vmatprep.subr.mxu1 %v2301_v25  ;;  %3228 = vmatprep.subr.mxu0 %v2429_v38  ;;  %v2505_v25 = vld [vmem:[#allocation20 + $0x718] sm:$0xff]  ;;  %v2376_v38 = vld [vmem:[#allocation20 + $0x310] sm:$0xff] }
 0x58f   : > { %3158 = vmatpush1.msra.mxu1 %v2300_v42  ;;  %3229 = vmatpush1.msra.mxu0 %v2428_v12  ;;  %v2504_v42 = vld [vmem:[#allocation20 + $0x710] sm:$0xff]  ;;  %v2373_v12 = vld [vmem:[#allocation20 + $0x2f8] sm:$0xff] }
 0x590   : > { %3159 = vmatprep.subr.mxu1 %v2297_v59  ;;  %3230 = vmatprep.subr.mxu0 %v2425_v37  ;;  %v2501_v59 = vld [vmem:[#allocation20 + $0x6f8] sm:$0xff]  ;;  %v2372_v37 = vld [vmem:[#allocation20 + $0x2f0] sm:$0xff] }
 0x591   : > { %3160 = vmatpush1.msra.mxu1 %v2296_v56  ;;  %3231 = vmatpush1.msra.mxu0 %v2424_v24  ;;  %v2500_v56 = vld [vmem:[#allocation20 + $0x6f0] sm:$0xff]  ;;  %v2369_v24 = vld [vmem:[#allocation20 + $0x2d8] sm:$0xff] }
 0x592   : > { %3161 = vmatprep.subr.mxu1 %v2293_v61  ;;  %3232 = vmatprep.subr.mxu0 %v2421_v43  ;;  %v2497_v61 = vld [vmem:[#allocation20 + $0x6d8] sm:$0xff]  ;;  %v2368_v43 = vld [vmem:[#allocation20 + $0x2d0] sm:$0xff] }
 0x593   : > { %3162 = vmatpush1.msra.mxu1 %v2292_v28  ;;  %3233 = vmatpush1.msra.mxu0 %v2420_v44  ;;  %v2496_v28 = vld [vmem:[#allocation20 + $0x6d0] sm:$0xff]  ;;  %v2365_v44 = vld [vmem:[#allocation20 + $0x2b8] sm:$0xff] }
 0x594   : > { %3163 = vmatprep.subr.mxu1 %v2289_v29  ;;  %3234 = vmatprep.subr.mxu0 %v2417_v54  ;;  %v2493_v29 = vld [vmem:[#allocation20 + $0x6b8] sm:$0xff]  ;;  %v2364_v54 = vld [vmem:[#allocation20 + $0x2b0] sm:$0xff] }
 0x595   : > { %3164 = vmatpush1.msra.mxu1 %v2288_v57  ;;  %3235 = vmatpush1.msra.mxu0 %v2416_v58  ;;  %v2492_v57 = vld [vmem:[#allocation20 + $0x6b0] sm:$0xff]  ;;  %v2361_v58 = vld [vmem:[#allocation20 + $0x298] sm:$0xff] }
 0x596   : > { %3165 = vmatprep.subr.mxu1 %v2285_v62  ;;  %3236 = vmatprep.subr.mxu0 %v2413_v63  ;;  %v2489_v62 = vld [vmem:[#allocation20 + $0x698] sm:$0xff]  ;;  %v2360_v63 = vld [vmem:[#allocation20 + $0x290] sm:$0xff] }
 0x597   : > { %3166 = vmatpush1.msra.mxu1 %v2284_v0  ;;  %3237 = vmatpush1.msra.mxu0 %v2412_v1  ;;  %v2488_v0 = vld [vmem:[#allocation20 + $0x690] sm:$0xff]  ;;  %v2357_v1 = vld [vmem:[#allocation20 + $0x278] sm:$0xff] }
 0x598   : > { %3167 = vmatprep.subr.mxu1 %v2281_v20  ;;  %3238 = vmatprep.subr.mxu0 %v2409_v26  ;;  %v2485_v20 = vld [vmem:[#allocation20 + $0x678] sm:$0xff]  ;;  %v2356_v26 = vld [vmem:[#allocation20 + $0x270] sm:$0xff] }
 0x599   : > { %3168 = vmatpush1.msra.mxu1 %v2280_v30  ;;  %3239 = vmatpush1.msra.mxu0 %v2408_v35  ;;  %v2484_v30 = vld [vmem:[#allocation20 + $0x670] sm:$0xff]  ;;  %v2353_v35 = vld [vmem:[#allocation20 + $0x258] sm:$0xff] }
 0x59a   : > { %3169 = vmatprep.subr.mxu1 %v2405_v5  ;;  %3240 = vmatprep.subr.mxu0 %v2533_v6  ;;  %v2481_v5 = vld [vmem:[#allocation20 + $0x658] sm:$0xff]  ;;  %v2352_v6 = vld [vmem:[#allocation20 + $0x250] sm:$0xff] }
 0x59b   : > { %3170 = vmatpush2.msra.mxu1 %v2404_v39  ;;  %3241 = vmatpush2.msra.mxu0 %v2532_v7  ;;  %v2480_v39 = vld [vmem:[#allocation20 + $0x650] sm:$0xff]  ;;  %v2349_v7 = vld [vmem:[#allocation20 + $0x238] sm:$0xff] }
 0x59c   : > { %3171 = vmatprep.subr.mxu1 %v2401_v9  ;;  %3242 = vmatprep.subr.mxu0 %v2529_v11  ;;  %v2477_v9 = vld [vmem:[#allocation20 + $0x638] sm:$0xff]  ;;  %v2348_v11 = vld [vmem:[#allocation20 + $0x230] sm:$0xff] }
 0x59d   : > { %3172 = vmatpush2.msra.mxu1 %v2400_v10  ;;  %3243 = vmatpush2.msra.mxu0 %v2528_v4  ;;  %v2476_v10 = vld [vmem:[#allocation20 + $0x630] sm:$0xff]  ;;  %v2345_v4 = vld [vmem:[#allocation20 + $0x218] sm:$0xff] }
 0x59e   : > { %3173 = vmatprep.subr.mxu1 %v2397_v48  ;;  %3244 = vmatprep.subr.mxu0 %v2525_v46  ;;  %v2473_v48 = vld [vmem:[#allocation20 + $0x618] sm:$0xff]  ;;  %v2344_v46 = vld [vmem:[#allocation20 + $0x210] sm:$0xff] }
 0x59f   : > { %3174 = vmatpush2.msra.mxu1 %v2396_v36  ;;  %3245 = vmatpush2.msra.mxu0 %v2524_v60  ;;  %v2472_v36 = vld [vmem:[#allocation20 + $0x610] sm:$0xff]  ;;  %v2597_v60 = vld [vmem:[#allocation20 + $0x9f8] sm:$0xff] }
 0x5a0   : > { %3175 = vmatprep.subr.mxu1 %v2393_v13  ;;  %3246 = vmatprep.subr.mxu0 %v2521_v14  ;;  %v2725_v13 = vld [vmem:[#allocation20 + $0xdf8] sm:$0xff]  ;;  %v2596_v14 = vld [vmem:[#allocation20 + $0x9f0] sm:$0xff] }
 0x5a1   : > { %3176 = vmatpush2.msra.mxu1 %v2392_v15  ;;  %3247 = vmatpush2.msra.mxu0 %v2520_v16  ;;  %v2724_v15 = vld [vmem:[#allocation20 + $0xdf0] sm:$0xff]  ;;  %v2593_v16 = vld [vmem:[#allocation20 + $0x9d8] sm:$0xff] }
 0x5a2   : > { %3177 = vmatprep.subr.mxu1 %v2389_v2  ;;  %3248 = vmatprep.subr.mxu0 %v2517_v3  ;;  %v2721_v2 = vld [vmem:[#allocation20 + $0xdd8] sm:$0xff]  ;;  %v2592_v3 = vld [vmem:[#allocation20 + $0x9d0] sm:$0xff] }
 0x5a3   : > { %3178 = vmatpush2.msra.mxu1 %v2388_v27  ;;  %3249 = vmatpush2.msra.mxu0 %v2516_v22  ;;  %v2720_v27 = vld [vmem:[#allocation20 + $0xdd0] sm:$0xff]  ;;  %v2589_v22 = vld [vmem:[#allocation20 + $0x9b8] sm:$0xff] }
 0x5a4   : > { %3179 = vmatprep.subr.mxu1 %v2385_v8  ;;  %3250 = vmatprep.subr.mxu0 %v2513_v17  ;;  %v2717_v8 = vld [vmem:[#allocation20 + $0xdb8] sm:$0xff]  ;;  %v2716_v17 = vld [vmem:[#allocation20 + $0xdb0] sm:$0xff] }
 0x5a5   : > { %3180 = vmatpush2.msra.mxu1 %v2384_v34  ;;  %3251 = vmatpush2.msra.mxu0 %v2512_v49  ;;  %v2713_v34 = vld [vmem:[#allocation20 + $0xd98] sm:$0xff]  ;;  %v2584_v49 = vld [vmem:[#allocation20 + $0x990] sm:$0xff] }
 0x5a6   : > { %3181 = vmatprep.subr.mxu1 %v2381_v23  ;;  %3252 = vmatprep.subr.mxu0 %v2509_v55  ;;  %v2712_v23 = vld [vmem:[#allocation20 + $0xd90] sm:$0xff]  ;;  %v2709_v55 = vld [vmem:[#allocation20 + $0xd78] sm:$0xff] }
 0x5a7   : > { %3182 = vmatpush2.msra.mxu1 %v2380_v31  ;;  %3253 = vmatpush2.msra.mxu0 %v2508_v32  ;;  %v2708_v31 = vld [vmem:[#allocation20 + $0xd70] sm:$0xff]  ;;  %v2577_v32 = vld [vmem:[#allocation20 + $0x958] sm:$0xff] }
 0x5a8   : > { %3183 = vmatprep.subr.mxu1 %v2377_v21  ;;  %3254 = vmatprep.subr.mxu0 %v2505_v25  ;;  %v2705_v21 = vld [vmem:[#allocation20 + $0xd58] sm:$0xff]  ;;  %v2576_v25 = vld [vmem:[#allocation20 + $0x950] sm:$0xff] }
 0x5a9   : > { %3184 = vmatpush2.msra.mxu1 %v2376_v38  ;;  %3255 = vmatpush2.msra.mxu0 %v2504_v42  ;;  %v2704_v38 = vld [vmem:[#allocation20 + $0xd50] sm:$0xff]  ;;  %v2573_v42 = vld [vmem:[#allocation20 + $0x938] sm:$0xff] }
 0x5aa   : > { %3185 = vmatprep.subr.mxu1 %v2373_v12  ;;  %3256 = vmatprep.subr.mxu0 %v2501_v59  ;;  %v2701_v12 = vld [vmem:[#allocation20 + $0xd38] sm:$0xff]  ;;  %v2572_v59 = vld [vmem:[#allocation20 + $0x930] sm:$0xff] }
 0x5ab   : > { %3186 = vmatpush2.msra.mxu1 %v2372_v37  ;;  %3257 = vmatpush2.msra.mxu0 %v2500_v56  ;;  %v2700_v37 = vld [vmem:[#allocation20 + $0xd30] sm:$0xff]  ;;  %v2569_v56 = vld [vmem:[#allocation20 + $0x918] sm:$0xff] }
 0x5ac   : > { %3187 = vmatprep.subr.mxu1 %v2369_v24  ;;  %3258 = vmatprep.subr.mxu0 %v2497_v61  ;;  %v2697_v24 = vld [vmem:[#allocation20 + $0xd18] sm:$0xff]  ;;  %v2568_v61 = vld [vmem:[#allocation20 + $0x910] sm:$0xff] }
 0x5ad   : > { %3188 = vmatpush2.msra.mxu1 %v2368_v43  ;;  %3259 = vmatpush2.msra.mxu0 %v2496_v28  ;;  %v2696_v43 = vld [vmem:[#allocation20 + $0xd10] sm:$0xff]  ;;  %v2565_v28 = vld [vmem:[#allocation20 + $0x8f8] sm:$0xff] }
 0x5ae   : > { %3189 = vmatprep.subr.mxu1 %v2365_v44  ;;  %3260 = vmatprep.subr.mxu0 %v2493_v29  ;;  %v2693_v44 = vld [vmem:[#allocation20 + $0xcf8] sm:$0xff]  ;;  %v2564_v29 = vld [vmem:[#allocation20 + $0x8f0] sm:$0xff] }
 0x5af   : > { %3190 = vmatpush2.msra.mxu1 %v2364_v54  ;;  %3261 = vmatpush2.msra.mxu0 %v2492_v57  ;;  %v2692_v54 = vld [vmem:[#allocation20 + $0xcf0] sm:$0xff]  ;;  %v2561_v57 = vld [vmem:[#allocation20 + $0x8d8] sm:$0xff] }
 0x5b0   : > { %3191 = vmatprep.subr.mxu1 %v2361_v58  ;;  %3262 = vmatprep.subr.mxu0 %v2489_v62  ;;  %v2689_v58 = vld [vmem:[#allocation20 + $0xcd8] sm:$0xff]  ;;  %v2560_v62 = vld [vmem:[#allocation20 + $0x8d0] sm:$0xff] }
 0x5b1   : > { %3192 = vmatpush2.msra.mxu1 %v2360_v63  ;;  %3263 = vmatpush2.msra.mxu0 %v2488_v0  ;;  %v2688_v63 = vld [vmem:[#allocation20 + $0xcd0] sm:$0xff]  ;;  %v2557_v0 = vld [vmem:[#allocation20 + $0x8b8] sm:$0xff] }
 0x5b2   : > { %3193 = vmatprep.subr.mxu1 %v2357_v1  ;;  %3264 = vmatprep.subr.mxu0 %v2485_v20  ;;  %v2685_v1 = vld [vmem:[#allocation20 + $0xcb8] sm:$0xff]  ;;  %v2556_v20 = vld [vmem:[#allocation20 + $0x8b0] sm:$0xff] }
 0x5b3   : > { %3194 = vmatpush2.msra.mxu1 %v2356_v26  ;;  %3265 = vmatpush2.msra.mxu0 %v2484_v30  ;;  %v2684_v26 = vld [vmem:[#allocation20 + $0xcb0] sm:$0xff]  ;;  %v2553_v30 = vld [vmem:[#allocation20 + $0x898] sm:$0xff] }
 0x5b4   : > { %3195 = vmatprep.subr.mxu1 %v2353_v35  ;;  %3266 = vmatprep.subr.mxu0 %v2481_v5  ;;  %v2681_v35 = vld [vmem:[#allocation20 + $0xc98] sm:$0xff]  ;;  %v2552_v5 = vld [vmem:[#allocation20 + $0x890] sm:$0xff] }
 0x5b5   : > { %3196 = vmatpush2.msra.mxu1 %v2352_v6  ;;  %3267 = vmatpush2.msra.mxu0 %v2480_v39  ;;  %v2680_v6 = vld [vmem:[#allocation20 + $0xc90] sm:$0xff]  ;;  %v2549_v39 = vld [vmem:[#allocation20 + $0x878] sm:$0xff] }
 0x5b6   : > { %3197 = vmatprep.subr.mxu1 %v2349_v7  ;;  %3268 = vmatprep.subr.mxu0 %v2477_v9  ;;  %v2677_v7 = vld [vmem:[#allocation20 + $0xc78] sm:$0xff]  ;;  %v2548_v9 = vld [vmem:[#allocation20 + $0x870] sm:$0xff] }
 0x5b7   : > { %3198 = vmatpush2.msra.mxu1 %v2348_v11  ;;  %3269 = vmatpush2.msra.mxu0 %v2476_v10  ;;  %v2676_v11 = vld [vmem:[#allocation20 + $0xc70] sm:$0xff]  ;;  %v2545_v10 = vld [vmem:[#allocation20 + $0x858] sm:$0xff] }
 0x5b8   : > { %3199 = vmatprep.subr.mxu1 %v2345_v4  ;;  %3270 = vmatprep.subr.mxu0 %v2473_v48  ;;  %v2673_v4 = vld [vmem:[#allocation20 + $0xc58] sm:$0xff]  ;;  %v2544_v48 = vld [vmem:[#allocation20 + $0x850] sm:$0xff] }
 0x5b9   : > { %3200 = vmatpush2.msra.mxu1 %v2344_v46  ;;  %3271 = vmatpush2.msra.mxu0 %v2472_v36  ;;  %v2672_v46 = vld [vmem:[#allocation20 + $0xc50] sm:$0xff]  ;;  %v2541_v36 = vld [vmem:[#allocation20 + $0x838] sm:$0xff] }
 0x5ba   : > { %3202 = vmatmul.mubr.f32.vlgmr.msra.gmra.mxu1 %v5800_v52  ;;  %3273 = vmatmul.mubr.f32.vlgmr.msra.gmra.mxu0 %v5804_v53  ;;  %v2588_v52 = vld [vmem:[#allocation20 + $0x9b0] sm:$0xff]  ;;  %v2585_v53 = vld [vmem:[#allocation20 + $0x998] sm:$0xff] }
 0x5bb   : > { %3279 = vmatprep.subr.mxu1 %v2597_v60  ;;  %3350 = vmatprep.subr.mxu0 %v2725_v13  ;;  %v2669_v60 = vld [vmem:[#allocation20 + $0xc38] sm:$0xff]  ;;  %v2540_v13 = vld [vmem:[#allocation20 + $0x830] sm:$0xff] }
 0x5bc   : > { %3280 = vmatpush1.msra.mxu1 %v2596_v14  ;;  %3343 = vmatprep.mubr.f32.mxu1 %v5811_v33  ;;  %v2581_v33 = vld [vmem:[#allocation20 + $0x978] sm:$0xff]  ;;  %v2668_v14 = vld [vmem:[#allocation20 + $0xc30] sm:$0xff] }
 0x5bd   : > { %3351 = vmatpush1.msra.mxu0 %v2724_v15  ;;  %3414 = vmatprep.mubr.f32.mxu0 %v5814_v18  ;;  %v2580_v18 = vld [vmem:[#allocation20 + $0x970] sm:$0xff]  ;;  %v2537_v15 = vld [vmem:[#allocation20 + $0x818] sm:$0xff] }
 0x5be   : > { %3281 = vmatprep.subr.mxu1 %v2593_v16  ;;  %3352 = vmatprep.subr.mxu0 %v2721_v2  ;;  %v2665_v16 = vld [vmem:[#allocation20 + $0xc18] sm:$0xff]  ;;  %v2536_v2 = vld [vmem:[#allocation20 + $0x810] sm:$0xff] }
 0x5bf   : > { %3282 = vmatpush1.msra.mxu1 %v2592_v3  ;;  %3353 = vmatpush1.msra.mxu0 %v2720_v27  ;;  %v2664_v3 = vld [vmem:[#allocation20 + $0xc10] sm:$0xff]  ;;  %v2661_v27 = vld [vmem:[#allocation20 + $0xbf8] sm:$0xff] }
 0x5c0   : > { %3283 = vmatprep.subr.mxu1 %v2589_v22  ;;  %3354 = vmatprep.subr.mxu0 %v2717_v8  ;;  %v2789_v22 = vld [vmem:[#allocation20 + $0xff8] sm:$0xff]  ;;  %v2660_v8 = vld [vmem:[#allocation20 + $0xbf0] sm:$0xff] }
 0x5c1   : > { %3284 = vmatpush1.msra.mxu1 %v2588_v52  ;;  %3355 = vmatpush1.msra.mxu0 %v2716_v17  ;;  %v2788_v52 = vld [vmem:[#allocation20 + $0xff0] sm:$0xff]  ;;  %v2657_v17 = vld [vmem:[#allocation20 + $0xbd8] sm:$0xff] }
 0x5c2   : > { %3285 = vmatprep.subr.mxu1 %v2585_v53  ;;  %3356 = vmatprep.subr.mxu0 %v2713_v34  ;;  %v2785_v53 = vld [vmem:[#allocation20 + $0xfd8] sm:$0xff]  ;;  %v2656_v34 = vld [vmem:[#allocation20 + $0xbd0] sm:$0xff] }
 0x5c3   : > { %3286 = vmatpush1.msra.mxu1 %v2584_v49  ;;  %3357 = vmatpush1.msra.mxu0 %v2712_v23  ;;  %v2784_v49 = vld [vmem:[#allocation20 + $0xfd0] sm:$0xff]  ;;  %v2653_v23 = vld [vmem:[#allocation20 + $0xbb8] sm:$0xff] }
 0x5c4   : > { %3287 = vmatprep.subr.mxu1 %v2581_v33  ;;  %3358 = vmatprep.subr.mxu0 %v2709_v55  ;;  %v2781_v33 = vld [vmem:[#allocation20 + $0xfb8] sm:$0xff]  ;;  %v2652_v55 = vld [vmem:[#allocation20 + $0xbb0] sm:$0xff] }
 0x5c5   : > { %3288 = vmatpush1.msra.mxu1 %v2580_v18  ;;  %3359 = vmatpush1.msra.mxu0 %v2708_v31  ;;  %v2780_v18 = vld [vmem:[#allocation20 + $0xfb0] sm:$0xff]  ;;  %v2649_v31 = vld [vmem:[#allocation20 + $0xb98] sm:$0xff] }
 0x5c6   : > { %3289 = vmatprep.subr.mxu1 %v2577_v32  ;;  %3360 = vmatprep.subr.mxu0 %v2705_v21  ;;  %v2777_v32 = vld [vmem:[#allocation20 + $0xf98] sm:$0xff]  ;;  %v2648_v21 = vld [vmem:[#allocation20 + $0xb90] sm:$0xff] }
 0x5c7   : > { %3290 = vmatpush1.msra.mxu1 %v2576_v25  ;;  %3361 = vmatpush1.msra.mxu0 %v2704_v38  ;;  %v2776_v25 = vld [vmem:[#allocation20 + $0xf90] sm:$0xff]  ;;  %v2645_v38 = vld [vmem:[#allocation20 + $0xb78] sm:$0xff] }
 0x5c8   : > { %3291 = vmatprep.subr.mxu1 %v2573_v42  ;;  %3362 = vmatprep.subr.mxu0 %v2701_v12  ;;  %v2773_v42 = vld [vmem:[#allocation20 + $0xf78] sm:$0xff]  ;;  %v2644_v12 = vld [vmem:[#allocation20 + $0xb70] sm:$0xff] }
 0x5c9   : > { %3292 = vmatpush1.msra.mxu1 %v2572_v59  ;;  %3363 = vmatpush1.msra.mxu0 %v2700_v37  ;;  %v2772_v59 = vld [vmem:[#allocation20 + $0xf70] sm:$0xff]  ;;  %v2641_v37 = vld [vmem:[#allocation20 + $0xb58] sm:$0xff] }
 0x5ca   : > { %3293 = vmatprep.subr.mxu1 %v2569_v56  ;;  %3364 = vmatprep.subr.mxu0 %v2697_v24  ;;  %v2769_v56 = vld [vmem:[#allocation20 + $0xf58] sm:$0xff]  ;;  %v2640_v24 = vld [vmem:[#allocation20 + $0xb50] sm:$0xff] }
 0x5cb   : > { %3294 = vmatpush1.msra.mxu1 %v2568_v61  ;;  %3365 = vmatpush1.msra.mxu0 %v2696_v43  ;;  %v2768_v61 = vld [vmem:[#allocation20 + $0xf50] sm:$0xff]  ;;  %v2637_v43 = vld [vmem:[#allocation20 + $0xb38] sm:$0xff] }
 0x5cc   : > { %3295 = vmatprep.subr.mxu1 %v2565_v28  ;;  %3366 = vmatprep.subr.mxu0 %v2693_v44  ;;  %v2765_v28 = vld [vmem:[#allocation20 + $0xf38] sm:$0xff]  ;;  %v2636_v44 = vld [vmem:[#allocation20 + $0xb30] sm:$0xff] }
 0x5cd   : > { %3296 = vmatpush1.msra.mxu1 %v2564_v29  ;;  %3367 = vmatpush1.msra.mxu0 %v2692_v54  ;;  %v2764_v29 = vld [vmem:[#allocation20 + $0xf30] sm:$0xff]  ;;  %v2633_v54 = vld [vmem:[#allocation20 + $0xb18] sm:$0xff] }
 0x5ce   : > { %3297 = vmatprep.subr.mxu1 %v2561_v57  ;;  %3368 = vmatprep.subr.mxu0 %v2689_v58  ;;  %v2761_v57 = vld [vmem:[#allocation20 + $0xf18] sm:$0xff]  ;;  %v2632_v58 = vld [vmem:[#allocation20 + $0xb10] sm:$0xff] }
 0x5cf   : > { %3298 = vmatpush1.msra.mxu1 %v2560_v62  ;;  %3369 = vmatpush1.msra.mxu0 %v2688_v63  ;;  %v2760_v62 = vld [vmem:[#allocation20 + $0xf10] sm:$0xff]  ;;  %v2629_v63 = vld [vmem:[#allocation20 + $0xaf8] sm:$0xff] }
 0x5d0   : > { %3299 = vmatprep.subr.mxu1 %v2557_v0  ;;  %3370 = vmatprep.subr.mxu0 %v2685_v1  ;;  %v2757_v0 = vld [vmem:[#allocation20 + $0xef8] sm:$0xff]  ;;  %v2628_v1 = vld [vmem:[#allocation20 + $0xaf0] sm:$0xff] }
 0x5d1   : > { %3300 = vmatpush1.msra.mxu1 %v2556_v20  ;;  %3371 = vmatpush1.msra.mxu0 %v2684_v26  ;;  %v2756_v20 = vld [vmem:[#allocation20 + $0xef0] sm:$0xff]  ;;  %v2625_v26 = vld [vmem:[#allocation20 + $0xad8] sm:$0xff] }
 0x5d2   : > { %3301 = vmatprep.subr.mxu1 %v2553_v30  ;;  %3372 = vmatprep.subr.mxu0 %v2681_v35  ;;  %v2753_v30 = vld [vmem:[#allocation20 + $0xed8] sm:$0xff]  ;;  %v2624_v35 = vld [vmem:[#allocation20 + $0xad0] sm:$0xff] }
 0x5d3   : > { %3302 = vmatpush1.msra.mxu1 %v2552_v5  ;;  %3373 = vmatpush1.msra.mxu0 %v2680_v6  ;;  %v2752_v5 = vld [vmem:[#allocation20 + $0xed0] sm:$0xff]  ;;  %v2621_v6 = vld [vmem:[#allocation20 + $0xab8] sm:$0xff] }
 0x5d4   : > { %3303 = vmatprep.subr.mxu1 %v2549_v39  ;;  %3374 = vmatprep.subr.mxu0 %v2677_v7  ;;  %v2749_v39 = vld [vmem:[#allocation20 + $0xeb8] sm:$0xff]  ;;  %v2620_v7 = vld [vmem:[#allocation20 + $0xab0] sm:$0xff] }
 0x5d5   : > { %3304 = vmatpush1.msra.mxu1 %v2548_v9  ;;  %3375 = vmatpush1.msra.mxu0 %v2676_v11  ;;  %v2748_v9 = vld [vmem:[#allocation20 + $0xeb0] sm:$0xff]  ;;  %v2617_v11 = vld [vmem:[#allocation20 + $0xa98] sm:$0xff] }
 0x5d6   : > { %3305 = vmatprep.subr.mxu1 %v2545_v10  ;;  %3376 = vmatprep.subr.mxu0 %v2673_v4  ;;  %v2745_v10 = vld [vmem:[#allocation20 + $0xe98] sm:$0xff]  ;;  %v2616_v4 = vld [vmem:[#allocation20 + $0xa90] sm:$0xff] }
 0x5d7   : > { %3306 = vmatpush1.msra.mxu1 %v2544_v48  ;;  %3377 = vmatpush1.msra.mxu0 %v2672_v46  ;;  %v2744_v48 = vld [vmem:[#allocation20 + $0xe90] sm:$0xff]  ;;  %v2613_v46 = vld [vmem:[#allocation20 + $0xa78] sm:$0xff] }
 0x5d8   : > { %3307 = vmatprep.subr.mxu1 %v2541_v36  ;;  %3378 = vmatprep.subr.mxu0 %v2669_v60  ;;  %v2741_v36 = vld [vmem:[#allocation20 + $0xe78] sm:$0xff]  ;;  %v2612_v60 = vld [vmem:[#allocation20 + $0xa70] sm:$0xff] }
 0x5d9   : > { %3308 = vmatpush1.msra.mxu1 %v2540_v13  ;;  %3379 = vmatpush1.msra.mxu0 %v2668_v14  ;;  %v2740_v13 = vld [vmem:[#allocation20 + $0xe70] sm:$0xff]  ;;  %v2609_v14 = vld [vmem:[#allocation20 + $0xa58] sm:$0xff] }
 0x5da   : > { %3309 = vmatprep.subr.mxu1 %v2537_v15  ;;  %3380 = vmatprep.subr.mxu0 %v2665_v16  ;;  %v2737_v15 = vld [vmem:[#allocation20 + $0xe58] sm:$0xff]  ;;  %v2608_v16 = vld [vmem:[#allocation20 + $0xa50] sm:$0xff] }
 0x5db   : > { %3310 = vmatpush1.msra.mxu1 %v2536_v2  ;;  %3381 = vmatpush1.msra.mxu0 %v2664_v3  ;;  %v2736_v2 = vld [vmem:[#allocation20 + $0xe50] sm:$0xff]  ;;  %v2605_v3 = vld [vmem:[#allocation20 + $0xa38] sm:$0xff] }
 0x5dc   : > { %3311 = vmatprep.subr.mxu1 %v2661_v27  ;;  %3382 = vmatprep.subr.mxu0 %v2789_v22  ;;  %v2733_v27 = vld [vmem:[#allocation20 + $0xe38] sm:$0xff]  ;;  %v2604_v22 = vld [vmem:[#allocation20 + $0xa30] sm:$0xff] }
 0x5dd   : > { %3312 = vmatpush2.msra.mxu1 %v2660_v8  ;;  %3383 = vmatpush2.msra.mxu0 %v2788_v52  ;;  %v2732_v8 = vld [vmem:[#allocation20 + $0xe30] sm:$0xff]  ;;  %v2601_v52 = vld [vmem:[#allocation20 + $0xa18] sm:$0xff] }
 0x5de   : > { %3313 = vmatprep.subr.mxu1 %v2657_v17  ;;  %3384 = vmatprep.subr.mxu0 %v2785_v53  ;;  %v2729_v17 = vld [vmem:[#allocation20 + $0xe18] sm:$0xff]  ;;  %v2600_v53 = vld [vmem:[#allocation20 + $0xa10] sm:$0xff] }
 0x5df   : > { %3314 = vmatpush2.msra.mxu1 %v2656_v34  ;;  %3385 = vmatpush2.msra.mxu0 %v2784_v49  ;;  %v2728_v34 = vld [vmem:[#allocation20 + $0xe10] sm:$0xff]  ;;  %v3456_v49 = vld [vmem:[#allocation23 + $0xf8] sm:$0xff] }
 0x5e0   : > { %3315 = vmatprep.subr.mxu1 %v2653_v23  ;;  %3386 = vmatprep.subr.mxu0 %v2781_v33  ;;  %v3455_v23 = vld [vmem:[#allocation23 + $0xf0] sm:$0xff]  ;;  %v3454_v33 = vld [vmem:[#allocation23 + $0xe8] sm:$0xff] }
 0x5e1   : > { %3316 = vmatpush2.msra.mxu1 %v2652_v55  ;;  %3387 = vmatpush2.msra.mxu0 %v2780_v18  ;;  %v3453_v55 = vld [vmem:[#allocation23 + $0xe0] sm:$0xff]  ;;  %v3452_v18 = vld [vmem:[#allocation23 + $0xd8] sm:$0xff] }
 0x5e2   : > { %3317 = vmatprep.subr.mxu1 %v2649_v31  ;;  %3388 = vmatprep.subr.mxu0 %v2777_v32  ;;  %v3451_v31 = vld [vmem:[#allocation23 + $0xd0] sm:$0xff]  ;;  %v3520_v32 = vld [vmem:[#allocation23 + $0x2f8] sm:$0xff] }
 0x5e3   : > { %3318 = vmatpush2.msra.mxu1 %v2648_v21  ;;  %3389 = vmatpush2.msra.mxu0 %v2776_v25  ;;  %v3519_v21 = vld [vmem:[#allocation23 + $0x2f0] sm:$0xff]  ;;  %v3518_v25 = vld [vmem:[#allocation23 + $0x2e8] sm:$0xff] }
 0x5e4   : > { %3319 = vmatprep.subr.mxu1 %v2645_v38  ;;  %3390 = vmatprep.subr.mxu0 %v2773_v42  ;;  %v3450_v38 = vld [vmem:[#allocation23 + $0xc8] sm:$0xff]  ;;  %v3517_v42 = vld [vmem:[#allocation23 + $0x2e0] sm:$0xff] }
 0x5e5   : > { %3320 = vmatpush2.msra.mxu1 %v2644_v12  ;;  %3391 = vmatpush2.msra.mxu0 %v2772_v59  ;;  %v3449_v12 = vld [vmem:[#allocation23 + $0xc0] sm:$0xff]  ;;  %v3515_v59 = vld [vmem:[#allocation23 + $0x2d0] sm:$0xff] }
 0x5e6   : > { %3321 = vmatprep.subr.mxu1 %v2641_v37  ;;  %3392 = vmatprep.subr.mxu0 %v2769_v56  ;;  %v3447_v37 = vld [vmem:[#allocation23 + $0xb0] sm:$0xff]  ;;  %v3514_v56 = vld [vmem:[#allocation23 + $0x2c8] sm:$0xff] }
 0x5e7   : > { %3322 = vmatpush2.msra.mxu1 %v2640_v24  ;;  %3393 = vmatpush2.msra.mxu0 %v2768_v61  ;;  %v3446_v24 = vld [vmem:[#allocation23 + $0xa8] sm:$0xff]  ;;  %v3513_v61 = vld [vmem:[#allocation23 + $0x2c0] sm:$0xff] }
 0x5e8   : > { %3323 = vmatprep.subr.mxu1 %v2637_v43  ;;  %3394 = vmatprep.subr.mxu0 %v2765_v28  ;;  %v3445_v43 = vld [vmem:[#allocation23 + $0xa0] sm:$0xff]  ;;  %v3512_v28 = vld [vmem:[#allocation23 + $0x2b8] sm:$0xff] }
 0x5e9   : > { %3324 = vmatpush2.msra.mxu1 %v2636_v44  ;;  %3395 = vmatpush2.msra.mxu0 %v2764_v29  ;;  %v3444_v44 = vld [vmem:[#allocation23 + $0x98] sm:$0xff]  ;;  %v3511_v29 = vld [vmem:[#allocation23 + $0x2b0] sm:$0xff] }
 0x5ea   : > { %3325 = vmatprep.subr.mxu1 %v2633_v54  ;;  %3396 = vmatprep.subr.mxu0 %v2761_v57  ;;  %v3443_v54 = vld [vmem:[#allocation23 + $0x90] sm:$0xff]  ;;  %v3510_v57 = vld [vmem:[#allocation23 + $0x2a8] sm:$0xff] }
 0x5eb   : > { %3326 = vmatpush2.msra.mxu1 %v2632_v58  ;;  %3397 = vmatpush2.msra.mxu0 %v2760_v62  ;;  %v3442_v58 = vld [vmem:[#allocation23 + $0x88] sm:$0xff]  ;;  %v3509_v62 = vld [vmem:[#allocation23 + $0x2a0] sm:$0xff] }
 0x5ec   : > { %3327 = vmatprep.subr.mxu1 %v2629_v63  ;;  %3398 = vmatprep.subr.mxu0 %v2757_v0  ;;  %v3441_v63 = vld [vmem:[#allocation23 + $0x80] sm:$0xff]  ;;  %v3508_v0 = vld [vmem:[#allocation23 + $0x298] sm:$0xff] }
 0x5ed   : > { %3328 = vmatpush2.msra.mxu1 %v2628_v1  ;;  %3399 = vmatpush2.msra.mxu0 %v2756_v20  ;;  %v3440_v1 = vld [vmem:[#allocation23 + $0x78] sm:$0xff]  ;;  %v3507_v20 = vld [vmem:[#allocation23 + $0x290] sm:$0xff] }
 0x5ee   : > { %3329 = vmatprep.subr.mxu1 %v2625_v26  ;;  %3400 = vmatprep.subr.mxu0 %v2753_v30  ;;  %v3439_v26 = vld [vmem:[#allocation23 + $0x70] sm:$0xff]  ;;  %v3506_v30 = vld [vmem:[#allocation23 + $0x288] sm:$0xff] }
 0x5ef   : > { %3330 = vmatpush2.msra.mxu1 %v2624_v35  ;;  %3401 = vmatpush2.msra.mxu0 %v2752_v5  ;;  %v3438_v35 = vld [vmem:[#allocation23 + $0x68] sm:$0xff]  ;;  %v3505_v5 = vld [vmem:[#allocation23 + $0x280] sm:$0xff] }
 0x5f0   : > { %3331 = vmatprep.subr.mxu1 %v2621_v6  ;;  %3402 = vmatprep.subr.mxu0 %v2749_v39  ;;  %v3437_v6 = vld [vmem:[#allocation23 + $0x60] sm:$0xff]  ;;  %v3504_v39 = vld [vmem:[#allocation23 + $0x278] sm:$0xff] }
 0x5f1   : > { %3332 = vmatpush2.msra.mxu1 %v2620_v7  ;;  %3403 = vmatpush2.msra.mxu0 %v2748_v9  ;;  %v3436_v7 = vld [vmem:[#allocation23 + $0x58] sm:$0xff]  ;;  %v3503_v9 = vld [vmem:[#allocation23 + $0x270] sm:$0xff] }
 0x5f2   : > { %3333 = vmatprep.subr.mxu1 %v2617_v11  ;;  %3404 = vmatprep.subr.mxu0 %v2745_v10  ;;  %v3435_v11 = vld [vmem:[#allocation23 + $0x50] sm:$0xff]  ;;  %v3502_v10 = vld [vmem:[#allocation23 + $0x268] sm:$0xff] }
 0x5f3   : > { %3334 = vmatpush2.msra.mxu1 %v2616_v4  ;;  %3405 = vmatpush2.msra.mxu0 %v2744_v48  ;;  %v3434_v4 = vld [vmem:[#allocation23 + $0x48] sm:$0xff]  ;;  %v3501_v48 = vld [vmem:[#allocation23 + $0x260] sm:$0xff] }
 0x5f4   : > { %3335 = vmatprep.subr.mxu1 %v2613_v46  ;;  %3406 = vmatprep.subr.mxu0 %v2741_v36  ;;  %v3433_v46 = vld [vmem:[#allocation23 + $0x40] sm:$0xff]  ;;  %v3500_v36 = vld [vmem:[#allocation23 + $0x258] sm:$0xff] }
 0x5f5   : > { %3336 = vmatpush2.msra.mxu1 %v2612_v60  ;;  %3407 = vmatpush2.msra.mxu0 %v2740_v13  ;;  %v3432_v60 = vld [vmem:[#allocation23 + $0x38] sm:$0xff]  ;;  %v3499_v13 = vld [vmem:[#allocation23 + $0x250] sm:$0xff] }
 0x5f6   : > { %3337 = vmatprep.subr.mxu1 %v2609_v14  ;;  %3408 = vmatprep.subr.mxu0 %v2737_v15  ;;  %v3431_v14 = vld [vmem:[#allocation23 + $0x30] sm:$0xff]  ;;  %v3498_v15 = vld [vmem:[#allocation23 + $0x248] sm:$0xff] }
 0x5f7   : > { %3338 = vmatpush2.msra.mxu1 %v2608_v16  ;;  %3409 = vmatpush2.msra.mxu0 %v2736_v2  ;;  %v3430_v16 = vld [vmem:[#allocation23 + $0x28] sm:$0xff]  ;;  %v3497_v2 = vld [vmem:[#allocation23 + $0x240] sm:$0xff] }
 0x5f8   : > { %3339 = vmatprep.subr.mxu1 %v2605_v3  ;;  %3410 = vmatprep.subr.mxu0 %v2733_v27  ;;  %v3429_v3 = vld [vmem:[#allocation23 + $0x20] sm:$0xff]  ;;  %v3496_v27 = vld [vmem:[#allocation23 + $0x238] sm:$0xff] }
 0x5f9   : > { %3340 = vmatpush2.msra.mxu1 %v2604_v22  ;;  %3411 = vmatpush2.msra.mxu0 %v2732_v8  ;;  %v3428_v22 = vld [vmem:[#allocation23 + $0x18] sm:$0xff]  ;;  %v3495_v8 = vld [vmem:[#allocation23 + $0x230] sm:$0xff] }
 0x5fa   : > { %3341 = vmatprep.subr.mxu1 %v2601_v52  ;;  %3412 = vmatprep.subr.mxu0 %v2729_v17  ;;  %v3427_v52 = vld [vmem:[#allocation23 + $0x10] sm:$0xff]  ;;  %v3494_v17 = vld [vmem:[#allocation23 + $0x228] sm:$0xff] }
 0x5fb   : > { %3342 = vmatpush2.msra.mxu1 %v2600_v53  ;;  %3413 = vmatpush2.msra.mxu0 %v2728_v34  ;;  %v3426_v53 = vld [vmem:[#allocation23 + $0x8] sm:$0xff]  ;;  %v3493_v34 = vld [vmem:[#allocation23 + $0x220] sm:$0xff] }
 0x5fc   : > { %3344 = vmatmul.mubr.f32.vlgmr.msra.gmra.mxu1 %v5821_v50  ;;  %3415 = vmatmul.mubr.f32.vlgmr.msra.gmra.mxu0 %v5824_v51  ;;  %v3516_v50 = vld [vmem:[#allocation23 + $0x2d8] sm:$0xff] }
 0x5fd   : > { %3565 = vmatprep.subr.mxu1 %v3456_v49  ;;  %3636 = vmatprep.subr.mxu0 %v3520_v32  ;;  %v3448_v51 = vld [vmem:[#allocation23 + $0xb8] sm:$0xff]  ;;  %v3425_v49 = vld [vmem:[#allocation23] sm:$0xff]  ;;  %v3486_v32 = vld [vmem:[#allocation23 + $0x1e8] sm:$0xff] }
 0x5fe   : > { %3566 = vmatpush1.msra.mxu1 %v3455_v23  ;;  %3637 = vmatpush1.msra.mxu0 %v3519_v21  ;;  %v3492_v23 = vld [vmem:[#allocation23 + $0x218] sm:$0xff]  ;;  %v3489_v21 = vld [vmem:[#allocation23 + $0x200] sm:$0xff] }
 0x5ff   : > { %3567 = vmatprep.subr.mxu1 %v3454_v33  ;;  %3638 = vmatprep.subr.mxu0 %v3518_v25  ;;  %v3488_v33 = vld [vmem:[#allocation23 + $0x1f8] sm:$0xff]  ;;  %v3485_v25 = vld [vmem:[#allocation23 + $0x1e0] sm:$0xff] }
 0x600   : > { %3568 = vmatpush1.msra.mxu1 %v3453_v55  ;;  %3639 = vmatpush1.msra.mxu0 %v3517_v42  ;;  %v3491_v55 = vld [vmem:[#allocation23 + $0x210] sm:$0xff]  ;;  %v3484_v42 = vld [vmem:[#allocation23 + $0x1d8] sm:$0xff] }
 0x601   : > { %3569 = vmatprep.subr.mxu1 %v3452_v18  ;;  %3640 = vmatprep.subr.mxu0 %v3516_v50  ;;  %v3487_v18 = vld [vmem:[#allocation23 + $0x1f0] sm:$0xff] }
 0x602   : > { %3570 = vmatpush1.msra.mxu1 %v3451_v31  ;;  %3641 = vmatpush1.msra.mxu0 %v3515_v59  ;;  %v3490_v31 = vld [vmem:[#allocation23 + $0x208] sm:$0xff]  ;;  %v3483_v50 = vld [vmem:[#allocation23 + $0x1d0] sm:$0xff] }
 0x603   : > { %3571 = vmatprep.subr.mxu1 %v3450_v38  ;;  %3642 = vmatprep.subr.mxu0 %v3514_v56  ;;  %v3552_v38 = vld [vmem:[#allocation23 + $0x3f8] sm:$0xff]  ;;  %v3482_v59 = vld [vmem:[#allocation23 + $0x1c8] sm:$0xff]  ;;  %v3481_v56 = vld [vmem:[#allocation23 + $0x1c0] sm:$0xff] }
 0x604   : > { %3572 = vmatpush1.msra.mxu1 %v3449_v12  ;;  %3643 = vmatpush1.msra.mxu0 %v3513_v61  ;;  %v3551_v12 = vld [vmem:[#allocation23 + $0x3f0] sm:$0xff]  ;;  %v3480_v61 = vld [vmem:[#allocation23 + $0x1b8] sm:$0xff] }
 0x605   : > { %3573 = vmatprep.subr.mxu1 %v3448_v51  ;;  %3644 = vmatprep.subr.mxu0 %v3512_v28  ;;  %v3550_v51 = vld [vmem:[#allocation23 + $0x3e8] sm:$0xff]  ;;  %v3479_v28 = vld [vmem:[#allocation23 + $0x1b0] sm:$0xff] }
 0x606   : > { %3574 = vmatpush1.msra.mxu1 %v3447_v37  ;;  %3645 = vmatpush1.msra.mxu0 %v3511_v29  ;;  %v3549_v37 = vld [vmem:[#allocation23 + $0x3e0] sm:$0xff]  ;;  %v3478_v29 = vld [vmem:[#allocation23 + $0x1a8] sm:$0xff] }
 0x607   : > { %3575 = vmatprep.subr.mxu1 %v3446_v24  ;;  %3646 = vmatprep.subr.mxu0 %v3510_v57  ;;  %v3548_v24 = vld [vmem:[#allocation23 + $0x3d8] sm:$0xff]  ;;  %v3477_v57 = vld [vmem:[#allocation23 + $0x1a0] sm:$0xff] }
 0x608   : > { %3576 = vmatpush1.msra.mxu1 %v3445_v43  ;;  %3647 = vmatpush1.msra.mxu0 %v3509_v62  ;;  %v3547_v43 = vld [vmem:[#allocation23 + $0x3d0] sm:$0xff]  ;;  %v3476_v62 = vld [vmem:[#allocation23 + $0x198] sm:$0xff] }
 0x609   : > { %3577 = vmatprep.subr.mxu1 %v3444_v44  ;;  %3648 = vmatprep.subr.mxu0 %v3508_v0  ;;  %v3546_v44 = vld [vmem:[#allocation23 + $0x3c8] sm:$0xff]  ;;  %v3475_v0 = vld [vmem:[#allocation23 + $0x190] sm:$0xff] }
 0x60a   : > { %3578 = vmatpush1.msra.mxu1 %v3443_v54  ;;  %3649 = vmatpush1.msra.mxu0 %v3507_v20  ;;  %v3545_v54 = vld [vmem:[#allocation23 + $0x3c0] sm:$0xff]  ;;  %v3474_v20 = vld [vmem:[#allocation23 + $0x188] sm:$0xff] }
 0x60b   : > { %3579 = vmatprep.subr.mxu1 %v3442_v58  ;;  %3650 = vmatprep.subr.mxu0 %v3506_v30  ;;  %v3544_v58 = vld [vmem:[#allocation23 + $0x3b8] sm:$0xff]  ;;  %v3473_v30 = vld [vmem:[#allocation23 + $0x180] sm:$0xff] }
 0x60c   : > { %3580 = vmatpush1.msra.mxu1 %v3441_v63  ;;  %3651 = vmatpush1.msra.mxu0 %v3505_v5  ;;  %v3543_v63 = vld [vmem:[#allocation23 + $0x3b0] sm:$0xff]  ;;  %v3472_v5 = vld [vmem:[#allocation23 + $0x178] sm:$0xff] }
 0x60d   : > { %3581 = vmatprep.subr.mxu1 %v3440_v1  ;;  %3652 = vmatprep.subr.mxu0 %v3504_v39  ;;  %v3542_v1 = vld [vmem:[#allocation23 + $0x3a8] sm:$0xff]  ;;  %v3471_v39 = vld [vmem:[#allocation23 + $0x170] sm:$0xff] }
 0x60e   : > { %3582 = vmatpush1.msra.mxu1 %v3439_v26  ;;  %3653 = vmatpush1.msra.mxu0 %v3503_v9  ;;  %v3541_v26 = vld [vmem:[#allocation23 + $0x3a0] sm:$0xff]  ;;  %v5836_v9 = vld [vmem:[#allocation21] sm:$0xf] }
 0x60f   : > { %3583 = vmatprep.subr.mxu1 %v3438_v35  ;;  %3654 = vmatprep.subr.mxu0 %v3502_v10  ;;  %v3540_v35 = vld [vmem:[#allocation23 + $0x398] sm:$0xff]  ;;  %v3537_v10 = vld [vmem:[#allocation23 + $0x380] sm:$0xff] }
 0x610   : > { %3584 = vmatpush1.msra.mxu1 %v3437_v6  ;;  %3655 = vmatpush1.msra.mxu0 %v3501_v48  ;;  %v3539_v6 = vld [vmem:[#allocation23 + $0x390] sm:$0xff]  ;;  %v3536_v48 = vld [vmem:[#allocation23 + $0x378] sm:$0xff] }
 0x611   : > { %3585 = vmatprep.subr.mxu1 %v3436_v7  ;;  %3656 = vmatprep.subr.mxu0 %v3500_v36  ;;  %v3538_v7 = vld [vmem:[#allocation23 + $0x388] sm:$0xff]  ;;  %v3468_v36 = vld [vmem:[#allocation23 + $0x158] sm:$0xff] }
 0x612   : > { %3586 = vmatpush1.msra.mxu1 %v3435_v11  ;;  %3657 = vmatpush1.msra.mxu0 %v3499_v13  ;;  %v3470_v11 = vld [vmem:[#allocation23 + $0x168] sm:$0xff]  ;;  %v2836_v13 = vrot.slane %v5836_v9, %v5509_v41 }
 0x613   : > { %3587 = vmatprep.subr.mxu1 %v3434_v4  ;;  %3658 = vmatprep.subr.mxu0 %v3498_v15  ;;  %v3469_v4 = vld [vmem:[#allocation23 + $0x160] sm:$0xff]  ;;  %v3534_v15 = vld [vmem:[#allocation23 + $0x368] sm:$0xff] }
 0x614   : > { %3588 = vmatpush1.msra.mxu1 %v3433_v46  ;;  %3659 = vmatpush1.msra.mxu0 %v3497_v2  ;;  %v2919_v46 = vpop.f32.mrf.mxu1  ;;  %v3533_v2 = vld [vmem:[#allocation23 + $0x360] sm:$0xff] }
 0x615   : > { %3589 = vmatprep.subr.mxu1 %v3432_v60  ;;  %3660 = vmatprep.subr.mxu0 %v3496_v27  ;;  %v3535_v60 = vld [vmem:[#allocation23 + $0x370] sm:$0xff]  ;;  %v3465_v27 = vld [vmem:[#allocation23 + $0x140] sm:$0xff] }
 0x616   : > { %3590 = vmatpush1.msra.mxu1 %v3431_v14  ;;  %3661 = vmatpush1.msra.mxu0 %v3495_v8  ;;  %v3467_v14 = vld [vmem:[#allocation23 + $0x150] sm:$0xff]  ;;  %v2990_v8 = vpop.f32.mrf.mxu0 }
 0x617   : > { %3591 = vmatprep.subr.mxu1 %v3430_v16  ;;  %3662 = vmatprep.subr.mxu0 %v3494_v17  ;;  %v3466_v16 = vld [vmem:[#allocation23 + $0x148] sm:$0xff]  ;;  %v3464_v17 = vld [vmem:[#allocation23 + $0x138] sm:$0xff] }
 0x618   : > { %3592 = vmatpush1.msra.mxu1 %v3429_v3  ;;  %3663 = vmatpush1.msra.mxu0 %v3493_v34  ;;  %v2840_v3 = vrot.slane %v5836_v9, %v5512_v45  ;;  %v2920_v34 = vadd.f32 %v2919_v46, %v2836_v13  ;;  %v3719_v46 = vld [vmem:[#allocation26 + $0x50] sm:$0xff]  ;;  %v3733_v13 = vld [vmem:[#allocation26 + $0xc0] sm:$0xff] }
 0x619   : > { %3593 = vmatprep.subr.mxu1 %v3428_v22  ;;  %3664 = vmatprep.subr.mxu0 %v3492_v23  ;;  %v3532_v22 = vld [vmem:[#allocation23 + $0x358] sm:$0xff]  ;;  %v3462_v23 = vld [vmem:[#allocation23 + $0x128] sm:$0xff] }
 0x61a   : > { %3594 = vmatpush1.msra.mxu1 %v3427_v52  ;;  %3665 = vmatpush1.msra.mxu0 %v3491_v55  ;;  %v2921_v52 = vpop.f32.mrf.mxu1  ;;  %v3461_v55 = vld [vmem:[#allocation23 + $0x120] sm:$0xff] }
 0x61b   : > { %3595 = vmatprep.subr.mxu1 %v3426_v53  ;;  %3666 = vmatprep.subr.mxu0 %v3490_v31  ;;  %v3531_v53 = vld [vmem:[#allocation23 + $0x350] sm:$0xff]  ;;  %v3460_v31 = vld [vmem:[#allocation23 + $0x118] sm:$0xff] }
 0x61c   : > { %3596 = vmatpush1.msra.mxu1 %v3425_v49  ;;  %3667 = vmatpush1.msra.mxu0 %v3489_v21  ;;  %v3463_v49 = vld [vmem:[#allocation23 + $0x130] sm:$0xff] }
 0x61d   : > { %3597 = vmatprep.subr.mxu1 %v3488_v33  ;;  %3668 = vmatprep.subr.mxu0 %v3552_v38  ;;  %v2922_v33 = vadd.f32 %v2921_v52, %v2840_v3  ;;  %v3459_v21 = vld [vmem:[#allocation23 + $0x110] sm:$0xff]  ;;  %v3713_v52 = vld [vmem:[#allocation26 + $0x20] sm:$0xff] }
 0x61e   : > { %3598 = vmatpush2.msra.mxu1 %v3487_v18  ;;  %3669 = vmatpush2.msra.mxu0 %v3551_v12  ;;  %v2992_v18 = vpop.f32.mrf.mxu0  ;;  %v3715_v3 = vld [vmem:[#allocation26 + $0x30] sm:$0xff] }
 0x61f   : > { %3599 = vmatprep.subr.mxu1 %v3486_v32  ;;  %3670 = vmatprep.subr.mxu0 %v3550_v51  ;;  %v2991_v32 = vadd.f32 %v2990_v8, %v2920_v34  ;;  %v2993_v12 = vadd.f32 %v2992_v18, %v2922_v33  ;;  %v3457_v51 = vld [vmem:[#allocation23 + $0x100] sm:$0xff]  ;;  %v2848_v34 = vrot.slane %v5836_v9, %v2806_v19 }
 0x620   : > { %3600 = vmatpush2.msra.mxu1 %v3485_v25  ;;  %3671 = vmatpush2.msra.mxu0 %v3549_v37  ;;  %v3729_v8 = vld [vmem:[#allocation26 + $0xa0] sm:$0xff]  ;;  %v3712_v19 = vld [vmem:[#allocation26 + $0x18] sm:$0xff] }
 0x621   : > { %3601 = vmatprep.subr.mxu1 %v3484_v42  ;;  %3672 = vmatprep.subr.mxu0 %v3548_v24  ;;  %v3458_v42 = vld [vmem:[#allocation23 + $0x108] sm:$0xff] }
 0x622   : > { %3602 = vmatpush2.msra.mxu1 %v3483_v50  ;;  %3673 = vmatpush2.msra.mxu0 %v3547_v43  ;;  %v3529_v43 = vld [vmem:[#allocation23 + $0x340] sm:$0xff] }
 0x623   : > { %3603 = vmatprep.subr.mxu1 %v3482_v59  ;;  %3674 = vmatprep.subr.mxu0 %v3546_v44  ;;  %v3528_v44 = vld [vmem:[#allocation23 + $0x338] sm:$0xff] }
 0x624   : > { %3604 = vmatpush2.msra.mxu1 %v3481_v56  ;;  %3675 = vmatpush2.msra.mxu0 %v3545_v54  ;;  %v3530_v56 = vld [vmem:[#allocation23 + $0x348] sm:$0xff] }
 0x625   : > { %3605 = vmatprep.subr.mxu1 %v3480_v61  ;;  %3676 = vmatprep.subr.mxu0 %v3544_v58 }
 0x626   : > { %3606 = vmatpush2.msra.mxu1 %v3479_v28  ;;  %3677 = vmatpush2.msra.mxu0 %v3543_v63  ;;  %v3524_v63 = vld [vmem:[#allocation23 + $0x318] sm:$0xff] }
 0x627   : > { %3607 = vmatprep.subr.mxu1 %v3478_v29  ;;  %3678 = vmatprep.subr.mxu0 %v3542_v1  ;;  %v3527_v29 = vld [vmem:[#allocation23 + $0x330] sm:$0xff]  ;;  %v3522_v1 = vld [vmem:[#allocation23 + $0x308] sm:$0xff] }
 0x628   : > { %3608 = vmatpush2.msra.mxu1 %v3477_v57  ;;  %3679 = vmatpush2.msra.mxu0 %v3541_v26  ;;  %v3526_v57 = vld [vmem:[#allocation23 + $0x328] sm:$0xff]  ;;  %v3740_v26 = vld [vmem:[#allocation26 + $0xf8] sm:$0xff] }
 0x629   : > { %3609 = vmatprep.subr.mxu1 %v3476_v62  ;;  %3680 = vmatprep.subr.mxu0 %v3540_v35  ;;  %v3525_v62 = vld [vmem:[#allocation23 + $0x320] sm:$0xff]  ;;  %v3739_v35 = vld [vmem:[#allocation26 + $0xf0] sm:$0xff] }
 0x62a   : > { %3610 = vmatpush2.msra.mxu1 %v3475_v0  ;;  %3681 = vmatpush2.msra.mxu0 %v3539_v6  ;;  %v3523_v0 = vld [vmem:[#allocation23 + $0x310] sm:$0xff] }
 0x62b   : > { %3611 = vmatprep.subr.mxu1 %v3474_v20  ;;  %3682 = vmatprep.subr.mxu0 %v3538_v7  ;;  %v3521_v20 = vld [vmem:[#allocation23 + $0x300] sm:$0xff]  ;;  %v3738_v6 = vld [vmem:[#allocation26 + $0xe8] sm:$0xff] }
 0x62c   : > { %3612 = vmatpush2.msra.mxu1 %v3473_v30  ;;  %3683 = vmatpush2.msra.mxu0 %v3537_v10  ;;  %v3724_v30 = vld [vmem:[#allocation26 + $0x78] sm:$0xff]  ;;  %v3737_v7 = vld [vmem:[#allocation26 + $0xe0] sm:$0xff] }
 0x62d   : > { %3613 = vmatprep.subr.mxu1 %v3472_v5  ;;  %3684 = vmatprep.subr.mxu0 %v3536_v48  ;;  %v3723_v5 = vld [vmem:[#allocation26 + $0x70] sm:$0xff]  ;;  %v3736_v10 = vld [vmem:[#allocation26 + $0xd8] sm:$0xff] }
 0x62e   : > { %3614 = vmatpush2.msra.mxu1 %v3471_v39  ;;  %3685 = vmatpush2.msra.mxu0 %v3535_v60  ;;  %v3722_v39 = vld [vmem:[#allocation26 + $0x68] sm:$0xff]  ;;  %v3735_v48 = vld [vmem:[#allocation26 + $0xd0] sm:$0xff] }
 0x62f   : > { %3615 = vmatprep.subr.mxu1 %v3470_v11  ;;  %3686 = vmatprep.subr.mxu0 %v3534_v15  ;;  %v3721_v11 = vld [vmem:[#allocation26 + $0x60] sm:$0xff]  ;;  %v3718_v60 = vld [vmem:[#allocation26 + $0x48] sm:$0xff]  ;;  %v3732_v15 = vld [vmem:[#allocation26 + $0xb8] sm:$0xff] }
 0x630   : > { %3616 = vmatpush2.msra.mxu1 %v3469_v4  ;;  %3687 = vmatpush2.msra.mxu0 %v3533_v2  ;;  %v3720_v4 = vld [vmem:[#allocation26 + $0x58] sm:$0xff]  ;;  %v3731_v2 = vld [vmem:[#allocation26 + $0xb0] sm:$0xff] }
 0x631   : > { %3617 = vmatprep.subr.mxu1 %v3468_v36  ;;  %3688 = vmatprep.subr.mxu0 %v3532_v22  ;;  %v3734_v36 = vld [vmem:[#allocation26 + $0xc8] sm:$0xff] }
 0x632   : > { %3618 = vmatpush2.msra.mxu1 %v3467_v14  ;;  %3689 = vmatpush2.msra.mxu0 %v3531_v53  ;;  %v3717_v14 = vld [vmem:[#allocation26 + $0x40] sm:$0xff]  ;;  %v3714_v22 = vld [vmem:[#allocation26 + $0x28] sm:$0xff]  ;;  %v2844_v53 = vrot.slane %v5836_v9, %v5518_v47  ;;  %v3727_v9 = vld [vmem:[#allocation26 + $0x90] sm:$0xff] }
 0x633   : > { %3619 = vmatprep.subr.mxu1 %v3466_v16  ;;  %3690 = vmatprep.subr.mxu0 %v3530_v56  ;;  %v3716_v16 = vld [vmem:[#allocation26 + $0x38] sm:$0xff]  ;;  %v3711_v56 = vld [vmem:[#allocation26 + $0x10] sm:$0xff] }
 0x634   : > { %3620 = vmatpush2.msra.mxu1 %v3465_v27  ;;  %3691 = vmatpush2.msra.mxu0 %v3529_v43  ;;  %v3730_v27 = vld [vmem:[#allocation26 + $0xa8] sm:$0xff]  ;;  %v3725_v43 = vld [vmem:[#allocation26 + $0x80] sm:$0xff] }
 0x635   : > { %3621 = vmatprep.subr.mxu1 %v3464_v17  ;;  %3692 = vmatprep.subr.mxu0 %v3528_v44  ;;  %v3553_v44 = vld [vmem:[#allocation24] sm:$0x3] }
 0x636   : > { %3622 = vmatpush2.msra.mxu1 %v3463_v49  ;;  %3693 = vmatpush2.msra.mxu0 %v3527_v29 }
 0x637   : > { %3623 = vmatprep.subr.mxu1 %v3462_v23  ;;  %3694 = vmatprep.subr.mxu0 %v3526_v57  ;;  %v3562_v57 = vrot.slane %v3553_v44, %v5512_v45 }
 0x638   : > { %v3061_v25 = vpop.f32.mrf.mxu1  ;;  %v3132_v38 = vpop.f32.mrf.mxu0  ;;  %3624 = vmatpush2.msra.mxu1 %v3461_v55  ;;  %3695 = vmatpush2.msra.mxu0 %v3525_v62 }
 0x639   : > { %v3062_v50 = vadd.f32 %v3061_v25, %v2991_v32  ;;  %3625 = vmatprep.subr.mxu1 %v3460_v31  ;;  %3696 = vmatprep.subr.mxu0 %v3524_v63 }
 0x63a   : > { %v3063_v59 = vpop.f32.mrf.mxu1  ;;  %3626 = vmatpush2.msra.mxu1 %v3459_v21  ;;  %v3134_v61 = vpop.f32.mrf.mxu0  ;;  %3697 = vmatpush2.msra.mxu0 %v3523_v0 }
 0x63b   : > { %v3064_v37 = vadd.f32 %v3063_v59, %v2993_v12  ;;  %3627 = vmatprep.subr.mxu1 %v3458_v42  ;;  %v3133_v24 = vadd.f32 %v3132_v38, %v3062_v50  ;;  %3698 = vmatprep.subr.mxu0 %v3522_v1 }
 0x63c   : > { %3628 = vmatpush2.msra.mxu1 %v3457_v51  ;;  %3699 = vmatpush2.msra.mxu0 %v3521_v20 }
 0x63d   : > { %v3135_v28 = vadd.f32 %v3134_v61, %v3064_v37  ;;  %v3421_v58 = vmax.f32 %v3133_v24, 0.0  ;;  %4169 = vmatprep.subr.mxu1 %v3740_v26  ;;  %v3726_v24 = vld [vmem:[#allocation26 + $0x88] sm:$0xff] }
 0x63e   : > { %v3710_v61 = vld [vmem:[#allocation26 + $0x8] sm:$0xff] }
 0x63f   : > { %v3422_v54 = vmax.f32 %v3135_v28, 0.0  ;;  %v3709_v28 = vld [vmem:[#allocation26] sm:$0xff] }
 0x641   : > { %3629 = vmatprep.mubr.f32.mxu1 %v3422_v54  ;;  %v3558_v54 = vrot.slane %v3553_v44, %v5509_v41 }
 0x642   : > { %3630 = vmatmul.mubr.f32.vlgmr.msra.gmra.mxu1 %v3421_v58 }
 0x643   : > { %4170 = vmatpush3.msra.mxu1 %v3724_v30 }
 0x644   : > { %4171 = vmatprep.subr.mxu1 %v3739_v35 }
 0x645   : > { %4172 = vmatpush3.msra.mxu1 %v3723_v5 }
 0x646   : > { %4173 = vmatprep.subr.mxu1 %v3738_v6  ;;  %v3741_v6 = vld [vmem:[#allocation27] sm:$0x1] }
 0x647   : > { %4174 = vmatpush3.msra.mxu1 %v3722_v39 }
 0x648   : > { %4175 = vmatprep.subr.mxu1 %v3737_v7 }
 0x649   : > { %4176 = vmatpush3.msra.mxu1 %v3721_v11 }
 0x64a   : > { %4177 = vmatprep.subr.mxu1 %v3736_v10 }
 0x64b   : > { %4178 = vmatpush3.msra.mxu1 %v3720_v4 }
 0x64c   : > { %4179 = vmatprep.subr.mxu1 %v3735_v48 }
 0x64d   : > { %4180 = vmatpush3.msra.mxu1 %v3719_v46 }
 0x64e   : > { %4181 = vmatprep.subr.mxu1 %v3734_v36 }
 0x64f   : > { %4182 = vmatpush3.msra.mxu1 %v3718_v60 }
 0x650   : > { %4183 = vmatprep.subr.mxu1 %v3733_v13 }
 0x651   : > { %4184 = vmatpush3.msra.mxu1 %v3717_v14 }
 0x652   : > { %4185 = vmatprep.subr.mxu1 %v3732_v15 }
 0x653   : > { %4186 = vmatpush3.msra.mxu1 %v3716_v16 }
 0x654   : > { %4187 = vmatprep.subr.mxu1 %v3731_v2 }
 0x655   : > { %4188 = vmatpush3.msra.mxu1 %v3715_v3 }
 0x656   : > { %4189 = vmatprep.subr.mxu1 %v3730_v27 }
 0x657   : > { %4190 = vmatpush3.msra.mxu1 %v3714_v22 }
 0x658   : > { %4191 = vmatprep.subr.mxu1 %v3729_v8 }
 0x659   : > { %4192 = vmatpush3.msra.mxu1 %v3713_v52 }
 0x65a   : > { %4193 = vmatprep.subr.mxu1 %v3728_v40 }
 0x65b   : > { %4194 = vmatpush3.msra.mxu1 %v3712_v19 }
 0x65c   : > { %4195 = vmatprep.subr.mxu1 %v3727_v9 }
 0x65d   : > { %4196 = vmatpush3.msra.mxu1 %v3711_v56 }
 0x65e   : > { %4197 = vmatprep.subr.mxu1 %v3726_v24 }
 0x65f   : > { %4198 = vmatpush3.msra.mxu1 %v3710_v61 }
 0x660   : > { %4199 = vmatprep.subr.mxu1 %v3725_v43 }
 0x661   : > { %4200 = vmatpush3.msra.mxu1 %v3709_v28 }
 0x67a   : > { %v3203_v17 = vpop.f32.mrf.mxu1  ;;  %v3274_v49 = vpop.f32.mrf.mxu0 }
 0x67b   : > { %v3204_v33 = vadd.f32 %v3203_v17, %v2844_v53 }
 0x67c   : > { %v3205_v23 = vpop.f32.mrf.mxu1  ;;  %v3276_v18 = vpop.f32.mrf.mxu0 }
 0x67d   : > { %v3206_v55 = vadd.f32 %v3205_v23, %v2848_v34  ;;  %v3275_v31 = vadd.f32 %v3274_v49, %v3204_v33 }
 0x67f   : > { %v3277_v25 = vadd.f32 %v3276_v18, %v3206_v55 }
 0x6bc   : > { %v3345_v32 = vpop.f32.mrf.mxu1  ;;  %v3416_v21 = vpop.f32.mrf.mxu0 }
 0x6bd   : > { %v3346_v38 = vadd.f32 %v3345_v32, %v3275_v31 }
 0x6be   : > { %v3347_v42 = vpop.f32.mrf.mxu1  ;;  %v3418_v51 = vpop.f32.mrf.mxu0 }
 0x6bf   : > { %v3348_v12 = vadd.f32 %v3347_v42, %v3277_v25  ;;  %v3417_v50 = vadd.f32 %v3416_v21, %v3346_v38 }
 0x6c1   : > { %v3419_v59 = vadd.f32 %v3418_v51, %v3348_v12  ;;  %v3423_v37 = vmax.f32 %v3417_v50, 0.0 }
 0x6c3   : > { %v3424_v47 = vmax.f32 %v3419_v59, 0.0 }
 0x6c5   : > { %3700 = vmatprep.mubr.f32.mxu0 %v3424_v47 }
 0x6c6   : > { %3701 = vmatmul.mubr.f32.vlgmr.msra.gmra.mxu0 %v3423_v37 }
 0x702   : > { %v3631_v29 = vpop.f32.mrf.mxu1 }
 0x703   : > { %v3632_v62 = vadd.f32 %v3631_v29, %v3558_v54 }
 0x704   : > { %v3633_v58 = vpop.f32.mrf.mxu1 }
 0x705   : > { %v3634_v0 = vadd.f32 %v3633_v58, %v3562_v57 }
 0x786   : > { %v3702_v63 = vpop.f32.mrf.mxu0 }
 0x787   : > { %v3703_v1 = vadd.f32 %v3702_v63, %v3632_v62 }
 0x788   : > { %v3704_v20 = vpop.f32.mrf.mxu0 }
 0x789   : > { %v3705_v26 = vadd.f32 %v3704_v20, %v3634_v0  ;;  %v3707_v35 = vmax.f32 %v3703_v1, 0.0 }
 0x78b   : > { %v3708_v30 = vmax.f32 %v3705_v26, 0.0 }
 0x78d   : > { %3806 = vmatprep.mubr.f32.mxu1 %v3708_v30 }
 0x78e   : > { %3807 = vmatmul.mubr.f32.vlgmr.msra.gmra.mxu1 %v3707_v35 }
 0x84e   : > { %v4201_v5 = vpop.f32.mrf.mxu1 }
 0x850   : > { %v4202_v39 = vpop.f32.mrf.mxu1 }
 0x851   : > { %v4203_v41 = vadd.f32 %v4202_v39, %v4201_v5 }
 0x853   : > { %v3809_v45 = vadd.f32 %v4203_v41, %v3741_v6 }
 0x855   : > { %3812 = vst [vmem:[%s778_s18] sm:$0x1] %v3809_v45 }
 0x856   : > { %5012 = shalt.err (!%p5009_p1)
}
 0x857   : > { %s5013_s2 = scalar_lea.hbm %s3824_s17, 16  ;;  %s5017_s24 = scalar_lea.hbm %s5948_s3, 32 }
 0x858   : > { %p5014_p2 = scmp.ne.s32.totalorder %s3824_s17, %s5013_s2  ;;  %p5018_p5 = scmp.lt.s32.totalorder %s3824_s17, %s5948_s3 }
 0x859   : > { %p5019_p6 = scmp.lt.s32.totalorder %s5017_s24, %s5013_s2 }
 0x85a   : > { %p5015_p3 = pnand %p5014_p2, %p5949_p7 }
 0x85b   : > { %p5020_p13 = por %p5019_p6, %p5018_p5 }
 0x85c   : > { %p5016_p8 = pneg %p5015_p3 }
 0x85e   : > { %p5021_p0 = pnand %p5020_p13, %p5016_p8 }
 0x860   : > { %5024 = shalt.err (!%p5021_p0)
}
 0x861   : > { %4400 = dma.vmem_to_hbm [thread:$0]  (%p5949_p7), %s3827_s21, 16, %s3824_s17, %s3814_s0  }
 0x862 PF: > { %s5950_s28 = sld [smem:[#allocation43_spill]] }
 0x863   : > { %s5951_s20 = sld [smem:[#allocation40_spill]] }
 0x864   : > { %s5952_s26 = sld [smem:[#allocation45_spill]] }
 0x868   : > { %p4487_p4 = scmp.ge.s32.totalorder %s5950_s28, 2 }
 0x869   : > { %s3838_s23 = sand.u32 1, %s5951_s20  }
 0x86a   : > { %p5953_p10 = scmp.ne.s32.totalorder %s5952_s26, 0  ;;  %s3839_s19 = scalar_lea.sflag [#allocation5], %s3838_s23 }
 0x86c   : > { %p4452_p11 = pnand %p4487_p4, %p5953_p10 }
 0x86e   : > { %p4453_p9 = pneg %p4452_p11 }
 0x870   : > { %5086 = dma.done.wait (%p4453_p9), %s3839_s19, 16  }
 0x871   : > { %5088 = vsyncadd (%p4453_p9), %s3839_s19, 4294967280  ;;  %s39_s29 = sadd.s32 1, %s5950_s28   ;;  %s5954_s27 = sld [smem:[#allocation41_spill]] }
 0x872   : > { %p36_p12 = scmp.ge.s32.totalorder %s39_s29, 4   ;;  %s5955_s26 = sld [smem:[#allocation46_spill]] }
 0x873   : > { %s5956_s1 = sld [smem:[#allocation42_spill]]  ;;  %s5958_s24 = smov %s5095_s25 }
 0x874   : > { %s5957_s28 = sld [smem:[#allocation44_spill]] }
 0x875   :  { %38 = sbr.rel (!%p36_p12) target bundleno = 19 (0x13), region = 196 }
 0x877   : > { %s5959_s25 = smov %s5954_s27 }
 0x879   : > { %s5960_s27 = smov %s5956_s1 }
 0x87a   :  { %3843 = vsyncpa [#allocation4], 1 }
 0x87b   :  { %3845 = vsyncpa [#allocation4 + $0x1], 1 }
 0x87c   :  { %3846 = vsyncpa [#allocation7], 1 }
 0x87d   :  { %3847 = vsyncpa [#allocation10], 1 }
 0x87e   :  { %3848 = vsyncpa [#allocation13], 1 }
 0x87f   :  { %3849 = vsyncpa [#allocation16], 1 }
 0x880   :  { %3850 = vsyncpa [#allocation19], 1 }
 0x881   :  { %3851 = vsyncpa [#allocation22], 1 }
 0x882   :  { %3852 = vsyncpa [#allocation25], 1 }
 0x883   :  { %3853 = vsyncpa [#allocation28], 1 }
 0x884   :  { %3854 = vsyncpa [#allocation5], 1 }
 0x885   :  { %3856 = vsyncpa [#allocation5 + $0x1], 1 }

</bundles_post_ra>
